<compile_context>
chip_gen: v6e
topology: v6e:2x2x1
jax: 0.10.0
libtpu: 0.0.40
codegen_flags: <defaults>
</compile_context>

<pallas_src>
import functools
import math

import jax
import jax.numpy as jnp
from jax.experimental import pallas as pl
from jax.experimental.pallas import tpu as pltpu


# ----------------------------------------------------------------------------
# Fused Pallas kernel: one grid step == one image's full forward pass
# ----------------------------------------------------------------------------
def _replicated_spec(arr):
    """Full-array block, same block for every grid step (stays VMEM-resident)."""
    nd = arr.ndim
    return pl.BlockSpec(arr.shape, lambda b, _nd=nd: (0,) * _nd)


def _vit_fused_kernel(patches_ref, conv_w_ref, base_ref,
                      ln1_g_ref, ln1_b_ref, qkv_w_ref, qkv_b_ref,
                      out_w_ref, out_b_ref, ln2_g_ref, ln2_b_ref,
                      w1_ref, b1_ref, w2_ref, b2_ref,
                      lnf_g_ref, lnf_b_ref, head_w_ref, head_b_ref,
                      o_ref, *, num_heads, seq_valid):
    f32 = jnp.float32
    D = conv_w_ref.shape[1]
    Dh = D // num_heads
    L = qkv_w_ref.shape[0]
    Spad = base_ref.shape[0]
    NPAD = head_w_ref.shape[1]
    scale = 1.0 / math.sqrt(Dh)
    inv_sqrt2 = 1.0 / math.sqrt(2.0)

    def layer_norm(x, g, b):
        mu = jnp.mean(x, axis=-1, keepdims=True)
        var = jnp.mean(jnp.square(x - mu), axis=-1, keepdims=True)
        return (x - mu) * jax.lax.rsqrt(var + 1e-6) * g + b   # torchvision ViT eps=1e-6

    # Mask for padded token positions: padded keys must never be attended to.
    col = jax.lax.broadcasted_iota(jnp.int32, (Spad, Spad), 1)
    key_bias = jnp.where(col < seq_valid, 0.0, -1e30).astype(f32)

    # Patch embedding.  `base` already contains class_token+pos[0] in row 0,
    # pos[1:]+conv_bias in rows 1..nP, zeros in padded rows; patch row 0 and
    # padded rows are zero, so one matmul + add builds the full token matrix.
    x = jnp.dot(patches_ref[0], conv_w_ref[...], preferred_element_type=f32) + base_ref[...]

    for l in range(L):                                   # unrolled at trace time
        # ---- attention sub-block (pre-norm) ----
        y = layer_norm(x, ln1_g_ref[l], ln1_b_ref[l])
        qkv = jnp.dot(y, qkv_w_ref[l], preferred_element_type=f32) + qkv_b_ref[l]
        q = qkv[:, 0:D] * scale          # fold 1/sqrt(Dh) into q (cheaper than SxS scale)
        k = qkv[:, D:2 * D]
        v = qkv[:, 2 * D:3 * D]
        w_out = out_w_ref[l]             # (D, D)
        att = None
        for h in range(num_heads):       # heads handled with static slices in VMEM
            lo, hi = h * Dh, (h + 1) * Dh
            qh, kh, vh = q[:, lo:hi], k[:, lo:hi], v[:, lo:hi]
            s = jax.lax.dot_general(qh, kh, (((1,), (1,)), ((), ())),
                                    preferred_element_type=f32)   # q @ k^T on the MXU
            s = s + key_bias
            s = s - jnp.max(s, axis=-1, keepdims=True)
            p = jnp.exp(s)
            p = p * pl.reciprocal(jnp.sum(p, axis=-1, keepdims=True), approx=True)
            oh = jnp.dot(p, vh, preferred_element_type=f32)       # (Spad, Dh)
            # concat-of-heads @ W_out  ==  sum_h oh @ W_out[rows of head h]
            contrib = jnp.dot(oh, w_out[lo:hi, :], preferred_element_type=f32)
            att = contrib if att is None else att + contrib
        x = x + att + out_b_ref[l]
        # ---- MLP sub-block (pre-norm), exact GELU ----
        y = layer_norm(x, ln2_g_ref[l], ln2_b_ref[l])
        hmid = jnp.dot(y, w1_ref[l], preferred_element_type=f32) + b1_ref[l]
        hmid = 0.5 * hmid * (1.0 + jax.lax.erf(hmid * inv_sqrt2))
        x = x + jnp.dot(hmid, w2_ref[l], preferred_element_type=f32) + b2_ref[l]

    # final LN, class-token pooling, lane-padded classification head
    xf = layer_norm(x, lnf_g_ref[...], lnf_b_ref[...])
    cls = xf[0:1, :]                                              # (1, D)
    logits = jnp.dot(cls, head_w_ref[...], preferred_element_type=f32) + head_b_ref[...]
    # single lane-dense (8, 128) store; wrapper slices row 0 / first num_classes
    o_ref[0] = jnp.broadcast_to(logits, (8, NPAD)).astype(o_ref.dtype)


# ----------------------------------------------------------------------------
# Parameters (synthetic, deterministic)
# ----------------------------------------------------------------------------
def init_params(key, cfg):
    C, p, D = cfg["channels"], cfg["patch"], cfg["hidden"]
    mlp_dim, L, ncls = cfg["mlp"], cfg["layers"], cfg["num_classes"]
    n_patches = (cfg["image"] // p) ** 2
    S = n_patches + 1

    def nrm(k, shape, scale=0.02):
        return scale * jax.random.normal(k, shape, jnp.float32)

    keys = iter(jax.random.split(key, 8 + 6 * L))
    params = {
        "conv_w": nrm(next(keys), (C * p * p, D)),
        "conv_b": jnp.zeros((D,), jnp.float32),
        "class_token": nrm(next(keys), (1, 1, D)),
        "pos_embedding": nrm(next(keys), (1, S, D)),
        "ln_g": jnp.ones((D,), jnp.float32),
        "ln_b": jnp.zeros((D,), jnp.float32),
        "head_w": nrm(next(keys), (D, ncls)),
        "head_b": jnp.zeros((ncls,), jnp.float32),
        "blocks": [],
    }
    for _ in range(L):
        params["blocks"].append({
            "ln1_g": jnp.ones((D,), jnp.float32),
            "ln1_b": jnp.zeros((D,), jnp.float32),
            "in_proj_w": nrm(next(keys), (D, 3 * D)),   # columns ordered [q | k | v]
            "in_proj_b": jnp.zeros((3 * D,), jnp.float32),
            "out_proj_w": nrm(next(keys), (D, D)),
            "out_proj_b": jnp.zeros((D,), jnp.float32),
            "ln2_g": jnp.ones((D,), jnp.float32),
            "ln2_b": jnp.zeros((D,), jnp.float32),
            "mlp_w1": nrm(next(keys), (D, mlp_dim)),
            "mlp_b1": jnp.zeros((mlp_dim,), jnp.float32),
            "mlp_w2": nrm(next(keys), (mlp_dim, D)),
            "mlp_b2": jnp.zeros((D,), jnp.float32),
        })
    return params


# ----------------------------------------------------------------------------
# Forward pass (wrapper: layout glue + one fused pallas_call)
# ----------------------------------------------------------------------------
def tiny_vit_forward(params, x_nchw, cfg):
    B, C, H, W = x_nchw.shape
    p = cfg["patch"]
    D, NH = cfg["hidden"], cfg["heads"]
    ncls = cfg["num_classes"]
    nH, nW = H // p, W // p
    nP = nH * nW
    S = nP + 1
    Spad = ((S + 7) // 8) * 8        # pad token axis to a sublane multiple (17 -> 24)
    Cpp = C * p * p
    NPAD = 128                       # lane-dense classifier output width

    # --- layout-only glue: patch extraction, padding, parameter packing ---
    # TODO(synk): at real vit_h_14 scale, fold patchification into the kernel via
    #             an index_map instead of this XLA transpose.
    patches = x_nchw.reshape(B, C, nH, p, nW, p).transpose(0, 2, 4, 1, 3, 5)
    patches = patches.reshape(B, nP, Cpp).astype(jnp.float32)
    patches_pad = jnp.zeros((B, Spad, Cpp), jnp.float32).at[:, 1:1 + nP, :].set(patches)

    # class token + positional embedding + conv bias folded into one additive base
    base = jnp.zeros((Spad, D), jnp.float32)
    base = base.at[0].set(params["class_token"][0, 0] + params["pos_embedding"][0, 0])
    base = base.at[1:1 + nP].set(params["pos_embedding"][0, 1:] + params["conv_b"][None, :])

    blocks = params["blocks"]
    stack_m = lambda name: jnp.stack([b[name] for b in blocks])              # (L, r, c)
    stack_v = lambda name: jnp.stack([b[name] for b in blocks])[:, None, :]  # (L, 1, c)

    ln1_g, ln1_b = stack_v("ln1_g"), stack_v("ln1_b")
    qkv_w, qkv_b = stack_m("in_proj_w"), stack_v("in_proj_b")
    out_w, out_b = stack_m("out_proj_w"), stack_v("out_proj_b")
    ln2_g, ln2_b = stack_v("ln2_g"), stack_v("ln2_b")
    w1, b1 = stack_m("mlp_w1"), stack_v("mlp_b1")
    w2, b2 = stack_m("mlp_w2"), stack_v("mlp_b2")

    lnf_g = params["ln_g"][None, :]
    lnf_b = params["ln_b"][None, :]
    head_w_pad = jnp.zeros((D, NPAD), jnp.float32).at[:, :ncls].set(params["head_w"])
    head_b_pad = jnp.zeros((1, NPAD), jnp.float32).at[:, :ncls].set(params["head_b"][None, :])

    operands = (patches_pad, params["conv_w"], base,
                ln1_g, ln1_b, qkv_w, qkv_b, out_w, out_b, ln2_g, ln2_b,
                w1, b1, w2, b2, lnf_g, lnf_b, head_w_pad, head_b_pad)

    in_specs = [pl.BlockSpec((1, Spad, Cpp), lambda b: (b, 0, 0))]   # per-image patches
    in_specs += [_replicated_spec(a) for a in operands[1:]]          # VMEM-resident weights

    out = pl.pallas_call(
        functools.partial(_vit_fused_kernel, num_heads=NH, seq_valid=S),
        out_shape=jax.ShapeDtypeStruct((B, 8, NPAD), jnp.float32),
        grid=(B,),
        in_specs=in_specs,
        out_specs=pl.BlockSpec((1, 8, NPAD), lambda b: (b, 0, 0)),
        compiler_params=pltpu.CompilerParams(dimension_semantics=("parallel",)),
    )(*operands)

    return out[:, 0, :ncls]                                          # (B, num_classes)


# ----------------------------------------------------------------------------
if __name__ == "__main__":
    cfg = dict(channels=3, image=16, patch=4, hidden=32, heads=4,
               mlp=64, layers=2, num_classes=4)
    key = jax.random.PRNGKey(0)
    pkey, xkey = jax.random.split(key)
    params = init_params(pkey, cfg)
    x = jax.random.normal(xkey, (2, cfg["channels"], cfg["image"], cfg["image"]),
                          jnp.float32)
    fwd = jax.jit(functools.partial(tiny_vit_forward, cfg=cfg))
    logits = fwd(params, x)
    jax.block_until_ready(logits)
    assert logits.shape == (2, cfg["num_classes"])
    assert logits.dtype == jnp.float32
    print("KERNEL_OK")
</pallas_src>

<mosaic_0001>
module attributes {stable_mosaic.version = 11 : i64} {
  func.func @_vit_fused_kernel(%arg0: i32, %arg1: memref<1x24x48xf32, #tpu.memory_space<vmem>>, %arg2: memref<48x32xf32, #tpu.memory_space<vmem>>, %arg3: memref<24x32xf32, #tpu.memory_space<vmem>>, %arg4: memref<2x1x32xf32, #tpu.memory_space<vmem>>, %arg5: memref<2x1x32xf32, #tpu.memory_space<vmem>>, %arg6: memref<2x32x96xf32, #tpu.memory_space<vmem>>, %arg7: memref<2x1x96xf32, #tpu.memory_space<vmem>>, %arg8: memref<2x32x32xf32, #tpu.memory_space<vmem>>, %arg9: memref<2x1x32xf32, #tpu.memory_space<vmem>>, %arg10: memref<2x1x32xf32, #tpu.memory_space<vmem>>, %arg11: memref<2x1x32xf32, #tpu.memory_space<vmem>>, %arg12: memref<2x32x64xf32, #tpu.memory_space<vmem>>, %arg13: memref<2x1x64xf32, #tpu.memory_space<vmem>>, %arg14: memref<2x64x32xf32, #tpu.memory_space<vmem>>, %arg15: memref<2x1x32xf32, #tpu.memory_space<vmem>>, %arg16: memref<1x32xf32, #tpu.memory_space<vmem>>, %arg17: memref<1x32xf32, #tpu.memory_space<vmem>>, %arg18: memref<32x128xf32, #tpu.memory_space<vmem>>, %arg19: memref<1x128xf32, #tpu.memory_space<vmem>>, %arg20: memref<1x8x128xf32, #tpu.memory_space<vmem>>) attributes {dimension_semantics = [#tpu.dimension_semantics<parallel>], iteration_bounds = array<i64: 2>, scalar_prefetch = 0 : i64, scratch_operands = 0 : i64, tpu.core_type = #tpu.core_type<tc>, window_params = [{transform_indices = @transform_0, window_bounds = array<i64: 1, 24, 48>}, {pipeline_mode = #tpu.pipeline_mode<synchronous>, transform_indices = @transform_1, window_bounds = array<i64: 48, 32>}, {pipeline_mode = #tpu.pipeline_mode<synchronous>, transform_indices = @transform_2, window_bounds = array<i64: 24, 32>}, {pipeline_mode = #tpu.pipeline_mode<synchronous>, transform_indices = @transform_3, window_bounds = array<i64: 2, 1, 32>}, {pipeline_mode = #tpu.pipeline_mode<synchronous>, transform_indices = @transform_4, window_bounds = array<i64: 2, 1, 32>}, {pipeline_mode = #tpu.pipeline_mode<synchronous>, transform_indices = @transform_5, window_bounds = array<i64: 2, 32, 96>}, {pipeline_mode = #tpu.pipeline_mode<synchronous>, transform_indices = @transform_6, window_bounds = array<i64: 2, 1, 96>}, {pipeline_mode = #tpu.pipeline_mode<synchronous>, transform_indices = @transform_7, window_bounds = array<i64: 2, 32, 32>}, {pipeline_mode = #tpu.pipeline_mode<synchronous>, transform_indices = @transform_8, window_bounds = array<i64: 2, 1, 32>}, {pipeline_mode = #tpu.pipeline_mode<synchronous>, transform_indices = @transform_9, window_bounds = array<i64: 2, 1, 32>}, {pipeline_mode = #tpu.pipeline_mode<synchronous>, transform_indices = @transform_10, window_bounds = array<i64: 2, 1, 32>}, {pipeline_mode = #tpu.pipeline_mode<synchronous>, transform_indices = @transform_11, window_bounds = array<i64: 2, 32, 64>}, {pipeline_mode = #tpu.pipeline_mode<synchronous>, transform_indices = @transform_12, window_bounds = array<i64: 2, 1, 64>}, {pipeline_mode = #tpu.pipeline_mode<synchronous>, transform_indices = @transform_13, window_bounds = array<i64: 2, 64, 32>}, {pipeline_mode = #tpu.pipeline_mode<synchronous>, transform_indices = @transform_14, window_bounds = array<i64: 2, 1, 32>}, {pipeline_mode = #tpu.pipeline_mode<synchronous>, transform_indices = @transform_15, window_bounds = array<i64: 1, 32>}, {pipeline_mode = #tpu.pipeline_mode<synchronous>, transform_indices = @transform_16, window_bounds = array<i64: 1, 32>}, {pipeline_mode = #tpu.pipeline_mode<synchronous>, transform_indices = @transform_17, window_bounds = array<i64: 32, 128>}, {pipeline_mode = #tpu.pipeline_mode<synchronous>, transform_indices = @transform_18, window_bounds = array<i64: 1, 128>}, {transform_indices = @transform_19, window_bounds = array<i64: 1, 8, 128>}]} {
    %0 = tpu.iota {dimensions = array<i32: 1>} : vector<24x24xi32>
    %c17_i32 = arith.constant 17 : i32
    %1 = vector.broadcast %c17_i32 : i32 to vector<24x24xi32>
    %2 = arith.cmpi slt, %0, %1 : vector<24x24xi32>
    %cst = arith.constant 0.000000e+00 : f32
    %cst_0 = arith.constant -1.000000e+30 : f32
    %3 = vector.broadcast %cst : f32 to vector<24x24xf32>
    %4 = vector.broadcast %cst_0 : f32 to vector<24x24xf32>
    %5 = arith.select %2, %3, %4 : vector<24x24xi1>, vector<24x24xf32>
    %c0 = arith.constant 0 : index
    %c0_1 = arith.constant 0 : index
    %c0_2 = arith.constant 0 : index
    %6 = vector.load %arg1[%c0, %c0_1, %c0_2] : memref<1x24x48xf32, #tpu.memory_space<vmem>>, vector<1x24x48xf32>
    %7 = vector.shape_cast %6 : vector<1x24x48xf32> to vector<24x48xf32>
    %c0_3 = arith.constant 0 : index
    %c0_4 = arith.constant 0 : index
    %8 = vector.load %arg2[%c0_3, %c0_4] : memref<48x32xf32, #tpu.memory_space<vmem>>, vector<48x32xf32>
    %cst_5 = arith.constant dense<0.000000e+00> : vector<24x32xf32>
    %9 = tpu.matmul %7, %8, %cst_5 {dimension_numbers = #tpu.dot_dimension_numbers<[1], [0], [0], [1], [0, 0, 1, 1], [], []>} : vector<24x48xf32>, vector<48x32xf32>, vector<24x32xf32> -> vector<24x32xf32>
    %c0_6 = arith.constant 0 : index
    %c0_7 = arith.constant 0 : index
    %10 = vector.load %arg3[%c0_6, %c0_7] : memref<24x32xf32, #tpu.memory_space<vmem>>, vector<24x32xf32>
    %11 = arith.addf %9, %10 : vector<24x32xf32>
    %c0_8 = arith.constant 0 : index
    %c0_9 = arith.constant 0 : index
    %c0_10 = arith.constant 0 : index
    %12 = vector.load %arg4[%c0_8, %c0_9, %c0_10] : memref<2x1x32xf32, #tpu.memory_space<vmem>>, vector<1x1x32xf32>
    %13 = vector.shape_cast %12 : vector<1x1x32xf32> to vector<1x32xf32>
    %c0_11 = arith.constant 0 : index
    %c0_12 = arith.constant 0 : index
    %c0_13 = arith.constant 0 : index
    %14 = vector.load %arg5[%c0_11, %c0_12, %c0_13] : memref<2x1x32xf32, #tpu.memory_space<vmem>>, vector<1x1x32xf32>
    %15 = vector.shape_cast %14 : vector<1x1x32xf32> to vector<1x32xf32>
    %cst_14 = arith.constant dense<0.000000e+00> : vector<24xf32>
    %16 = vector.multi_reduction <add>, %11, %cst_14 [1] : vector<24x32xf32> to vector<24xf32>
    %17 = vector.shape_cast %16 : vector<24xf32> to vector<24x1xf32>
    %cst_15 = arith.constant 3.200000e+01 : f32
    %18 = vector.broadcast %cst_15 : f32 to vector<24x1xf32>
    %19 = arith.divf %17, %18 : vector<24x1xf32>
    %20 = vector.broadcast %19 : vector<24x1xf32> to vector<24x32xf32>
    %21 = arith.subf %11, %20 : vector<24x32xf32>
    %22 = arith.mulf %21, %21 : vector<24x32xf32>
    %cst_16 = arith.constant dense<0.000000e+00> : vector<24xf32>
    %23 = vector.multi_reduction <add>, %22, %cst_16 [1] : vector<24x32xf32> to vector<24xf32>
    %24 = vector.shape_cast %23 : vector<24xf32> to vector<24x1xf32>
    %cst_17 = arith.constant 3.200000e+01 : f32
    %25 = vector.broadcast %cst_17 : f32 to vector<24x1xf32>
    %26 = arith.divf %24, %25 : vector<24x1xf32>
    %27 = vector.broadcast %19 : vector<24x1xf32> to vector<24x32xf32>
    %28 = arith.subf %11, %27 : vector<24x32xf32>
    %cst_18 = arith.constant 9.99999997E-7 : f32
    %29 = vector.broadcast %cst_18 : f32 to vector<24x1xf32>
    %30 = arith.addf %26, %29 : vector<24x1xf32>
    %31 = math.rsqrt %30 : vector<24x1xf32>
    %32 = vector.broadcast %31 : vector<24x1xf32> to vector<24x32xf32>
    %33 = arith.mulf %28, %32 : vector<24x32xf32>
    %34 = vector.broadcast %13 : vector<1x32xf32> to vector<24x32xf32>
    %35 = arith.mulf %33, %34 : vector<24x32xf32>
    %36 = vector.broadcast %15 : vector<1x32xf32> to vector<24x32xf32>
    %37 = arith.addf %35, %36 : vector<24x32xf32>
    %c0_19 = arith.constant 0 : index
    %c0_20 = arith.constant 0 : index
    %c0_21 = arith.constant 0 : index
    %38 = vector.load %arg6[%c0_19, %c0_20, %c0_21] : memref<2x32x96xf32, #tpu.memory_space<vmem>>, vector<1x32x96xf32>
    %39 = vector.shape_cast %38 : vector<1x32x96xf32> to vector<32x96xf32>
    %cst_22 = arith.constant dense<0.000000e+00> : vector<24x96xf32>
    %40 = tpu.matmul %37, %39, %cst_22 {dimension_numbers = #tpu.dot_dimension_numbers<[1], [0], [0], [1], [0, 0, 1, 1], [], []>} : vector<24x32xf32>, vector<32x96xf32>, vector<24x96xf32> -> vector<24x96xf32>
    %c0_23 = arith.constant 0 : index
    %c0_24 = arith.constant 0 : index
    %c0_25 = arith.constant 0 : index
    %41 = vector.load %arg7[%c0_23, %c0_24, %c0_25] : memref<2x1x96xf32, #tpu.memory_space<vmem>>, vector<1x1x96xf32>
    %42 = vector.shape_cast %41 : vector<1x1x96xf32> to vector<1x96xf32>
    %43 = vector.broadcast %42 : vector<1x96xf32> to vector<24x96xf32>
    %44 = arith.addf %40, %43 : vector<24x96xf32>
    %45 = vector.extract_strided_slice %44 {offsets = [0, 0], sizes = [24, 32], strides = [1, 1]} : vector<24x96xf32> to vector<24x32xf32>
    %cst_26 = arith.constant 0.353553385 : f32
    %46 = vector.broadcast %cst_26 : f32 to vector<24x32xf32>
    %47 = arith.mulf %45, %46 : vector<24x32xf32>
    %48 = vector.extract_strided_slice %44 {offsets = [0, 32], sizes = [24, 32], strides = [1, 1]} : vector<24x96xf32> to vector<24x32xf32>
    %49 = vector.extract_strided_slice %44 {offsets = [0, 64], sizes = [24, 32], strides = [1, 1]} : vector<24x96xf32> to vector<24x32xf32>
    %c0_27 = arith.constant 0 : index
    %c0_28 = arith.constant 0 : index
    %c0_29 = arith.constant 0 : index
    %50 = vector.load %arg8[%c0_27, %c0_28, %c0_29] : memref<2x32x32xf32, #tpu.memory_space<vmem>>, vector<1x32x32xf32>
    %51 = vector.shape_cast %50 : vector<1x32x32xf32> to vector<32x32xf32>
    %52 = vector.extract_strided_slice %47 {offsets = [0, 0], sizes = [24, 8], strides = [1, 1]} : vector<24x32xf32> to vector<24x8xf32>
    %53 = vector.extract_strided_slice %48 {offsets = [0, 0], sizes = [24, 8], strides = [1, 1]} : vector<24x32xf32> to vector<24x8xf32>
    %54 = vector.extract_strided_slice %49 {offsets = [0, 0], sizes = [24, 8], strides = [1, 1]} : vector<24x32xf32> to vector<24x8xf32>
    %cst_30 = arith.constant dense<0.000000e+00> : vector<24x24xf32>
    %55 = tpu.matmul %52, %53, %cst_30 {dimension_numbers = #tpu.dot_dimension_numbers<[1], [1], [0], [0], [0, 0, 1, 0], [], []>} : vector<24x8xf32>, vector<24x8xf32>, vector<24x24xf32> -> vector<24x24xf32>
    %56 = arith.addf %55, %5 : vector<24x24xf32>
    %cst_31 = arith.constant dense<0xFF800000> : vector<24xf32>
    %57 = vector.multi_reduction <maximumf>, %56, %cst_31 [1] : vector<24x24xf32> to vector<24xf32>
    %58 = vector.shape_cast %57 : vector<24xf32> to vector<24x1xf32>
    %59 = vector.broadcast %58 : vector<24x1xf32> to vector<24x24xf32>
    %60 = arith.subf %56, %59 : vector<24x24xf32>
    %61 = math.exp %60 : vector<24x24xf32>
    %cst_32 = arith.constant dense<0.000000e+00> : vector<24xf32>
    %62 = vector.multi_reduction <add>, %61, %cst_32 [1] : vector<24x24xf32> to vector<24xf32>
    %63 = vector.shape_cast %62 : vector<24xf32> to vector<24x1xf32>
    %64 = tpu.reciprocal %63 {approx = true} : vector<24x1xf32> -> vector<24x1xf32>
    %65 = vector.broadcast %64 : vector<24x1xf32> to vector<24x24xf32>
    %66 = arith.mulf %61, %65 : vector<24x24xf32>
    %cst_33 = arith.constant dense<0.000000e+00> : vector<24x8xf32>
    %67 = tpu.matmul %66, %54, %cst_33 {dimension_numbers = #tpu.dot_dimension_numbers<[1], [0], [0], [1], [0, 0, 1, 1], [], []>} : vector<24x24xf32>, vector<24x8xf32>, vector<24x8xf32> -> vector<24x8xf32>
    %68 = vector.extract_strided_slice %51 {offsets = [0, 0], sizes = [8, 32], strides = [1, 1]} : vector<32x32xf32> to vector<8x32xf32>
    %cst_34 = arith.constant dense<0.000000e+00> : vector<24x32xf32>
    %69 = tpu.matmul %67, %68, %cst_34 {dimension_numbers = #tpu.dot_dimension_numbers<[1], [0], [0], [1], [0, 0, 1, 1], [], []>} : vector<24x8xf32>, vector<8x32xf32>, vector<24x32xf32> -> vector<24x32xf32>
    %70 = vector.extract_strided_slice %47 {offsets = [0, 8], sizes = [24, 8], strides = [1, 1]} : vector<24x32xf32> to vector<24x8xf32>
    %71 = vector.extract_strided_slice %48 {offsets = [0, 8], sizes = [24, 8], strides = [1, 1]} : vector<24x32xf32> to vector<24x8xf32>
    %72 = vector.extract_strided_slice %49 {offsets = [0, 8], sizes = [24, 8], strides = [1, 1]} : vector<24x32xf32> to vector<24x8xf32>
    %cst_35 = arith.constant dense<0.000000e+00> : vector<24x24xf32>
    %73 = tpu.matmul %70, %71, %cst_35 {dimension_numbers = #tpu.dot_dimension_numbers<[1], [1], [0], [0], [0, 0, 1, 0], [], []>} : vector<24x8xf32>, vector<24x8xf32>, vector<24x24xf32> -> vector<24x24xf32>
    %74 = arith.addf %73, %5 : vector<24x24xf32>
    %cst_36 = arith.constant dense<0xFF800000> : vector<24xf32>
    %75 = vector.multi_reduction <maximumf>, %74, %cst_36 [1] : vector<24x24xf32> to vector<24xf32>
    %76 = vector.shape_cast %75 : vector<24xf32> to vector<24x1xf32>
    %77 = vector.broadcast %76 : vector<24x1xf32> to vector<24x24xf32>
    %78 = arith.subf %74, %77 : vector<24x24xf32>
    %79 = math.exp %78 : vector<24x24xf32>
    %cst_37 = arith.constant dense<0.000000e+00> : vector<24xf32>
    %80 = vector.multi_reduction <add>, %79, %cst_37 [1] : vector<24x24xf32> to vector<24xf32>
    %81 = vector.shape_cast %80 : vector<24xf32> to vector<24x1xf32>
    %82 = tpu.reciprocal %81 {approx = true} : vector<24x1xf32> -> vector<24x1xf32>
    %83 = vector.broadcast %82 : vector<24x1xf32> to vector<24x24xf32>
    %84 = arith.mulf %79, %83 : vector<24x24xf32>
    %cst_38 = arith.constant dense<0.000000e+00> : vector<24x8xf32>
    %85 = tpu.matmul %84, %72, %cst_38 {dimension_numbers = #tpu.dot_dimension_numbers<[1], [0], [0], [1], [0, 0, 1, 1], [], []>} : vector<24x24xf32>, vector<24x8xf32>, vector<24x8xf32> -> vector<24x8xf32>
    %86 = vector.extract_strided_slice %51 {offsets = [8, 0], sizes = [8, 32], strides = [1, 1]} : vector<32x32xf32> to vector<8x32xf32>
    %cst_39 = arith.constant dense<0.000000e+00> : vector<24x32xf32>
    %87 = tpu.matmul %85, %86, %cst_39 {dimension_numbers = #tpu.dot_dimension_numbers<[1], [0], [0], [1], [0, 0, 1, 1], [], []>} : vector<24x8xf32>, vector<8x32xf32>, vector<24x32xf32> -> vector<24x32xf32>
    %88 = arith.addf %69, %87 : vector<24x32xf32>
    %89 = vector.extract_strided_slice %47 {offsets = [0, 16], sizes = [24, 8], strides = [1, 1]} : vector<24x32xf32> to vector<24x8xf32>
    %90 = vector.extract_strided_slice %48 {offsets = [0, 16], sizes = [24, 8], strides = [1, 1]} : vector<24x32xf32> to vector<24x8xf32>
    %91 = vector.extract_strided_slice %49 {offsets = [0, 16], sizes = [24, 8], strides = [1, 1]} : vector<24x32xf32> to vector<24x8xf32>
    %cst_40 = arith.constant dense<0.000000e+00> : vector<24x24xf32>
    %92 = tpu.matmul %89, %90, %cst_40 {dimension_numbers = #tpu.dot_dimension_numbers<[1], [1], [0], [0], [0, 0, 1, 0], [], []>} : vector<24x8xf32>, vector<24x8xf32>, vector<24x24xf32> -> vector<24x24xf32>
    %93 = arith.addf %92, %5 : vector<24x24xf32>
    %cst_41 = arith.constant dense<0xFF800000> : vector<24xf32>
    %94 = vector.multi_reduction <maximumf>, %93, %cst_41 [1] : vector<24x24xf32> to vector<24xf32>
    %95 = vector.shape_cast %94 : vector<24xf32> to vector<24x1xf32>
    %96 = vector.broadcast %95 : vector<24x1xf32> to vector<24x24xf32>
    %97 = arith.subf %93, %96 : vector<24x24xf32>
    %98 = math.exp %97 : vector<24x24xf32>
    %cst_42 = arith.constant dense<0.000000e+00> : vector<24xf32>
    %99 = vector.multi_reduction <add>, %98, %cst_42 [1] : vector<24x24xf32> to vector<24xf32>
    %100 = vector.shape_cast %99 : vector<24xf32> to vector<24x1xf32>
    %101 = tpu.reciprocal %100 {approx = true} : vector<24x1xf32> -> vector<24x1xf32>
    %102 = vector.broadcast %101 : vector<24x1xf32> to vector<24x24xf32>
    %103 = arith.mulf %98, %102 : vector<24x24xf32>
    %cst_43 = arith.constant dense<0.000000e+00> : vector<24x8xf32>
    %104 = tpu.matmul %103, %91, %cst_43 {dimension_numbers = #tpu.dot_dimension_numbers<[1], [0], [0], [1], [0, 0, 1, 1], [], []>} : vector<24x24xf32>, vector<24x8xf32>, vector<24x8xf32> -> vector<24x8xf32>
    %105 = vector.extract_strided_slice %51 {offsets = [16, 0], sizes = [8, 32], strides = [1, 1]} : vector<32x32xf32> to vector<8x32xf32>
    %cst_44 = arith.constant dense<0.000000e+00> : vector<24x32xf32>
    %106 = tpu.matmul %104, %105, %cst_44 {dimension_numbers = #tpu.dot_dimension_numbers<[1], [0], [0], [1], [0, 0, 1, 1], [], []>} : vector<24x8xf32>, vector<8x32xf32>, vector<24x32xf32> -> vector<24x32xf32>
    %107 = arith.addf %88, %106 : vector<24x32xf32>
    %108 = vector.extract_strided_slice %47 {offsets = [0, 24], sizes = [24, 8], strides = [1, 1]} : vector<24x32xf32> to vector<24x8xf32>
    %109 = vector.extract_strided_slice %48 {offsets = [0, 24], sizes = [24, 8], strides = [1, 1]} : vector<24x32xf32> to vector<24x8xf32>
    %110 = vector.extract_strided_slice %49 {offsets = [0, 24], sizes = [24, 8], strides = [1, 1]} : vector<24x32xf32> to vector<24x8xf32>
    %cst_45 = arith.constant dense<0.000000e+00> : vector<24x24xf32>
    %111 = tpu.matmul %108, %109, %cst_45 {dimension_numbers = #tpu.dot_dimension_numbers<[1], [1], [0], [0], [0, 0, 1, 0], [], []>} : vector<24x8xf32>, vector<24x8xf32>, vector<24x24xf32> -> vector<24x24xf32>
    %112 = arith.addf %111, %5 : vector<24x24xf32>
    %cst_46 = arith.constant dense<0xFF800000> : vector<24xf32>
    %113 = vector.multi_reduction <maximumf>, %112, %cst_46 [1] : vector<24x24xf32> to vector<24xf32>
    %114 = vector.shape_cast %113 : vector<24xf32> to vector<24x1xf32>
    %115 = vector.broadcast %114 : vector<24x1xf32> to vector<24x24xf32>
    %116 = arith.subf %112, %115 : vector<24x24xf32>
    %117 = math.exp %116 : vector<24x24xf32>
    %cst_47 = arith.constant dense<0.000000e+00> : vector<24xf32>
    %118 = vector.multi_reduction <add>, %117, %cst_47 [1] : vector<24x24xf32> to vector<24xf32>
    %119 = vector.shape_cast %118 : vector<24xf32> to vector<24x1xf32>
    %120 = tpu.reciprocal %119 {approx = true} : vector<24x1xf32> -> vector<24x1xf32>
    %121 = vector.broadcast %120 : vector<24x1xf32> to vector<24x24xf32>
    %122 = arith.mulf %117, %121 : vector<24x24xf32>
    %cst_48 = arith.constant dense<0.000000e+00> : vector<24x8xf32>
    %123 = tpu.matmul %122, %110, %cst_48 {dimension_numbers = #tpu.dot_dimension_numbers<[1], [0], [0], [1], [0, 0, 1, 1], [], []>} : vector<24x24xf32>, vector<24x8xf32>, vector<24x8xf32> -> vector<24x8xf32>
    %124 = vector.extract_strided_slice %51 {offsets = [24, 0], sizes = [8, 32], strides = [1, 1]} : vector<32x32xf32> to vector<8x32xf32>
    %cst_49 = arith.constant dense<0.000000e+00> : vector<24x32xf32>
    %125 = tpu.matmul %123, %124, %cst_49 {dimension_numbers = #tpu.dot_dimension_numbers<[1], [0], [0], [1], [0, 0, 1, 1], [], []>} : vector<24x8xf32>, vector<8x32xf32>, vector<24x32xf32> -> vector<24x32xf32>
    %126 = arith.addf %107, %125 : vector<24x32xf32>
    %127 = arith.addf %11, %126 : vector<24x32xf32>
    %c0_50 = arith.constant 0 : index
    %c0_51 = arith.constant 0 : index
    %c0_52 = arith.constant 0 : index
    %128 = vector.load %arg9[%c0_50, %c0_51, %c0_52] : memref<2x1x32xf32, #tpu.memory_space<vmem>>, vector<1x1x32xf32>
    %129 = vector.shape_cast %128 : vector<1x1x32xf32> to vector<1x32xf32>
    %130 = vector.broadcast %129 : vector<1x32xf32> to vector<24x32xf32>
    %131 = arith.addf %127, %130 : vector<24x32xf32>
    %c0_53 = arith.constant 0 : index
    %c0_54 = arith.constant 0 : index
    %c0_55 = arith.constant 0 : index
    %132 = vector.load %arg10[%c0_53, %c0_54, %c0_55] : memref<2x1x32xf32, #tpu.memory_space<vmem>>, vector<1x1x32xf32>
    %133 = vector.shape_cast %132 : vector<1x1x32xf32> to vector<1x32xf32>
    %c0_56 = arith.constant 0 : index
    %c0_57 = arith.constant 0 : index
    %c0_58 = arith.constant 0 : index
    %134 = vector.load %arg11[%c0_56, %c0_57, %c0_58] : memref<2x1x32xf32, #tpu.memory_space<vmem>>, vector<1x1x32xf32>
    %135 = vector.shape_cast %134 : vector<1x1x32xf32> to vector<1x32xf32>
    %cst_59 = arith.constant dense<0.000000e+00> : vector<24xf32>
    %136 = vector.multi_reduction <add>, %131, %cst_59 [1] : vector<24x32xf32> to vector<24xf32>
    %137 = vector.shape_cast %136 : vector<24xf32> to vector<24x1xf32>
    %cst_60 = arith.constant 3.200000e+01 : f32
    %138 = vector.broadcast %cst_60 : f32 to vector<24x1xf32>
    %139 = arith.divf %137, %138 : vector<24x1xf32>
    %140 = vector.broadcast %139 : vector<24x1xf32> to vector<24x32xf32>
    %141 = arith.subf %131, %140 : vector<24x32xf32>
    %142 = arith.mulf %141, %141 : vector<24x32xf32>
    %cst_61 = arith.constant dense<0.000000e+00> : vector<24xf32>
    %143 = vector.multi_reduction <add>, %142, %cst_61 [1] : vector<24x32xf32> to vector<24xf32>
    %144 = vector.shape_cast %143 : vector<24xf32> to vector<24x1xf32>
    %cst_62 = arith.constant 3.200000e+01 : f32
    %145 = vector.broadcast %cst_62 : f32 to vector<24x1xf32>
    %146 = arith.divf %144, %145 : vector<24x1xf32>
    %147 = vector.broadcast %139 : vector<24x1xf32> to vector<24x32xf32>
    %148 = arith.subf %131, %147 : vector<24x32xf32>
    %cst_63 = arith.constant 9.99999997E-7 : f32
    %149 = vector.broadcast %cst_63 : f32 to vector<24x1xf32>
    %150 = arith.addf %146, %149 : vector<24x1xf32>
    %151 = math.rsqrt %150 : vector<24x1xf32>
    %152 = vector.broadcast %151 : vector<24x1xf32> to vector<24x32xf32>
    %153 = arith.mulf %148, %152 : vector<24x32xf32>
    %154 = vector.broadcast %133 : vector<1x32xf32> to vector<24x32xf32>
    %155 = arith.mulf %153, %154 : vector<24x32xf32>
    %156 = vector.broadcast %135 : vector<1x32xf32> to vector<24x32xf32>
    %157 = arith.addf %155, %156 : vector<24x32xf32>
    %c0_64 = arith.constant 0 : index
    %c0_65 = arith.constant 0 : index
    %c0_66 = arith.constant 0 : index
    %158 = vector.load %arg12[%c0_64, %c0_65, %c0_66] : memref<2x32x64xf32, #tpu.memory_space<vmem>>, vector<1x32x64xf32>
    %159 = vector.shape_cast %158 : vector<1x32x64xf32> to vector<32x64xf32>
    %cst_67 = arith.constant dense<0.000000e+00> : vector<24x64xf32>
    %160 = tpu.matmul %157, %159, %cst_67 {dimension_numbers = #tpu.dot_dimension_numbers<[1], [0], [0], [1], [0, 0, 1, 1], [], []>} : vector<24x32xf32>, vector<32x64xf32>, vector<24x64xf32> -> vector<24x64xf32>
    %c0_68 = arith.constant 0 : index
    %c0_69 = arith.constant 0 : index
    %c0_70 = arith.constant 0 : index
    %161 = vector.load %arg13[%c0_68, %c0_69, %c0_70] : memref<2x1x64xf32, #tpu.memory_space<vmem>>, vector<1x1x64xf32>
    %162 = vector.shape_cast %161 : vector<1x1x64xf32> to vector<1x64xf32>
    %163 = vector.broadcast %162 : vector<1x64xf32> to vector<24x64xf32>
    %164 = arith.addf %160, %163 : vector<24x64xf32>
    %cst_71 = arith.constant 5.000000e-01 : f32
    %165 = vector.broadcast %cst_71 : f32 to vector<24x64xf32>
    %166 = arith.mulf %165, %164 : vector<24x64xf32>
    %cst_72 = arith.constant 0.707106769 : f32
    %167 = vector.broadcast %cst_72 : f32 to vector<24x64xf32>
    %168 = arith.mulf %164, %167 : vector<24x64xf32>
    %169 = math.erf %168 : vector<24x64xf32>
    %cst_73 = arith.constant 1.000000e+00 : f32
    %170 = vector.broadcast %cst_73 : f32 to vector<24x64xf32>
    %171 = arith.addf %170, %169 : vector<24x64xf32>
    %172 = arith.mulf %166, %171 : vector<24x64xf32>
    %c0_74 = arith.constant 0 : index
    %c0_75 = arith.constant 0 : index
    %c0_76 = arith.constant 0 : index
    %173 = vector.load %arg14[%c0_74, %c0_75, %c0_76] : memref<2x64x32xf32, #tpu.memory_space<vmem>>, vector<1x64x32xf32>
    %174 = vector.shape_cast %173 : vector<1x64x32xf32> to vector<64x32xf32>
    %cst_77 = arith.constant dense<0.000000e+00> : vector<24x32xf32>
    %175 = tpu.matmul %172, %174, %cst_77 {dimension_numbers = #tpu.dot_dimension_numbers<[1], [0], [0], [1], [0, 0, 1, 1], [], []>} : vector<24x64xf32>, vector<64x32xf32>, vector<24x32xf32> -> vector<24x32xf32>
    %176 = arith.addf %131, %175 : vector<24x32xf32>
    %c0_78 = arith.constant 0 : index
    %c0_79 = arith.constant 0 : index
    %c0_80 = arith.constant 0 : index
    %177 = vector.load %arg15[%c0_78, %c0_79, %c0_80] : memref<2x1x32xf32, #tpu.memory_space<vmem>>, vector<1x1x32xf32>
    %178 = vector.shape_cast %177 : vector<1x1x32xf32> to vector<1x32xf32>
    %179 = vector.broadcast %178 : vector<1x32xf32> to vector<24x32xf32>
    %180 = arith.addf %176, %179 : vector<24x32xf32>
    %c1 = arith.constant 1 : index
    %c0_81 = arith.constant 0 : index
    %c0_82 = arith.constant 0 : index
    %181 = vector.load %arg4[%c1, %c0_81, %c0_82] : memref<2x1x32xf32, #tpu.memory_space<vmem>>, vector<1x1x32xf32>
    %182 = vector.shape_cast %181 : vector<1x1x32xf32> to vector<1x32xf32>
    %c1_83 = arith.constant 1 : index
    %c0_84 = arith.constant 0 : index
    %c0_85 = arith.constant 0 : index
    %183 = vector.load %arg5[%c1_83, %c0_84, %c0_85] : memref<2x1x32xf32, #tpu.memory_space<vmem>>, vector<1x1x32xf32>
    %184 = vector.shape_cast %183 : vector<1x1x32xf32> to vector<1x32xf32>
    %cst_86 = arith.constant dense<0.000000e+00> : vector<24xf32>
    %185 = vector.multi_reduction <add>, %180, %cst_86 [1] : vector<24x32xf32> to vector<24xf32>
    %186 = vector.shape_cast %185 : vector<24xf32> to vector<24x1xf32>
    %cst_87 = arith.constant 3.200000e+01 : f32
    %187 = vector.broadcast %cst_87 : f32 to vector<24x1xf32>
    %188 = arith.divf %186, %187 : vector<24x1xf32>
    %189 = vector.broadcast %188 : vector<24x1xf32> to vector<24x32xf32>
    %190 = arith.subf %180, %189 : vector<24x32xf32>
    %191 = arith.mulf %190, %190 : vector<24x32xf32>
    %cst_88 = arith.constant dense<0.000000e+00> : vector<24xf32>
    %192 = vector.multi_reduction <add>, %191, %cst_88 [1] : vector<24x32xf32> to vector<24xf32>
    %193 = vector.shape_cast %192 : vector<24xf32> to vector<24x1xf32>
    %cst_89 = arith.constant 3.200000e+01 : f32
    %194 = vector.broadcast %cst_89 : f32 to vector<24x1xf32>
    %195 = arith.divf %193, %194 : vector<24x1xf32>
    %196 = vector.broadcast %188 : vector<24x1xf32> to vector<24x32xf32>
    %197 = arith.subf %180, %196 : vector<24x32xf32>
    %cst_90 = arith.constant 9.99999997E-7 : f32
    %198 = vector.broadcast %cst_90 : f32 to vector<24x1xf32>
    %199 = arith.addf %195, %198 : vector<24x1xf32>
    %200 = math.rsqrt %199 : vector<24x1xf32>
    %201 = vector.broadcast %200 : vector<24x1xf32> to vector<24x32xf32>
    %202 = arith.mulf %197, %201 : vector<24x32xf32>
    %203 = vector.broadcast %182 : vector<1x32xf32> to vector<24x32xf32>
    %204 = arith.mulf %202, %203 : vector<24x32xf32>
    %205 = vector.broadcast %184 : vector<1x32xf32> to vector<24x32xf32>
    %206 = arith.addf %204, %205 : vector<24x32xf32>
    %c1_91 = arith.constant 1 : index
    %c0_92 = arith.constant 0 : index
    %c0_93 = arith.constant 0 : index
    %207 = vector.load %arg6[%c1_91, %c0_92, %c0_93] : memref<2x32x96xf32, #tpu.memory_space<vmem>>, vector<1x32x96xf32>
    %208 = vector.shape_cast %207 : vector<1x32x96xf32> to vector<32x96xf32>
    %cst_94 = arith.constant dense<0.000000e+00> : vector<24x96xf32>
    %209 = tpu.matmul %206, %208, %cst_94 {dimension_numbers = #tpu.dot_dimension_numbers<[1], [0], [0], [1], [0, 0, 1, 1], [], []>} : vector<24x32xf32>, vector<32x96xf32>, vector<24x96xf32> -> vector<24x96xf32>
    %c1_95 = arith.constant 1 : index
    %c0_96 = arith.constant 0 : index
    %c0_97 = arith.constant 0 : index
    %210 = vector.load %arg7[%c1_95, %c0_96, %c0_97] : memref<2x1x96xf32, #tpu.memory_space<vmem>>, vector<1x1x96xf32>
    %211 = vector.shape_cast %210 : vector<1x1x96xf32> to vector<1x96xf32>
    %212 = vector.broadcast %211 : vector<1x96xf32> to vector<24x96xf32>
    %213 = arith.addf %209, %212 : vector<24x96xf32>
    %214 = vector.extract_strided_slice %213 {offsets = [0, 0], sizes = [24, 32], strides = [1, 1]} : vector<24x96xf32> to vector<24x32xf32>
    %cst_98 = arith.constant 0.353553385 : f32
    %215 = vector.broadcast %cst_98 : f32 to vector<24x32xf32>
    %216 = arith.mulf %214, %215 : vector<24x32xf32>
    %217 = vector.extract_strided_slice %213 {offsets = [0, 32], sizes = [24, 32], strides = [1, 1]} : vector<24x96xf32> to vector<24x32xf32>
    %218 = vector.extract_strided_slice %213 {offsets = [0, 64], sizes = [24, 32], strides = [1, 1]} : vector<24x96xf32> to vector<24x32xf32>
    %c1_99 = arith.constant 1 : index
    %c0_100 = arith.constant 0 : index
    %c0_101 = arith.constant 0 : index
    %219 = vector.load %arg8[%c1_99, %c0_100, %c0_101] : memref<2x32x32xf32, #tpu.memory_space<vmem>>, vector<1x32x32xf32>
    %220 = vector.shape_cast %219 : vector<1x32x32xf32> to vector<32x32xf32>
    %221 = vector.extract_strided_slice %216 {offsets = [0, 0], sizes = [24, 8], strides = [1, 1]} : vector<24x32xf32> to vector<24x8xf32>
    %222 = vector.extract_strided_slice %217 {offsets = [0, 0], sizes = [24, 8], strides = [1, 1]} : vector<24x32xf32> to vector<24x8xf32>
    %223 = vector.extract_strided_slice %218 {offsets = [0, 0], sizes = [24, 8], strides = [1, 1]} : vector<24x32xf32> to vector<24x8xf32>
    %cst_102 = arith.constant dense<0.000000e+00> : vector<24x24xf32>
    %224 = tpu.matmul %221, %222, %cst_102 {dimension_numbers = #tpu.dot_dimension_numbers<[1], [1], [0], [0], [0, 0, 1, 0], [], []>} : vector<24x8xf32>, vector<24x8xf32>, vector<24x24xf32> -> vector<24x24xf32>
    %225 = arith.addf %224, %5 : vector<24x24xf32>
    %cst_103 = arith.constant dense<0xFF800000> : vector<24xf32>
    %226 = vector.multi_reduction <maximumf>, %225, %cst_103 [1] : vector<24x24xf32> to vector<24xf32>
    %227 = vector.shape_cast %226 : vector<24xf32> to vector<24x1xf32>
    %228 = vector.broadcast %227 : vector<24x1xf32> to vector<24x24xf32>
    %229 = arith.subf %225, %228 : vector<24x24xf32>
    %230 = math.exp %229 : vector<24x24xf32>
    %cst_104 = arith.constant dense<0.000000e+00> : vector<24xf32>
    %231 = vector.multi_reduction <add>, %230, %cst_104 [1] : vector<24x24xf32> to vector<24xf32>
    %232 = vector.shape_cast %231 : vector<24xf32> to vector<24x1xf32>
    %233 = tpu.reciprocal %232 {approx = true} : vector<24x1xf32> -> vector<24x1xf32>
    %234 = vector.broadcast %233 : vector<24x1xf32> to vector<24x24xf32>
    %235 = arith.mulf %230, %234 : vector<24x24xf32>
    %cst_105 = arith.constant dense<0.000000e+00> : vector<24x8xf32>
    %236 = tpu.matmul %235, %223, %cst_105 {dimension_numbers = #tpu.dot_dimension_numbers<[1], [0], [0], [1], [0, 0, 1, 1], [], []>} : vector<24x24xf32>, vector<24x8xf32>, vector<24x8xf32> -> vector<24x8xf32>
    %237 = vector.extract_strided_slice %220 {offsets = [0, 0], sizes = [8, 32], strides = [1, 1]} : vector<32x32xf32> to vector<8x32xf32>
    %cst_106 = arith.constant dense<0.000000e+00> : vector<24x32xf32>
    %238 = tpu.matmul %236, %237, %cst_106 {dimension_numbers = #tpu.dot_dimension_numbers<[1], [0], [0], [1], [0, 0, 1, 1], [], []>} : vector<24x8xf32>, vector<8x32xf32>, vector<24x32xf32> -> vector<24x32xf32>
    %239 = vector.extract_strided_slice %216 {offsets = [0, 8], sizes = [24, 8], strides = [1, 1]} : vector<24x32xf32> to vector<24x8xf32>
    %240 = vector.extract_strided_slice %217 {offsets = [0, 8], sizes = [24, 8], strides = [1, 1]} : vector<24x32xf32> to vector<24x8xf32>
    %241 = vector.extract_strided_slice %218 {offsets = [0, 8], sizes = [24, 8], strides = [1, 1]} : vector<24x32xf32> to vector<24x8xf32>
    %cst_107 = arith.constant dense<0.000000e+00> : vector<24x24xf32>
    %242 = tpu.matmul %239, %240, %cst_107 {dimension_numbers = #tpu.dot_dimension_numbers<[1], [1], [0], [0], [0, 0, 1, 0], [], []>} : vector<24x8xf32>, vector<24x8xf32>, vector<24x24xf32> -> vector<24x24xf32>
    %243 = arith.addf %242, %5 : vector<24x24xf32>
    %cst_108 = arith.constant dense<0xFF800000> : vector<24xf32>
    %244 = vector.multi_reduction <maximumf>, %243, %cst_108 [1] : vector<24x24xf32> to vector<24xf32>
    %245 = vector.shape_cast %244 : vector<24xf32> to vector<24x1xf32>
    %246 = vector.broadcast %245 : vector<24x1xf32> to vector<24x24xf32>
    %247 = arith.subf %243, %246 : vector<24x24xf32>
    %248 = math.exp %247 : vector<24x24xf32>
    %cst_109 = arith.constant dense<0.000000e+00> : vector<24xf32>
    %249 = vector.multi_reduction <add>, %248, %cst_109 [1] : vector<24x24xf32> to vector<24xf32>
    %250 = vector.shape_cast %249 : vector<24xf32> to vector<24x1xf32>
    %251 = tpu.reciprocal %250 {approx = true} : vector<24x1xf32> -> vector<24x1xf32>
    %252 = vector.broadcast %251 : vector<24x1xf32> to vector<24x24xf32>
    %253 = arith.mulf %248, %252 : vector<24x24xf32>
    %cst_110 = arith.constant dense<0.000000e+00> : vector<24x8xf32>
    %254 = tpu.matmul %253, %241, %cst_110 {dimension_numbers = #tpu.dot_dimension_numbers<[1], [0], [0], [1], [0, 0, 1, 1], [], []>} : vector<24x24xf32>, vector<24x8xf32>, vector<24x8xf32> -> vector<24x8xf32>
    %255 = vector.extract_strided_slice %220 {offsets = [8, 0], sizes = [8, 32], strides = [1, 1]} : vector<32x32xf32> to vector<8x32xf32>
    %cst_111 = arith.constant dense<0.000000e+00> : vector<24x32xf32>
    %256 = tpu.matmul %254, %255, %cst_111 {dimension_numbers = #tpu.dot_dimension_numbers<[1], [0], [0], [1], [0, 0, 1, 1], [], []>} : vector<24x8xf32>, vector<8x32xf32>, vector<24x32xf32> -> vector<24x32xf32>
    %257 = arith.addf %238, %256 : vector<24x32xf32>
    %258 = vector.extract_strided_slice %216 {offsets = [0, 16], sizes = [24, 8], strides = [1, 1]} : vector<24x32xf32> to vector<24x8xf32>
    %259 = vector.extract_strided_slice %217 {offsets = [0, 16], sizes = [24, 8], strides = [1, 1]} : vector<24x32xf32> to vector<24x8xf32>
    %260 = vector.extract_strided_slice %218 {offsets = [0, 16], sizes = [24, 8], strides = [1, 1]} : vector<24x32xf32> to vector<24x8xf32>
    %cst_112 = arith.constant dense<0.000000e+00> : vector<24x24xf32>
    %261 = tpu.matmul %258, %259, %cst_112 {dimension_numbers = #tpu.dot_dimension_numbers<[1], [1], [0], [0], [0, 0, 1, 0], [], []>} : vector<24x8xf32>, vector<24x8xf32>, vector<24x24xf32> -> vector<24x24xf32>
    %262 = arith.addf %261, %5 : vector<24x24xf32>
    %cst_113 = arith.constant dense<0xFF800000> : vector<24xf32>
    %263 = vector.multi_reduction <maximumf>, %262, %cst_113 [1] : vector<24x24xf32> to vector<24xf32>
    %264 = vector.shape_cast %263 : vector<24xf32> to vector<24x1xf32>
    %265 = vector.broadcast %264 : vector<24x1xf32> to vector<24x24xf32>
    %266 = arith.subf %262, %265 : vector<24x24xf32>
    %267 = math.exp %266 : vector<24x24xf32>
    %cst_114 = arith.constant dense<0.000000e+00> : vector<24xf32>
    %268 = vector.multi_reduction <add>, %267, %cst_114 [1] : vector<24x24xf32> to vector<24xf32>
    %269 = vector.shape_cast %268 : vector<24xf32> to vector<24x1xf32>
    %270 = tpu.reciprocal %269 {approx = true} : vector<24x1xf32> -> vector<24x1xf32>
    %271 = vector.broadcast %270 : vector<24x1xf32> to vector<24x24xf32>
    %272 = arith.mulf %267, %271 : vector<24x24xf32>
    %cst_115 = arith.constant dense<0.000000e+00> : vector<24x8xf32>
    %273 = tpu.matmul %272, %260, %cst_115 {dimension_numbers = #tpu.dot_dimension_numbers<[1], [0], [0], [1], [0, 0, 1, 1], [], []>} : vector<24x24xf32>, vector<24x8xf32>, vector<24x8xf32> -> vector<24x8xf32>
    %274 = vector.extract_strided_slice %220 {offsets = [16, 0], sizes = [8, 32], strides = [1, 1]} : vector<32x32xf32> to vector<8x32xf32>
    %cst_116 = arith.constant dense<0.000000e+00> : vector<24x32xf32>
    %275 = tpu.matmul %273, %274, %cst_116 {dimension_numbers = #tpu.dot_dimension_numbers<[1], [0], [0], [1], [0, 0, 1, 1], [], []>} : vector<24x8xf32>, vector<8x32xf32>, vector<24x32xf32> -> vector<24x32xf32>
    %276 = arith.addf %257, %275 : vector<24x32xf32>
    %277 = vector.extract_strided_slice %216 {offsets = [0, 24], sizes = [24, 8], strides = [1, 1]} : vector<24x32xf32> to vector<24x8xf32>
    %278 = vector.extract_strided_slice %217 {offsets = [0, 24], sizes = [24, 8], strides = [1, 1]} : vector<24x32xf32> to vector<24x8xf32>
    %279 = vector.extract_strided_slice %218 {offsets = [0, 24], sizes = [24, 8], strides = [1, 1]} : vector<24x32xf32> to vector<24x8xf32>
    %cst_117 = arith.constant dense<0.000000e+00> : vector<24x24xf32>
    %280 = tpu.matmul %277, %278, %cst_117 {dimension_numbers = #tpu.dot_dimension_numbers<[1], [1], [0], [0], [0, 0, 1, 0], [], []>} : vector<24x8xf32>, vector<24x8xf32>, vector<24x24xf32> -> vector<24x24xf32>
    %281 = arith.addf %280, %5 : vector<24x24xf32>
    %cst_118 = arith.constant dense<0xFF800000> : vector<24xf32>
    %282 = vector.multi_reduction <maximumf>, %281, %cst_118 [1] : vector<24x24xf32> to vector<24xf32>
    %283 = vector.shape_cast %282 : vector<24xf32> to vector<24x1xf32>
    %284 = vector.broadcast %283 : vector<24x1xf32> to vector<24x24xf32>
    %285 = arith.subf %281, %284 : vector<24x24xf32>
    %286 = math.exp %285 : vector<24x24xf32>
    %cst_119 = arith.constant dense<0.000000e+00> : vector<24xf32>
    %287 = vector.multi_reduction <add>, %286, %cst_119 [1] : vector<24x24xf32> to vector<24xf32>
    %288 = vector.shape_cast %287 : vector<24xf32> to vector<24x1xf32>
    %289 = tpu.reciprocal %288 {approx = true} : vector<24x1xf32> -> vector<24x1xf32>
    %290 = vector.broadcast %289 : vector<24x1xf32> to vector<24x24xf32>
    %291 = arith.mulf %286, %290 : vector<24x24xf32>
    %cst_120 = arith.constant dense<0.000000e+00> : vector<24x8xf32>
    %292 = tpu.matmul %291, %279, %cst_120 {dimension_numbers = #tpu.dot_dimension_numbers<[1], [0], [0], [1], [0, 0, 1, 1], [], []>} : vector<24x24xf32>, vector<24x8xf32>, vector<24x8xf32> -> vector<24x8xf32>
    %293 = vector.extract_strided_slice %220 {offsets = [24, 0], sizes = [8, 32], strides = [1, 1]} : vector<32x32xf32> to vector<8x32xf32>
    %cst_121 = arith.constant dense<0.000000e+00> : vector<24x32xf32>
    %294 = tpu.matmul %292, %293, %cst_121 {dimension_numbers = #tpu.dot_dimension_numbers<[1], [0], [0], [1], [0, 0, 1, 1], [], []>} : vector<24x8xf32>, vector<8x32xf32>, vector<24x32xf32> -> vector<24x32xf32>
    %295 = arith.addf %276, %294 : vector<24x32xf32>
    %296 = arith.addf %180, %295 : vector<24x32xf32>
    %c1_122 = arith.constant 1 : index
    %c0_123 = arith.constant 0 : index
    %c0_124 = arith.constant 0 : index
    %297 = vector.load %arg9[%c1_122, %c0_123, %c0_124] : memref<2x1x32xf32, #tpu.memory_space<vmem>>, vector<1x1x32xf32>
    %298 = vector.shape_cast %297 : vector<1x1x32xf32> to vector<1x32xf32>
    %299 = vector.broadcast %298 : vector<1x32xf32> to vector<24x32xf32>
    %300 = arith.addf %296, %299 : vector<24x32xf32>
    %c1_125 = arith.constant 1 : index
    %c0_126 = arith.constant 0 : index
    %c0_127 = arith.constant 0 : index
    %301 = vector.load %arg10[%c1_125, %c0_126, %c0_127] : memref<2x1x32xf32, #tpu.memory_space<vmem>>, vector<1x1x32xf32>
    %302 = vector.shape_cast %301 : vector<1x1x32xf32> to vector<1x32xf32>
    %c1_128 = arith.constant 1 : index
    %c0_129 = arith.constant 0 : index
    %c0_130 = arith.constant 0 : index
    %303 = vector.load %arg11[%c1_128, %c0_129, %c0_130] : memref<2x1x32xf32, #tpu.memory_space<vmem>>, vector<1x1x32xf32>
    %304 = vector.shape_cast %303 : vector<1x1x32xf32> to vector<1x32xf32>
    %cst_131 = arith.constant dense<0.000000e+00> : vector<24xf32>
    %305 = vector.multi_reduction <add>, %300, %cst_131 [1] : vector<24x32xf32> to vector<24xf32>
    %306 = vector.shape_cast %305 : vector<24xf32> to vector<24x1xf32>
    %cst_132 = arith.constant 3.200000e+01 : f32
    %307 = vector.broadcast %cst_132 : f32 to vector<24x1xf32>
    %308 = arith.divf %306, %307 : vector<24x1xf32>
    %309 = vector.broadcast %308 : vector<24x1xf32> to vector<24x32xf32>
    %310 = arith.subf %300, %309 : vector<24x32xf32>
    %311 = arith.mulf %310, %310 : vector<24x32xf32>
    %cst_133 = arith.constant dense<0.000000e+00> : vector<24xf32>
    %312 = vector.multi_reduction <add>, %311, %cst_133 [1] : vector<24x32xf32> to vector<24xf32>
    %313 = vector.shape_cast %312 : vector<24xf32> to vector<24x1xf32>
    %cst_134 = arith.constant 3.200000e+01 : f32
    %314 = vector.broadcast %cst_134 : f32 to vector<24x1xf32>
    %315 = arith.divf %313, %314 : vector<24x1xf32>
    %316 = vector.broadcast %308 : vector<24x1xf32> to vector<24x32xf32>
    %317 = arith.subf %300, %316 : vector<24x32xf32>
    %cst_135 = arith.constant 9.99999997E-7 : f32
    %318 = vector.broadcast %cst_135 : f32 to vector<24x1xf32>
    %319 = arith.addf %315, %318 : vector<24x1xf32>
    %320 = math.rsqrt %319 : vector<24x1xf32>
    %321 = vector.broadcast %320 : vector<24x1xf32> to vector<24x32xf32>
    %322 = arith.mulf %317, %321 : vector<24x32xf32>
    %323 = vector.broadcast %302 : vector<1x32xf32> to vector<24x32xf32>
    %324 = arith.mulf %322, %323 : vector<24x32xf32>
    %325 = vector.broadcast %304 : vector<1x32xf32> to vector<24x32xf32>
    %326 = arith.addf %324, %325 : vector<24x32xf32>
    %c1_136 = arith.constant 1 : index
    %c0_137 = arith.constant 0 : index
    %c0_138 = arith.constant 0 : index
    %327 = vector.load %arg12[%c1_136, %c0_137, %c0_138] : memref<2x32x64xf32, #tpu.memory_space<vmem>>, vector<1x32x64xf32>
    %328 = vector.shape_cast %327 : vector<1x32x64xf32> to vector<32x64xf32>
    %cst_139 = arith.constant dense<0.000000e+00> : vector<24x64xf32>
    %329 = tpu.matmul %326, %328, %cst_139 {dimension_numbers = #tpu.dot_dimension_numbers<[1], [0], [0], [1], [0, 0, 1, 1], [], []>} : vector<24x32xf32>, vector<32x64xf32>, vector<24x64xf32> -> vector<24x64xf32>
    %c1_140 = arith.constant 1 : index
    %c0_141 = arith.constant 0 : index
    %c0_142 = arith.constant 0 : index
    %330 = vector.load %arg13[%c1_140, %c0_141, %c0_142] : memref<2x1x64xf32, #tpu.memory_space<vmem>>, vector<1x1x64xf32>
    %331 = vector.shape_cast %330 : vector<1x1x64xf32> to vector<1x64xf32>
    %332 = vector.broadcast %331 : vector<1x64xf32> to vector<24x64xf32>
    %333 = arith.addf %329, %332 : vector<24x64xf32>
    %cst_143 = arith.constant 5.000000e-01 : f32
    %334 = vector.broadcast %cst_143 : f32 to vector<24x64xf32>
    %335 = arith.mulf %334, %333 : vector<24x64xf32>
    %cst_144 = arith.constant 0.707106769 : f32
    %336 = vector.broadcast %cst_144 : f32 to vector<24x64xf32>
    %337 = arith.mulf %333, %336 : vector<24x64xf32>
    %338 = math.erf %337 : vector<24x64xf32>
    %cst_145 = arith.constant 1.000000e+00 : f32
    %339 = vector.broadcast %cst_145 : f32 to vector<24x64xf32>
    %340 = arith.addf %339, %338 : vector<24x64xf32>
    %341 = arith.mulf %335, %340 : vector<24x64xf32>
    %c1_146 = arith.constant 1 : index
    %c0_147 = arith.constant 0 : index
    %c0_148 = arith.constant 0 : index
    %342 = vector.load %arg14[%c1_146, %c0_147, %c0_148] : memref<2x64x32xf32, #tpu.memory_space<vmem>>, vector<1x64x32xf32>
    %343 = vector.shape_cast %342 : vector<1x64x32xf32> to vector<64x32xf32>
    %cst_149 = arith.constant dense<0.000000e+00> : vector<24x32xf32>
    %344 = tpu.matmul %341, %343, %cst_149 {dimension_numbers = #tpu.dot_dimension_numbers<[1], [0], [0], [1], [0, 0, 1, 1], [], []>} : vector<24x64xf32>, vector<64x32xf32>, vector<24x32xf32> -> vector<24x32xf32>
    %345 = arith.addf %300, %344 : vector<24x32xf32>
    %c1_150 = arith.constant 1 : index
    %c0_151 = arith.constant 0 : index
    %c0_152 = arith.constant 0 : index
    %346 = vector.load %arg15[%c1_150, %c0_151, %c0_152] : memref<2x1x32xf32, #tpu.memory_space<vmem>>, vector<1x1x32xf32>
    %347 = vector.shape_cast %346 : vector<1x1x32xf32> to vector<1x32xf32>
    %348 = vector.broadcast %347 : vector<1x32xf32> to vector<24x32xf32>
    %349 = arith.addf %345, %348 : vector<24x32xf32>
    %c0_153 = arith.constant 0 : index
    %c0_154 = arith.constant 0 : index
    %350 = vector.load %arg16[%c0_153, %c0_154] : memref<1x32xf32, #tpu.memory_space<vmem>>, vector<1x32xf32>
    %c0_155 = arith.constant 0 : index
    %c0_156 = arith.constant 0 : index
    %351 = vector.load %arg17[%c0_155, %c0_156] : memref<1x32xf32, #tpu.memory_space<vmem>>, vector<1x32xf32>
    %cst_157 = arith.constant dense<0.000000e+00> : vector<24xf32>
    %352 = vector.multi_reduction <add>, %349, %cst_157 [1] : vector<24x32xf32> to vector<24xf32>
    %353 = vector.shape_cast %352 : vector<24xf32> to vector<24x1xf32>
    %cst_158 = arith.constant 3.200000e+01 : f32
    %354 = vector.broadcast %cst_158 : f32 to vector<24x1xf32>
    %355 = arith.divf %353, %354 : vector<24x1xf32>
    %356 = vector.broadcast %355 : vector<24x1xf32> to vector<24x32xf32>
    %357 = arith.subf %349, %356 : vector<24x32xf32>
    %358 = arith.mulf %357, %357 : vector<24x32xf32>
    %cst_159 = arith.constant dense<0.000000e+00> : vector<24xf32>
    %359 = vector.multi_reduction <add>, %358, %cst_159 [1] : vector<24x32xf32> to vector<24xf32>
    %360 = vector.shape_cast %359 : vector<24xf32> to vector<24x1xf32>
    %cst_160 = arith.constant 3.200000e+01 : f32
    %361 = vector.broadcast %cst_160 : f32 to vector<24x1xf32>
    %362 = arith.divf %360, %361 : vector<24x1xf32>
    %363 = vector.broadcast %355 : vector<24x1xf32> to vector<24x32xf32>
    %364 = arith.subf %349, %363 : vector<24x32xf32>
    %cst_161 = arith.constant 9.99999997E-7 : f32
    %365 = vector.broadcast %cst_161 : f32 to vector<24x1xf32>
    %366 = arith.addf %362, %365 : vector<24x1xf32>
    %367 = math.rsqrt %366 : vector<24x1xf32>
    %368 = vector.broadcast %367 : vector<24x1xf32> to vector<24x32xf32>
    %369 = arith.mulf %364, %368 : vector<24x32xf32>
    %370 = vector.broadcast %350 : vector<1x32xf32> to vector<24x32xf32>
    %371 = arith.mulf %369, %370 : vector<24x32xf32>
    %372 = vector.broadcast %351 : vector<1x32xf32> to vector<24x32xf32>
    %373 = arith.addf %371, %372 : vector<24x32xf32>
    %374 = vector.extract_strided_slice %373 {offsets = [0, 0], sizes = [1, 32], strides = [1, 1]} : vector<24x32xf32> to vector<1x32xf32>
    %c0_162 = arith.constant 0 : index
    %c0_163 = arith.constant 0 : index
    %375 = vector.load %arg18[%c0_162, %c0_163] : memref<32x128xf32, #tpu.memory_space<vmem>>, vector<32x128xf32>
    %cst_164 = arith.constant dense<0.000000e+00> : vector<1x128xf32>
    %376 = tpu.matmul %374, %375, %cst_164 {dimension_numbers = #tpu.dot_dimension_numbers<[1], [0], [0], [1], [0, 0, 1, 1], [], []>} : vector<1x32xf32>, vector<32x128xf32>, vector<1x128xf32> -> vector<1x128xf32>
    %c0_165 = arith.constant 0 : index
    %c0_166 = arith.constant 0 : index
    %377 = vector.load %arg19[%c0_165, %c0_166] : memref<1x128xf32, #tpu.memory_space<vmem>>, vector<1x128xf32>
    %378 = arith.addf %376, %377 : vector<1x128xf32>
    %379 = vector.shape_cast %378 : vector<1x128xf32> to vector<1x128xf32>
    %380 = vector.broadcast %379 : vector<1x128xf32> to vector<8x128xf32>
    %c0_167 = arith.constant 0 : index
    %c0_168 = arith.constant 0 : index
    %c0_169 = arith.constant 0 : index
    %381 = vector.load %arg20[%c0_167, %c0_168, %c0_169] : memref<1x8x128xf32, #tpu.memory_space<vmem>>, vector<1x8x128xf32>
    %382 = vector.shape_cast %381 : vector<1x8x128xf32> to vector<8x128xf32>
    %383 = vector.shape_cast %380 : vector<8x128xf32> to vector<1x8x128xf32>
    tpu.vector_store %arg20[%c0_167, %c0_168, %c0_169], %383 {strides = array<i32>} : memref<1x8x128xf32, #tpu.memory_space<vmem>>, vector<1x8x128xf32>,
    return
  }
  func.func @transform_0(%arg0: i32) -> (i32, i32, i32) {
    %c0_i32 = arith.constant 0 : i32
    %c0_i32_0 = arith.constant 0 : i32
    %c0_i32_1 = arith.constant 0 : i32
    return %arg0, %c0_i32, %c0_i32_0 : i32, i32, i32
  }
  func.func @transform_1(%arg0: i32) -> (i32, i32) {
    %c0_i32 = arith.constant 0 : i32
    %c0_i32_0 = arith.constant 0 : i32
    %c0_i32_1 = arith.constant 0 : i32
    return %c0_i32, %c0_i32_0 : i32, i32
  }
  func.func @transform_2(%arg0: i32) -> (i32, i32) {
    %c0_i32 = arith.constant 0 : i32
    %c0_i32_0 = arith.constant 0 : i32
    %c0_i32_1 = arith.constant 0 : i32
    return %c0_i32, %c0_i32_0 : i32, i32
  }
  func.func @transform_3(%arg0: i32) -> (i32, i32, i32) {
    %c0_i32 = arith.constant 0 : i32
    %c0_i32_0 = arith.constant 0 : i32
    %c0_i32_1 = arith.constant 0 : i32
    %c0_i32_2 = arith.constant 0 : i32
    return %c0_i32, %c0_i32_0, %c0_i32_1 : i32, i32, i32
  }
  func.func @transform_4(%arg0: i32) -> (i32, i32, i32) {
    %c0_i32 = arith.constant 0 : i32
    %c0_i32_0 = arith.constant 0 : i32
    %c0_i32_1 = arith.constant 0 : i32
    %c0_i32_2 = arith.constant 0 : i32
    return %c0_i32, %c0_i32_0, %c0_i32_1 : i32, i32, i32
  }
  func.func @transform_5(%arg0: i32) -> (i32, i32, i32) {
    %c0_i32 = arith.constant 0 : i32
    %c0_i32_0 = arith.constant 0 : i32
    %c0_i32_1 = arith.constant 0 : i32
    %c0_i32_2 = arith.constant 0 : i32
    return %c0_i32, %c0_i32_0, %c0_i32_1 : i32, i32, i32
  }
  func.func @transform_6(%arg0: i32) -> (i32, i32, i32) {
    %c0_i32 = arith.constant 0 : i32
    %c0_i32_0 = arith.constant 0 : i32
    %c0_i32_1 = arith.constant 0 : i32
    %c0_i32_2 = arith.constant 0 : i32
    return %c0_i32, %c0_i32_0, %c0_i32_1 : i32, i32, i32
  }
  func.func @transform_7(%arg0: i32) -> (i32, i32, i32) {
    %c0_i32 = arith.constant 0 : i32
    %c0_i32_0 = arith.constant 0 : i32
    %c0_i32_1 = arith.constant 0 : i32
    %c0_i32_2 = arith.constant 0 : i32
    return %c0_i32, %c0_i32_0, %c0_i32_1 : i32, i32, i32
  }
  func.func @transform_8(%arg0: i32) -> (i32, i32, i32) {
    %c0_i32 = arith.constant 0 : i32
    %c0_i32_0 = arith.constant 0 : i32
    %c0_i32_1 = arith.constant 0 : i32
    %c0_i32_2 = arith.constant 0 : i32
    return %c0_i32, %c0_i32_0, %c0_i32_1 : i32, i32, i32
  }
  func.func @transform_9(%arg0: i32) -> (i32, i32, i32) {
    %c0_i32 = arith.constant 0 : i32
    %c0_i32_0 = arith.constant 0 : i32
    %c0_i32_1 = arith.constant 0 : i32
    %c0_i32_2 = arith.constant 0 : i32
    return %c0_i32, %c0_i32_0, %c0_i32_1 : i32, i32, i32
  }
  func.func @transform_10(%arg0: i32) -> (i32, i32, i32) {
    %c0_i32 = arith.constant 0 : i32
    %c0_i32_0 = arith.constant 0 : i32
    %c0_i32_1 = arith.constant 0 : i32
    %c0_i32_2 = arith.constant 0 : i32
    return %c0_i32, %c0_i32_0, %c0_i32_1 : i32, i32, i32
  }
  func.func @transform_11(%arg0: i32) -> (i32, i32, i32) {
    %c0_i32 = arith.constant 0 : i32
    %c0_i32_0 = arith.constant 0 : i32
    %c0_i32_1 = arith.constant 0 : i32
    %c0_i32_2 = arith.constant 0 : i32
    return %c0_i32, %c0_i32_0, %c0_i32_1 : i32, i32, i32
  }
  func.func @transform_12(%arg0: i32) -> (i32, i32, i32) {
    %c0_i32 = arith.constant 0 : i32
    %c0_i32_0 = arith.constant 0 : i32
    %c0_i32_1 = arith.constant 0 : i32
    %c0_i32_2 = arith.constant 0 : i32
    return %c0_i32, %c0_i32_0, %c0_i32_1 : i32, i32, i32
  }
  func.func @transform_13(%arg0: i32) -> (i32, i32, i32) {
    %c0_i32 = arith.constant 0 : i32
    %c0_i32_0 = arith.constant 0 : i32
    %c0_i32_1 = arith.constant 0 : i32
    %c0_i32_2 = arith.constant 0 : i32
    return %c0_i32, %c0_i32_0, %c0_i32_1 : i32, i32, i32
  }
  func.func @transform_14(%arg0: i32) -> (i32, i32, i32) {
    %c0_i32 = arith.constant 0 : i32
    %c0_i32_0 = arith.constant 0 : i32
    %c0_i32_1 = arith.constant 0 : i32
    %c0_i32_2 = arith.constant 0 : i32
    return %c0_i32, %c0_i32_0, %c0_i32_1 : i32, i32, i32
  }
  func.func @transform_15(%arg0: i32) -> (i32, i32) {
    %c0_i32 = arith.constant 0 : i32
    %c0_i32_0 = arith.constant 0 : i32
    %c0_i32_1 = arith.constant 0 : i32
    return %c0_i32, %c0_i32_0 : i32, i32
  }
  func.func @transform_16(%arg0: i32) -> (i32, i32) {
    %c0_i32 = arith.constant 0 : i32
    %c0_i32_0 = arith.constant 0 : i32
    %c0_i32_1 = arith.constant 0 : i32
    return %c0_i32, %c0_i32_0 : i32, i32
  }
  func.func @transform_17(%arg0: i32) -> (i32, i32) {
    %c0_i32 = arith.constant 0 : i32
    %c0_i32_0 = arith.constant 0 : i32
    %c0_i32_1 = arith.constant 0 : i32
    return %c0_i32, %c0_i32_0 : i32, i32
  }
  func.func @transform_18(%arg0: i32) -> (i32, i32) {
    %c0_i32 = arith.constant 0 : i32
    %c0_i32_0 = arith.constant 0 : i32
    %c0_i32_1 = arith.constant 0 : i32
    return %c0_i32, %c0_i32_0 : i32, i32
  }
  func.func @transform_19(%arg0: i32) -> (i32, i32, i32) {
    %c0_i32 = arith.constant 0 : i32
    %c0_i32_0 = arith.constant 0 : i32
    %c0_i32_1 = arith.constant 0 : i32
    return %arg0, %c0_i32, %c0_i32_0 : i32, i32, i32
  }
}

</mosaic_0001>

<bundles_post_ra>
// kernel: tiny_vit_forward.1
= control target key start
LH: loop header
LB: loop body
LE: loop exit
PB: predicated region body
PF: predicated region fallthrough
CT: control target
= control target key end

     0   :  { %s6533_s0 = inlined_call_operand.vmem [shape: f32[2,24,48], index: 0, kind: input, shape index: {}]   ;;  %s6534_s1 = inlined_call_operand.vmem [shape: f32[48,32], index: 1, kind: input, shape index: {}]   ;;  %s6535_s2 = inlined_call_operand.vmem [shape: f32[24,32], index: 2, kind: input, shape index: {}]   ;;  %s6536_s3 = inlined_call_operand.vmem [shape: f32[2,1,32], index: 3, kind: input, shape index: {}]   ;;  %s6537_s4 = inlined_call_operand.vmem [shape: f32[2,1,32], index: 4, kind: input, shape index: {}]   ;;  %s6538_s5 = inlined_call_operand.vmem [shape: f32[2,32,96], index: 5, kind: input, shape index: {}]   ;;  %s6539_s6 = inlined_call_operand.vmem [shape: f32[2,1,96], index: 6, kind: input, shape index: {}]   ;;  %s6540_s7 = inlined_call_operand.vmem [shape: f32[2,32,32], index: 7, kind: input, shape index: {}]   ;;  %s6541_s8 = inlined_call_operand.vmem [shape: f32[2,1,32], index: 8, kind: input, shape index: {}]   ;;  %s6542_s9 = inlined_call_operand.vmem [shape: f32[2,1,32], index: 9, kind: input, shape index: {}]   ;;  %s6543_s10 = inlined_call_operand.vmem [shape: f32[2,1,32], index: 10, kind: input, shape index: {}]   ;;  %s6544_s11 = inlined_call_operand.vmem [shape: f32[2,32,64], index: 11, kind: input, shape index: {}]   ;;  %s6545_s12 = inlined_call_operand.vmem [shape: f32[2,1,64], index: 12, kind: input, shape index: {}]   ;;  %s6546_s13 = inlined_call_operand.vmem [shape: f32[2,64,32], index: 13, kind: input, shape index: {}]   ;;  %s6547_s14 = inlined_call_operand.vmem [shape: f32[2,1,32], index: 14, kind: input, shape index: {}]   ;;  %s6548_s15 = inlined_call_operand.vmem [shape: f32[1,32], index: 15, kind: input, shape index: {}]   ;;  %s6549_s16 = inlined_call_operand.vmem [shape: f32[1,32], index: 16, kind: input, shape index: {}]   ;;  %s6550_s17 = inlined_call_operand.vmem [shape: f32[32,128], index: 17, kind: input, shape index: {}]   ;;  %s6551_s18 = inlined_call_operand.vmem [shape: f32[1,128], index: 18, kind: input, shape index: {}]   ;;  %s6552_s19 = inlined_call_operand.vmem [shape: f32[2,8,128], index: 19, kind: output, shape index: {}]  }
   0x1   :  { %6574 = sst [smem:[#allocation2_spill]] %s6533_s0  ;;  %s5535_s0 = smov 0  }
   0x2   :  { %6575 = sst [smem:[#allocation3_spill]] %s6534_s1 }
   0x3   :  { %6576 = sst [smem:[#allocation4_spill]] %s6535_s2 }
   0x4   :  { %6577 = sst [smem:[#allocation5_spill]] %s6536_s3 }
   0x5 LB: > { %s4413_s30 = sadd.s32 4294967295, %s5419_s0   ;;  %p4417_p0 = scmp.ge.s32.totalorder %s5419_s0, 1  ;;  %s5419_s0 = sphi %s5535_s0, %s29_s0  }
   0x6   : > { %p537_p1 = scmp.lt.s32.totalorder %s5419_s0, 3 }
   0x8   : > { %p538_p2 = pnand %p4417_p0, %p537_p1 }
   0x9   : > { %s6578_s1 = sld [smem:[#allocation3_spill]] (!%p538_p2)  ;;  %p592_p3 = scmp.lt.s32.totalorder (!%p538_p2), %s4413_s30, 1 }
   0xa   : > { %541 = sbr.rel (%p538_p2) target bundleno = 7772 (0x1e5c), region = 96  ;;  %s6579_s21 = sld [smem:[#allocation2_spill]] (!%p538_p2) }
   0xb   : > { %s6580_s3 = sld [smem:[#allocation4_spill]] (!%p538_p2)  ;;  %s5423_s23 = smov (!%p538_p2), 96  }
   0xc   : > { %s6581_s29 = sld [smem:[#allocation5_spill]] (!%p538_p2)  ;;  %s5424_s24 = smov (!%p538_p2), 88  }
   0xd   : > { %s6570_s26 = smov (!%p538_p2), 64   ;;  %s6568_s27 = smov (!%p538_p2), 56  }
   0xe   : > { %s6566_s28 = smov (!%p538_p2), 80   ;;  %s6556_s20 = smov (!%p538_p2), 112  }
   0xf   : > { %v613_v0 = vld [vmem:[%s6578_s1 + $0x28] sm:$0xff]  ;;  %v5421_v1 = vmov 0.0   ;;  %v612_v2 = vld [vmem:[%s6578_s1 + $0x20] sm:$0xff]  ;;  %vm5422_vm0 = vmmov 0   ;;  %s6592_s30 = smov (!%p592_p3, %s4413_s30), 1  ;;  %v611_v3 = vld [vmem:[%s6578_s1 + $0x18] sm:$0xff] }
  0x10   : > { %4778 = vmatprep.subr.mxu0 %v5421_v1  ;;  %4790 = vmatprep.mubr.msk.f32.mxu0 %vm5422_vm0, %v5421_v1  ;;  %s5256_s25 = smul.u32 24, %s6592_s30  ;;  %v610_v4 = vld [vmem:[%s6578_s1 + $0x10] sm:$0xff]  ;;  %v609_v5 = vld [vmem:[%s6578_s1 + $0x8] sm:$0xff]  ;;  %v608_v6 = vld [vmem:[%s6578_s1] sm:$0xff]  ;;  %vm617_vm1 = vcmask 392192   ;;  %vm709_vm2 = vcmask 261120  }
  0x11   : > { %4779 = vmatpush3.msra.mxu0 %v613_v0  ;;  %4799 = vmatprep.subr.mxu1 %v5421_v1  ;;  %v614_v10 = vld [vmem:[%s6580_s3] sm:$0xff]  ;;  %v615_v14 = vld [vmem:[%s6580_s3 + $0x8] sm:$0xff]  ;;  %v616_v19 = vld [vmem:[%s6580_s3 + $0x10] sm:$0xff]  ;;  %vm884_vm3 = vcmask 64512   ;;  %vm980_vm5 = vcmask 195584   ;;  %vm2374_vm6 = vcmask 523264  }
  0x12   : > { %4780 = vmatprep.subr.mxu0 %v5421_v1  ;;  %4807 = vmatprep.mubr.msk.f32.mxu1 %vm5422_vm0, %v5421_v1  ;;  %s596_s22 = scalar_lea.vmem %s6579_s21, %s5256_s25  ;;  %v771_v40 = vld [vmem:[%s6538_s5 + $0x18] sm:$0xff]  ;;  %v770_v41 = vld [vmem:[%s6538_s5 + $0x10] sm:$0xff]  ;;  %v769_v42 = vld [vmem:[%s6538_s5 + $0x8] sm:$0xff]  ;;  %s6572_s25 = smov 120  }
  0x13   : > { %4781 = vmatpush3.msra.mxu0 %v612_v2  ;;  %v605_v7 = vld [vmem:[%s596_s22] sm:$0xff]  ;;  %v606_v8 = vld [vmem:[%s596_s22 + $0x8] sm:$0xff]  ;;  %v607_v9 = vld [vmem:[%s596_s22 + $0x10] sm:$0xff]  ;;  %4800 = vmatpush3.msra.mxu1 %v771_v40  ;;  %s6560_s21 = smov 72   ;;  %s6558_s22 = smov 104  }
  0x14   : > { %4782 = vmatprep.subr.mxu0 %v5421_v1  ;;  %4801 = vmatprep.subr.mxu1 %v5421_v1  ;;  %v768_v43 = vld [vmem:[%s6538_s5] sm:$0xff]  ;;  %s6585_s2 = smov 80  }
  0x15   : > { %4783 = vmatpush3.msra.mxu0 %v611_v3  ;;  %4802 = vmatpush3.msra.mxu1 %v770_v41  ;;  %v4423_v54 = vld [vmem:[%s6581_s29] ss:$0 sm:$0xff] }
  0x16   : > { %4784 = vmatprep.subr.mxu0 %v5421_v1  ;;  %4803 = vmatprep.subr.mxu1 %v5421_v1  ;;  %v4424_v56 = vld [vmem:[%s6537_s4] ss:$0 sm:$0xff] }
  0x17   : > { %4785 = vmatpush3.msra.mxu0 %v610_v4  ;;  %4804 = vmatpush3.msra.mxu1 %v769_v42 }
  0x18   : > { %4786 = vmatprep.subr.mxu0 %v5421_v1  ;;  %4805 = vmatprep.subr.mxu1 %v5421_v1 }
  0x19   : > { %4787 = vmatpush3.msra.mxu0 %v609_v5  ;;  %4806 = vmatpush3.msra.mxu1 %v768_v43 }
  0x1a   : > { %4788 = vmatprep.subr.mxu0 %v5421_v1  ;;  %4816 = vmatprep.subr.mxu1 %v5421_v1 }
  0x1b   : > { %4789 = vmatpush3.msra.mxu0 %v608_v6  ;;  %v4425_v6 = vld [vmem:[%s6539_s6] ss:$0 sm:$0xff] }
  0x1c   : > { %4791 = vmatmul.mubr.msk.f32.vlgmr.msra.gmra.mxu0 %vm617_vm1, %v605_v7  ;;  %4831 = vmatprep.subr.mxu0 %v5421_v1 }
  0x1d   : > { %4793 = vmatprep.mubr.msk.f32.mxu0 %vm5422_vm0, %v5421_v1 }
  0x20   : > { %4794 = vmatmul.mubr.msk.f32.gmra.mxu0 %vm617_vm1, %v606_v8 }
  0x21   : > { %4796 = vmatprep.mubr.msk.f32.mxu0 %vm5422_vm0, %v5421_v1 }
  0x24   : > { %4797 = vmatmul.mubr.msk.f32.gmra.mxu0 %vm617_vm1, %v607_v9 }
  0x25   : > { %4837 = vmatprep.mubr.msk.f32.mxu0 %vm5422_vm0, %v5421_v1 }
  0xdc   : > { %v693_v11 = vpop.f32.mrf.mxu0 }
  0xdd   : > { %v5588_v12 = vadd.f32 %v693_v11, %v614_v10 }
  0xde   : > { %v4792_v13 = vpop.f32.mrf.mxu0 }
  0xdf   : > { %v710_v15 = vsel %vm709_vm2, %v5588_v12, 0.0 }
  0xe0   : > { %711 = vadd.xlane.f32.xlu0 %v710_v15  ;;  %v698_v16 = vpop.f32.mrf.mxu0 }
  0xe1   : > { %v5595_v17 = vadd.f32 %v698_v16, %v615_v14 }
  0xe2   : > { %v4795_v18 = vpop.f32.mrf.mxu0 }
  0xe3   : > { %v713_v20 = vsel %vm709_vm2, %v5595_v17, 0.0 }
  0xe4   : > { %714 = vadd.xlane.f32.xlu0 %v713_v20  ;;  %v703_v21 = vpop.f32.mrf.mxu0 }
  0xe5   : > { %v5602_v22 = vadd.f32 %v703_v21, %v616_v19 }
  0xe6   : > { %v4798_v23 = vpop.f32.mrf.mxu0 }
  0xe7   : > { %v716_v24 = vsel %vm709_vm2, %v5602_v22, 0.0 }
  0xe8   : > { %717 = vadd.xlane.f32.xlu1 %v716_v24 }
 0x169   : > { %v712_v25 = vpop.xlane.xlu0 %711 }
 0x16a   : > { %v720_v26 = vmul.f32 0.03125, %v712_v25 }
 0x16c   : > { %v723_v27 = vsub.f32 %v5588_v12, %v720_v26 }
 0x16d   : > { %v715_v28 = vpop.xlane.xlu0 %714 }
 0x16e   : > { %v721_v29 = vmul.f32 0.03125, %v715_v28  ;;  %v726_v30 = vmul.f32 %v723_v27, %v723_v27 }
 0x170   : > { %v724_v31 = vsub.f32 %v5595_v17, %v721_v29  ;;  %v729_v32 = vsel %vm709_vm2, %v726_v30, 0.0  ;;  %v601_v29 = vlaneseq }
 0x171   : > { %730 = vadd.xlane.f32.xlu1 %v729_v32  ;;  %v718_v33 = vpop.xlane.xlu1 %717 }
 0x172   : > { %v722_v34 = vmul.f32 0.03125, %v718_v33  ;;  %v727_v35 = vmul.f32 %v724_v31, %v724_v31  ;;  %v602_v30 = vand.u32 127, %v601_v29 }
 0x174   : > { %v725_v36 = vsub.f32 %v5602_v22, %v722_v34  ;;  %v732_v37 = vsel %vm709_vm2, %v727_v35, 0.0  ;;  %vm603_vm4 = vcmp.lt.s32.totalorder %v602_v30, 17 }
 0x175   : > { %733 = vadd.xlane.f32.xlu0 %v732_v37 }
 0x176   : > { %v728_v38 = vmul.f32 %v725_v36, %v725_v36 }
 0x178   : > { %v735_v39 = vsel %vm709_vm2, %v728_v38, 0.0 }
 0x179   : > { %736 = vadd.xlane.f32.xlu1 %v735_v39 }
 0x1fa   : > { %v731_v44 = vpop.xlane.xlu1 %730 }
 0x1fb   : > { %v738_v45 = vmul.f32 0.03125, %v731_v44 }
 0x1fd   : > { %v741_v46 = vadd.f32 1e-06, %v738_v45 }
 0x1fe   : > { %v734_v47 = vpop.xlane.xlu0 %733 }
 0x1ff   : > { %5279 = vrsqrt.f32 %v741_v46  ;;  %v739_v48 = vmul.f32 0.03125, %v734_v47 }
 0x201   : > { %v742_v49 = vadd.f32 1e-06, %v739_v48 }
 0x202   : > { %v737_v50 = vpop.xlane.xlu1 %736 }
 0x203   : > { %5281 = vrsqrt.f32 %v742_v49  ;;  %v740_v51 = vmul.f32 0.03125, %v737_v50 }
 0x205   : > { %v743_v52 = vadd.f32 1e-06, %v740_v51 }
 0x207   : > { %5283 = vrsqrt.f32 %v743_v52 }
 0x20c   : > { %v5280_v53 = vpop.eup %5279 }
 0x20d   : > { %v747_v55 = vmul.f32 %v5280_v53, %v723_v27 }
 0x20f   : > { %v756_v57 = vmul.f32 %v4423_v54, %v747_v55 }
 0x210   : > { %v5282_v58 = vpop.eup %5281 }
 0x211   : > { %v765_v59 = vadd.f32 %v4424_v56, %v756_v57  ;;  %v748_v60 = vmul.f32 %v5282_v58, %v724_v31  ;;  %v5426_v31 = vmov -1e+30  }
 0x212   : > { %v5713_v32 = vsel %vm603_vm4, 0.0, %v5426_v31 }
 0x213   : > { %4808 = vmatmul.mubr.msk.f32.vlgmr.msra.gmra.mxu1 %vm709_vm2, %v765_v59  ;;  %v757_v61 = vmul.f32 %v4423_v54, %v748_v60 }
 0x214   : > { %v5284_v62 = vpop.eup %5283  ;;  %4810 = vmatprep.mubr.msk.f32.mxu1 %vm5422_vm0, %v5421_v1 }
 0x215   : > { %v766_v63 = vadd.f32 %v4424_v56, %v757_v61  ;;  %v749_v0 = vmul.f32 %v5284_v62, %v725_v36 }
 0x217   : > { %4811 = vmatmul.mubr.msk.f32.gmra.mxu1 %vm709_vm2, %v766_v63  ;;  %v758_v2 = vmul.f32 %v4423_v54, %v749_v0 }
 0x218   : > { %4813 = vmatprep.mubr.msk.f32.mxu1 %vm5422_vm0, %v5421_v1 }
 0x219   : > { %v767_v3 = vadd.f32 %v4424_v56, %v758_v2 }
 0x21b   : > { %4814 = vmatmul.mubr.msk.f32.gmra.mxu1 %vm709_vm2, %v767_v3 }
 0x21c   : > { %4822 = vmatprep.mubr.msk.f32.mxu1 %vm5422_vm0, %v5421_v1 }
 0x2d3   : > { %v854_v4 = vpop.f32.mrf.mxu1 }
 0x2d4   : > { %v5650_v11 = vadd.f32 %v4425_v6, %v854_v4 }
 0x2d5   : > { %v4809_v5 = vpop.f32.mrf.mxu1 }
 0x2d6   : > { %v5663_v15 = vmul.f32 0.35355338, %v5650_v11 }
 0x2d7   : > { %v859_v7 = vpop.f32.mrf.mxu1 }
 0x2d8   : > { %v5646_v8 = vadd.f32 %v4425_v6, %v859_v7 }
 0x2d9   : > { %v4812_v9 = vpop.f32.mrf.mxu1 }
 0x2da   : > { %880 = vrot.lane.b32.xlu1 %v5646_v8, %s5423_s23  ;;  %v5670_v16 = vmul.f32 0.35355338, %v5646_v8 }
 0x2db   : > { %v864_v10 = vpop.f32.mrf.mxu1 }
 0x2dc   : > { %v5652_v13 = vadd.f32 %v4425_v6, %v864_v10 }
 0x2dd   : > { %v4815_v14 = vpop.f32.mrf.mxu1 }
 0x2de   : > { %878 = vrot.lane.b32.xlu1 %v5650_v11, %s5423_s23  ;;  %882 = vrot.lane.b32.xlu0 %v5652_v13, %s5423_s23  ;;  %v5673_v18 = vmul.f32 0.35355338, %v5652_v13 }
 0x2e2   : > { %1122 = vrot.lane.b32.xlu1 %v5652_v13, %s5424_s24  ;;  %1120 = vrot.lane.b32.xlu0 %v5646_v8, %s5424_s24 }
 0x2e6   : > { %1118 = vrot.lane.b32.xlu1 %v5650_v11, %s5424_s24  ;;  %1112 = vrot.lane.b32.xlu0 %v5663_v15, %s6572_s25 }
 0x2ea   : > { %1114 = vrot.lane.b32.xlu1 %v5670_v16, %s6572_s25  ;;  %1116 = vrot.lane.b32.xlu0 %v5673_v18, %s6572_s25  ;;  %s6586_s25 = smov 112  }
 0x34c   : > { %v881_v19 = vpop.permute.xlu1 %880 }
 0x350   : > { %v883_v20 = vpop.permute.xlu0 %882  ;;  %v879_v21 = vpop.permute.xlu1 %878 }
 0x351   : > { %4817 = vmatpush3.xpose.msk.msra.mxu1 %vm884_vm3, %v883_v20 }
 0x352   : > { %4818 = vmatprep.subr.mxu1 %v5421_v1 }
 0x354   : > { %v1123_v23 = vpop.permute.xlu1 %1122  ;;  %v1121_v24 = vpop.permute.xlu0 %1120 }
 0x355   : > { %4819 = vmatpush3.xpose.msk.msra.mxu1 %vm884_vm3, %v881_v19 }
 0x356   : > { %4820 = vmatprep.subr.mxu1 %v5421_v1 }
 0x358   : > { %v1119_v25 = vpop.permute.xlu1 %1118  ;;  %v1113_v26 = vpop.permute.xlu0 %1112 }
 0x359   : > { %4821 = vmatpush3.xpose.msk.msra.mxu1 %vm884_vm3, %v879_v21 }
 0x35a   : > { %4846 = vmatprep.subr.mxu1 %v5421_v1 }
 0x35c   : > { %4823 = vmatmul.mubr.msk.f32.vlgmr.msra.gmra.mxu1 %vm884_vm3, %v5663_v15  ;;  %v1115_v27 = vpop.permute.xlu1 %1114  ;;  %v1117_v28 = vpop.permute.xlu0 %1116 }
 0x35d   : > { %4847 = vmatpush3.xpose.msk.msra.mxu1 %vm884_vm3, %v1123_v23  ;;  %4825 = vmatprep.mubr.msk.f32.mxu1 %vm5422_vm0, %v5421_v1 }
 0x35e   : > { %4848 = vmatprep.subr.mxu1 %v5421_v1 }
 0x360   : > { %4826 = vmatmul.mubr.msk.f32.gmra.mxu1 %vm884_vm3, %v5670_v16 }
 0x361   : > { %4849 = vmatpush3.xpose.msk.msra.mxu1 %vm884_vm3, %v1121_v24  ;;  %4828 = vmatprep.mubr.msk.f32.mxu1 %vm5422_vm0, %v5421_v1 }
 0x362   : > { %4850 = vmatprep.subr.mxu1 %v5421_v1 }
 0x364   : > { %4829 = vmatmul.mubr.msk.f32.gmra.mxu1 %vm884_vm3, %v5673_v18 }
 0x365   : > { %4851 = vmatpush3.xpose.msk.msra.mxu1 %vm884_vm3, %v1119_v25  ;;  %4852 = vmatprep.mubr.msk.f32.mxu1 %vm5422_vm0, %v5421_v1 }
 0x366   : > { %4876 = vmatprep.subr.mxu1 %v5421_v1 }
 0x368   : > { %4853 = vmatmul.mubr.msk.f32.vlgmr.msra.gmra.mxu1 %vm884_vm3, %v1113_v26 }
 0x369   : > { %4855 = vmatprep.mubr.msk.f32.mxu1 %vm5422_vm0, %v5421_v1 }
 0x36c   : > { %4856 = vmatmul.mubr.msk.f32.gmra.mxu1 %vm884_vm3, %v1115_v27 }
 0x36d   : > { %4858 = vmatprep.mubr.msk.f32.mxu1 %vm5422_vm0, %v5421_v1 }
 0x370   : > { %4859 = vmatmul.mubr.msk.f32.gmra.mxu1 %vm884_vm3, %v1117_v28 }
 0x371   : > { %4878 = vmatprep.mubr.msk.f32.mxu1 %vm5422_vm0, %v5421_v1 }
 0x41c   : > { %v966_v33 = vpop.f32.mrf.mxu1 }
 0x41d   : > { %v967_v34 = vadd.f32 %v966_v33, %v5713_v32 }
 0x41e   : > { %v4824_v35 = vpop.f32.mrf.mxu1 }
 0x41f   : > { %v981_v36 = vsel %vm980_vm5, %v967_v34, -inf }
 0x420   : > { %982 = vmax.xlane.f32.xlu1 %v981_v36  ;;  %v971_v37 = vpop.f32.mrf.mxu1 }
 0x421   : > { %v972_v38 = vadd.f32 %v971_v37, %v5713_v32 }
 0x422   : > { %v4827_v39 = vpop.f32.mrf.mxu1 }
 0x423   : > { %v984_v40 = vsel %vm980_vm5, %v972_v38, -inf }
 0x424   : > { %985 = vmax.xlane.f32.xlu0 %v984_v40  ;;  %v976_v41 = vpop.f32.mrf.mxu1 }
 0x425   : > { %v977_v42 = vadd.f32 %v976_v41, %v5713_v32 }
 0x426   : > { %v4830_v43 = vpop.f32.mrf.mxu1 }
 0x427   : > { %v987_v44 = vsel %vm980_vm5, %v977_v42, -inf }
 0x428   : > { %988 = vmax.xlane.f32.xlu0 %v987_v44  ;;  %v1202_v45 = vpop.f32.mrf.mxu1 }
 0x429   : > { %v1203_v46 = vadd.f32 %v1202_v45, %v5713_v32 }
 0x42a   : > { %v4854_v47 = vpop.f32.mrf.mxu1 }
 0x42b   : > { %v1216_v48 = vsel %vm980_vm5, %v1203_v46, -inf }
 0x42c   : > { %1217 = vmax.xlane.f32.xlu0 %v1216_v48  ;;  %v1207_v49 = vpop.f32.mrf.mxu1 }
 0x42d   : > { %v1208_v50 = vadd.f32 %v1207_v49, %v5713_v32 }
 0x42e   : > { %v4857_v51 = vpop.f32.mrf.mxu1 }
 0x42f   : > { %v1219_v52 = vsel %vm980_vm5, %v1208_v50, -inf }
 0x430   : > { %1220 = vmax.xlane.f32.xlu1 %v1219_v52  ;;  %v1212_v53 = vpop.f32.mrf.mxu1 }
 0x431   : > { %v1213_v54 = vadd.f32 %v1212_v53, %v5713_v32 }
 0x432   : > { %v4860_v55 = vpop.f32.mrf.mxu1 }
 0x433   : > { %v1222_v56 = vsel %vm980_vm5, %v1213_v54, -inf }
 0x434   : > { %1223 = vmax.xlane.f32.xlu0 %v1222_v56 }
 0x441   : > { %1018 = vrot.lane.b32.xlu1 %v5652_v13, %s6570_s26 }
 0x445   : > { %1014 = vrot.lane.b32.xlu1 %v5650_v11, %s6570_s26 }
 0x449   : > { %1253 = vrot.lane.b32.xlu1 %v5652_v13, %s6568_s27 }
 0x44a   : > { %1016 = vrot.lane.b32.xlu0 %v5646_v8, %s6570_s26  ;;  %s4419_s26 = sshll.u32 %s6592_s30, 3 }
 0x4a9   : > { %v983_v57 = vpop.xlane.xlu1 %982 }
 0x4aa   : > { %v990_v58 = vsub.f32 %v967_v34, %v983_v57 }
 0x4ac   : > { %v993_v59 = vmul.f32 1.442695, %v990_v58 }
 0x4ad   : > { %v986_v60 = vpop.xlane.xlu0 %985 }
 0x4ae   : > { %5285 = vpow2.f32 %v993_v59  ;;  %v991_v61 = vsub.f32 %v972_v38, %v986_v60  ;;  %v871_v59 = vld [vmem:[%s6540_s7] sm:$0xff]  ;;  %v872_v60 = vld [vmem:[%s6540_s7 + $0x8] sm:$0xff] }
 0x4af   : > { %4877 = vmatpush3.msra.mxu1 %v872_v60 }
 0x4b0   : > { %v995_v62 = vmul.f32 1.442695, %v991_v61  ;;  %4898 = vmatprep.subr.mxu1 %v5421_v1 }
 0x4b1   : > { %v989_v63 = vpop.xlane.xlu0 %988 }
 0x4b2   : > { %5287 = vpow2.f32 %v995_v62  ;;  %v992_v0 = vsub.f32 %v977_v42, %v989_v63 }
 0x4b4   : > { %v997_v2 = vmul.f32 1.442695, %v992_v0 }
 0x4b5   : > { %v1218_v3 = vpop.xlane.xlu0 %1217 }
 0x4b6   : > { %5289 = vpow2.f32 %v997_v2  ;;  %v1225_v4 = vsub.f32 %v1203_v46, %v1218_v3 }
 0x4b8   : > { %v1228_v5 = vmul.f32 1.442695, %v1225_v4 }
 0x4b9   : > { %v1221_v6 = vpop.xlane.xlu1 %1220 }
 0x4ba   : > { %5291 = vpow2.f32 %v1228_v5  ;;  %v1226_v7 = vsub.f32 %v1208_v50, %v1221_v6 }
 0x4bb   : > { %v5286_v9 = vpop.eup %5285 }
 0x4bc   : > { %v1230_v10 = vmul.f32 1.442695, %v1226_v7  ;;  %v999_v14 = vsel %vm980_vm5, %v5286_v9, 0.0 }
 0x4bd   : > { %v1224_v19 = vpop.xlane.xlu0 %1223  ;;  %1000 = vadd.xlane.f32.xlu1 %v999_v14  ;;  %v1019_v20 = vpop.permute.xlu1 %1018 }
 0x4be   : > { %5293 = vpow2.f32 %v1230_v10  ;;  %v1227_v21 = vsub.f32 %v1213_v54, %v1224_v19  ;;  %4832 = vmatpush3.msra.mxu0 %v1019_v20 }
 0x4bf   : > { %v5288_v23 = vpop.eup %5287  ;;  %4833 = vmatprep.subr.mxu0 %v5421_v1 }
 0x4c0   : > { %v1232_v24 = vmul.f32 1.442695, %v1227_v21  ;;  %v1002_v25 = vsel %vm980_vm5, %v5288_v23, 0.0 }
 0x4c1   : > { %1003 = vadd.xlane.f32.xlu0 %v1002_v25  ;;  %v1017_v26 = vpop.permute.xlu0 %1016  ;;  %v1015_v28 = vpop.permute.xlu1 %1014 }
 0x4c2   : > { %5295 = vpow2.f32 %v1232_v24  ;;  %4834 = vmatpush3.msra.mxu0 %v1017_v26 }
 0x4c3   : > { %v5290_v27 = vpop.eup %5289  ;;  %4835 = vmatprep.subr.mxu0 %v5421_v1 }
 0x4c4   : > { %4836 = vmatpush3.msra.mxu0 %v1015_v28  ;;  %v1005_v30 = vsel %vm980_vm5, %v5290_v27, 0.0 }
 0x4c5   : > { %1006 = vadd.xlane.f32.xlu1 %v1005_v30  ;;  %4861 = vmatprep.subr.mxu0 %v5421_v1  ;;  %v1254_v38 = vpop.permute.xlu1 %1253 }
 0x4c7   : > { %v5292_v31 = vpop.eup %5291 }
 0x4c8   : > { %v1234_v33 = vsel %vm980_vm5, %v5292_v31, 0.0 }
 0x4c9   : > { %1235 = vadd.xlane.f32.xlu0 %v1234_v33 }
 0x4cb   : > { %v5294_v34 = vpop.eup %5293 }
 0x4cc   : > { %v1237_v35 = vsel %vm980_vm5, %v5294_v34, 0.0 }
 0x4cd   : > { %1238 = vadd.xlane.f32.xlu1 %v1237_v35 }
 0x4cf   : > { %v5296_v36 = vpop.eup %5295 }
 0x4d0   : > { %v1240_v37 = vsel %vm980_vm5, %v5296_v36, 0.0 }
 0x4d1   : > { %1241 = vadd.xlane.f32.xlu0 %v1240_v37 }
 0x4de   : > { %1251 = vrot.lane.b32.xlu1 %v5646_v8, %s6568_s27 }
 0x4e2   : > { %1535 = vrot.lane.b32.xlu1 %v5652_v13, %s6566_s28 }
 0x4e6   : > { %1531 = vrot.lane.b32.xlu1 %v5650_v11, %s6566_s28 }
 0x4e7   : > { %1249 = vrot.lane.b32.xlu0 %v5650_v11, %s6568_s27 }
 0x4ea   : > { %1527 = vrot.lane.b32.xlu1 %v5670_v16, %s6556_s20 }
 0x4eb   : > { %1533 = vrot.lane.b32.xlu0 %v5646_v8, %s6566_s28 }
 0x4ef   : > { %1525 = vrot.lane.b32.xlu0 %v5663_v15, %s6556_s20 }
 0x4f3   : > { %1529 = vrot.lane.b32.xlu0 %v5673_v18, %s6556_s20  ;;  %s6564_s20 = smov 48  }
 0x546   : > { %v1001_v39 = vpop.xlane.xlu1 %1000 }
 0x547   : > { %5297 = vrcp.f32 %v1001_v39 }
 0x54a   : > { %v1004_v40 = vpop.xlane.xlu0 %1003 }
 0x54b   : > { %5299 = vrcp.f32 %v1004_v40 }
 0x54e   : > { %v1007_v41 = vpop.xlane.xlu1 %1006 }
 0x54f   : > { %5301 = vrcp.f32 %v1007_v41 }
 0x552   : > { %v1236_v42 = vpop.xlane.xlu0 %1235 }
 0x553   : > { %5303 = vrcp.f32 %v1236_v42 }
 0x554   : > { %v5298_v43 = vpop.eup %5297 }
 0x555   : > { %v1011_v44 = vmul.f32 %v5298_v43, %v5286_v9 }
 0x556   : > { %v1239_v45 = vpop.xlane.xlu1 %1238 }
 0x557   : > { %5305 = vrcp.f32 %v1239_v45  ;;  %4838 = vmatmul.mubr.msk.f32.vlgmr.msra.gmra.mxu0 %vm980_vm5, %v1011_v44 }
 0x558   : > { %v5300_v46 = vpop.eup %5299  ;;  %4862 = vmatpush3.msra.mxu0 %v1254_v38  ;;  %4840 = vmatprep.mubr.msk.f32.mxu0 %vm5422_vm0, %v5421_v1 }
 0x559   : > { %4863 = vmatprep.subr.mxu0 %v5421_v1  ;;  %v1012_v47 = vmul.f32 %v5300_v46, %v5288_v23 }
 0x55a   : > { %v1242_v48 = vpop.xlane.xlu0 %1241  ;;  %v1252_v49 = vpop.permute.xlu1 %1251 }
 0x55b   : > { %5307 = vrcp.f32 %v1242_v48  ;;  %4841 = vmatmul.mubr.msk.f32.gmra.mxu0 %vm980_vm5, %v1012_v47 }
 0x55c   : > { %v5302_v50 = vpop.eup %5301  ;;  %4864 = vmatpush3.msra.mxu0 %v1252_v49  ;;  %4843 = vmatprep.mubr.msk.f32.mxu0 %vm5422_vm0, %v5421_v1 }
 0x55d   : > { %4865 = vmatprep.subr.mxu0 %v5421_v1  ;;  %v1013_v51 = vmul.f32 %v5302_v50, %v5290_v27 }
 0x55e   : > { %v1250_v52 = vpop.permute.xlu0 %1249  ;;  %v1536_v5 = vpop.permute.xlu1 %1535 }
 0x55f   : > { %4844 = vmatmul.mubr.msk.f32.gmra.mxu0 %vm980_vm5, %v1013_v51 }
 0x560   : > { %v5304_v53 = vpop.eup %5303  ;;  %4866 = vmatpush3.msra.mxu0 %v1250_v52  ;;  %4867 = vmatprep.mubr.msk.f32.mxu0 %vm5422_vm0, %v5421_v1 }
 0x561   : > { %v1246_v54 = vmul.f32 %v5304_v53, %v5292_v31  ;;  %4887 = vmatprep.subr.mxu0 %v5421_v1 }
 0x562   : > { %v1534_v9 = vpop.permute.xlu0 %1533  ;;  %v1532_v19 = vpop.permute.xlu1 %1531 }
 0x563   : > { %4868 = vmatmul.mubr.msk.f32.vlgmr.msra.gmra.mxu0 %vm980_vm5, %v1246_v54 }
 0x564   : > { %v5306_v55 = vpop.eup %5305  ;;  %4870 = vmatprep.mubr.msk.f32.mxu0 %vm5422_vm0, %v5421_v1  ;;  %4888 = vmatpush3.msra.mxu0 %v871_v59 }
 0x565   : > { %v1247_v56 = vmul.f32 %v5306_v55, %v5294_v34  ;;  %4913 = vmatprep.subr.mxu0 %v5421_v1 }
 0x566   : > { %v1526_v21 = vpop.permute.xlu0 %1525  ;;  %v1528_v23 = vpop.permute.xlu1 %1527 }
 0x567   : > { %4871 = vmatmul.mubr.msk.f32.gmra.mxu0 %vm980_vm5, %v1247_v56 }
 0x568   : > { %v5308_v57 = vpop.eup %5307  ;;  %4873 = vmatprep.mubr.msk.f32.mxu0 %vm5422_vm0, %v5421_v1 }
 0x569   : > { %v1248_v58 = vmul.f32 %v5308_v57, %v5296_v36 }
 0x56a   : > { %v1530_v24 = vpop.permute.xlu0 %1529 }
 0x56b   : > { %4874 = vmatmul.mubr.msk.f32.gmra.mxu0 %vm980_vm5, %v1248_v58 }
 0x56c   : > { %4889 = vmatprep.mubr.msk.f32.mxu0 %vm5422_vm0, %v5421_v1 }
 0x617   : > { %v1098_v61 = vpop.f32.mrf.mxu0 }
 0x618   : > { %4890 = vmatmul.mubr.msk.f32.vlgmr.msra.gmra.mxu0 %vm884_vm3, %v1098_v61 }
 0x619   : > { %v4839_v62 = vpop.f32.mrf.mxu0  ;;  %4892 = vmatprep.mubr.msk.f32.mxu0 %vm5422_vm0, %v5421_v1 }
 0x61b   : > { %v1103_v63 = vpop.f32.mrf.mxu0 }
 0x61c   : > { %4893 = vmatmul.mubr.msk.f32.gmra.mxu0 %vm884_vm3, %v1103_v63 }
 0x61d   : > { %v4842_v0 = vpop.f32.mrf.mxu0  ;;  %4895 = vmatprep.mubr.msk.f32.mxu0 %vm5422_vm0, %v5421_v1 }
 0x61f   : > { %v1108_v2 = vpop.f32.mrf.mxu0 }
 0x620   : > { %4896 = vmatmul.mubr.msk.f32.gmra.mxu0 %vm884_vm3, %v1108_v2 }
 0x621   : > { %v4845_v3 = vpop.f32.mrf.mxu0  ;;  %4919 = vmatprep.mubr.msk.f32.mxu0 %vm5422_vm0, %v5421_v1 }
 0x623   : > { %v1333_v4 = vpop.f32.mrf.mxu0 }
 0x624   : > { %4879 = vmatmul.mubr.msk.f32.vlgmr.msra.gmra.mxu1 %vm884_vm3, %v1333_v4 }
 0x625   : > { %4899 = vmatpush3.xpose.msk.msra.mxu1 %vm884_vm3, %v1536_v5  ;;  %v4869_v6 = vpop.f32.mrf.mxu0  ;;  %4881 = vmatprep.mubr.msk.f32.mxu1 %vm5422_vm0, %v5421_v1 }
 0x626   : > { %4900 = vmatprep.subr.mxu1 %v5421_v1 }
 0x627   : > { %v1338_v7 = vpop.f32.mrf.mxu0 }
 0x628   : > { %4882 = vmatmul.mubr.msk.f32.gmra.mxu1 %vm884_vm3, %v1338_v7 }
 0x629   : > { %4901 = vmatpush3.xpose.msk.msra.mxu1 %vm884_vm3, %v1534_v9  ;;  %v4872_v10 = vpop.f32.mrf.mxu0  ;;  %4884 = vmatprep.mubr.msk.f32.mxu1 %vm5422_vm0, %v5421_v1 }
 0x62a   : > { %4902 = vmatprep.subr.mxu1 %v5421_v1 }
 0x62b   : > { %v1343_v14 = vpop.f32.mrf.mxu0 }
 0x62c   : > { %4885 = vmatmul.mubr.msk.f32.gmra.mxu1 %vm884_vm3, %v1343_v14 }
 0x62d   : > { %4903 = vmatpush3.xpose.msk.msra.mxu1 %vm884_vm3, %v1532_v19  ;;  %v4875_v20 = vpop.f32.mrf.mxu0  ;;  %4904 = vmatprep.mubr.msk.f32.mxu1 %vm5422_vm0, %v5421_v1 }
 0x62e   : > { %4928 = vmatprep.subr.mxu1 %v5421_v1 }
 0x630   : > { %4905 = vmatmul.mubr.msk.f32.vlgmr.msra.gmra.mxu1 %vm884_vm3, %v1526_v21 }
 0x631   : > { %4907 = vmatprep.mubr.msk.f32.mxu1 %vm5422_vm0, %v5421_v1 }
 0x634   : > { %4908 = vmatmul.mubr.msk.f32.gmra.mxu1 %vm884_vm3, %v1528_v23 }
 0x635   : > { %4910 = vmatprep.mubr.msk.f32.mxu1 %vm5422_vm0, %v5421_v1 }
 0x638   : > { %4911 = vmatmul.mubr.msk.f32.gmra.mxu1 %vm884_vm3, %v1530_v24 }
 0x639   : > { %4930 = vmatprep.mubr.msk.f32.mxu1 %vm5422_vm0, %v5421_v1 }
 0x6d8   : > { %v1511_v25 = vpop.f32.mrf.mxu0 }
 0x6da   : > { %v4891_v26 = vpop.f32.mrf.mxu0 }
 0x6dc   : > { %v1516_v27 = vpop.f32.mrf.mxu0 }
 0x6de   : > { %v4894_v28 = vpop.f32.mrf.mxu0 }
 0x6e0   : > { %v1521_v30 = vpop.f32.mrf.mxu0 }
 0x6e2   : > { %v4897_v31 = vpop.f32.mrf.mxu0 }
 0x6e3   : > { %v873_v31 = vld [vmem:[%s6540_s7 + $0x10] sm:$0xff] }
 0x6e4   : > { %v1422_v33 = vpop.f32.mrf.mxu1  ;;  %4929 = vmatpush3.msra.mxu1 %v873_v31 }
 0x6e5   : > { %v5822_v34 = vadd.f32 %v1511_v25, %v1422_v33  ;;  %4954 = vmatprep.subr.mxu1 %v5421_v1 }
 0x6e6   : > { %v4880_v35 = vpop.f32.mrf.mxu1 }
 0x6e8   : > { %v1427_v36 = vpop.f32.mrf.mxu1 }
 0x6e9   : > { %v5824_v37 = vadd.f32 %v1516_v27, %v1427_v36 }
 0x6ea   : > { %v4883_v38 = vpop.f32.mrf.mxu1 }
 0x6ec   : > { %v1432_v39 = vpop.f32.mrf.mxu1 }
 0x6ed   : > { %v5826_v40 = vadd.f32 %v1521_v30, %v1432_v39 }
 0x6ee   : > { %v4886_v41 = vpop.f32.mrf.mxu1 }
 0x6f0   : > { %v1615_v42 = vpop.f32.mrf.mxu1 }
 0x6f1   : > { %v1616_v43 = vadd.f32 %v1615_v42, %v5713_v32 }
 0x6f2   : > { %v4906_v44 = vpop.f32.mrf.mxu1 }
 0x6f3   : > { %v1629_v45 = vsel %vm980_vm5, %v1616_v43, -inf }
 0x6f4   : > { %1630 = vmax.xlane.f32.xlu1 %v1629_v45  ;;  %v1620_v46 = vpop.f32.mrf.mxu1 }
 0x6f5   : > { %v1621_v47 = vadd.f32 %v1620_v46, %v5713_v32 }
 0x6f6   : > { %v4909_v48 = vpop.f32.mrf.mxu1 }
 0x6f7   : > { %v1632_v49 = vsel %vm980_vm5, %v1621_v47, -inf }
 0x6f8   : > { %1633 = vmax.xlane.f32.xlu0 %v1632_v49  ;;  %v1625_v50 = vpop.f32.mrf.mxu1 }
 0x6f9   : > { %v1626_v51 = vadd.f32 %v1625_v50, %v5713_v32 }
 0x6fa   : > { %v4912_v52 = vpop.f32.mrf.mxu1 }
 0x6fb   : > { %v1635_v53 = vsel %vm980_vm5, %v1626_v51, -inf }
 0x6fc   : > { %1636 = vmax.xlane.f32.xlu0 %v1635_v53 }
 0x705   : > { %1666 = vrot.lane.b32.xlu1 %v5652_v13, %s6564_s20 }
 0x709   : > { %1662 = vrot.lane.b32.xlu1 %v5650_v11, %s6564_s20 }
 0x70d   : > { %1862 = vrot.lane.b32.xlu1 %v5652_v13, %s6560_s21 }
 0x711   : > { %1860 = vrot.lane.b32.xlu1 %v5646_v8, %s6560_s21 }
 0x77d   : > { %v1631_v54 = vpop.xlane.xlu1 %1630 }
 0x77e   : > { %v1638_v55 = vsub.f32 %v1616_v43, %v1631_v54 }
 0x780   : > { %v1641_v56 = vmul.f32 1.442695, %v1638_v55 }
 0x781   : > { %v1667_v57 = vpop.permute.xlu1 %1666  ;;  %v1634_v58 = vpop.xlane.xlu0 %1633 }
 0x782   : > { %5309 = vpow2.f32 %v1641_v56  ;;  %v1639_v59 = vsub.f32 %v1621_v47, %v1634_v58  ;;  %4914 = vmatpush3.msra.mxu0 %v1667_v57 }
 0x783   : > { %4915 = vmatprep.subr.mxu0 %v5421_v1 }
 0x784   : > { %v1643_v60 = vmul.f32 1.442695, %v1639_v59 }
 0x785   : > { %v1637_v2 = vpop.xlane.xlu0 %1636 }
 0x786   : > { %5311 = vpow2.f32 %v1643_v60  ;;  %v1640_v3 = vsub.f32 %v1626_v51, %v1637_v2 }
 0x788   : > { %v1645_v4 = vmul.f32 1.442695, %v1640_v3 }
 0x78a   : > { %5313 = vpow2.f32 %v1645_v4 }
 0x78f   : > { %v5310_v61 = vpop.eup %5309 }
 0x790   : > { %v1647_v62 = vsel %vm980_vm5, %v5310_v61, 0.0 }
 0x791   : > { %1648 = vadd.xlane.f32.xlu0 %v1647_v62 }
 0x793   : > { %v5312_v63 = vpop.eup %5311 }
 0x794   : > { %v1650_v0 = vsel %vm980_vm5, %v5312_v63, 0.0 }
 0x795   : > { %1651 = vadd.xlane.f32.xlu1 %v1650_v0 }
 0x797   : > { %v5314_v5 = vpop.eup %5313 }
 0x798   : > { %v1653_v6 = vsel %vm980_vm5, %v5314_v5, 0.0 }
 0x7a6   : > { %1852 = vrot.lane.b32.xlu1 %v5663_v15, %s6558_s22  ;;  %v1663_v15 = vpop.permute.xlu1 %1662 }
 0x7a7   : > { %1664 = vrot.lane.b32.xlu0 %v5646_v8, %s6564_s20  ;;  %s600_s20 = scalar_lea.vmem %s6552_s19, %s4419_s26 }
 0x7aa   : > { %1856 = vrot.lane.b32.xlu1 %v5673_v18, %s6558_s22  ;;  %v1863_v7 = vpop.permute.xlu1 %1862 }
 0x7ae   : > { %v1861_v9 = vpop.permute.xlu1 %1860 }
 0x7c6   : > { %1654 = vadd.xlane.f32.xlu0 %v1653_v6 }
 0x7dc   : > { %1858 = vrot.lane.b32.xlu0 %v5650_v11, %s6560_s21  ;;  %s6582_s21 = smov 120  }
 0x7e0   : > { %1854 = vrot.lane.b32.xlu0 %v5670_v16, %s6558_s22  ;;  %s6562_s22 = smov 40  }
 0x81a   : > { %v1649_v10 = vpop.xlane.xlu0 %1648 }
 0x81b   : > { %5315 = vrcp.f32 %v1649_v10 }
 0x81e   : > { %v1652_v14 = vpop.xlane.xlu1 %1651  ;;  %v1665_v18 = vpop.permute.xlu0 %1664 }
 0x81f   : > { %5317 = vrcp.f32 %v1652_v14  ;;  %4916 = vmatpush3.msra.mxu0 %v1665_v18  ;;  %v874_v18 = vld [vmem:[%s6540_s7 + $0x18] sm:$0xff] }
 0x820   : > { %4917 = vmatprep.subr.mxu0 %v5421_v1 }
 0x821   : > { %4918 = vmatpush3.msra.mxu0 %v1663_v15 }
 0x822   : > { %4939 = vmatprep.subr.mxu0 %v5421_v1  ;;  %v1853_v27 = vpop.permute.xlu1 %1852 }
 0x826   : > { %v1857_v30 = vpop.permute.xlu1 %1856 }
 0x828   : > { %v5316_v19 = vpop.eup %5315 }
 0x829   : > { %v1659_v20 = vmul.f32 %v5316_v19, %v5310_v61 }
 0x82b   : > { %4920 = vmatmul.mubr.msk.f32.vlgmr.msra.gmra.mxu0 %vm980_vm5, %v1659_v20 }
 0x82c   : > { %v5318_v21 = vpop.eup %5317  ;;  %4940 = vmatpush3.xpose.msk.msra.mxu0 %vm884_vm3, %v1863_v7  ;;  %4922 = vmatprep.mubr.msk.f32.mxu0 %vm5422_vm0, %v5421_v1 }
 0x82d   : > { %4941 = vmatprep.subr.mxu0 %v5421_v1  ;;  %v1660_v16 = vmul.f32 %v5318_v21, %v5312_v63 }
 0x82f   : > { %4923 = vmatmul.mubr.msk.f32.gmra.mxu0 %vm980_vm5, %v1660_v16 }
 0x830   : > { %4942 = vmatpush3.xpose.msk.msra.mxu0 %vm884_vm3, %v1861_v9  ;;  %4925 = vmatprep.mubr.msk.f32.mxu0 %vm5422_vm0, %v5421_v1 }
 0x831   : > { %4943 = vmatprep.subr.mxu0 %v5421_v1 }
 0x84f   : > { %v1655_v23 = vpop.xlane.xlu0 %1654 }
 0x850   : > { %5319 = vrcp.f32 %v1655_v23 }
 0x853   : > { %v1859_v24 = vpop.permute.xlu0 %1858 }
 0x854   : > { %4944 = vmatpush3.xpose.msk.msra.mxu0 %vm884_vm3, %v1859_v24 }
 0x855   : > { %4969 = vmatprep.subr.mxu0 %v5421_v1 }
 0x857   : > { %v1855_v28 = vpop.permute.xlu0 %1854 }
 0x85d   : > { %v5320_v25 = vpop.eup %5319 }
 0x85e   : > { %v1661_v26 = vmul.f32 %v5320_v25, %v5314_v5 }
 0x860   : > { %4926 = vmatmul.mubr.msk.f32.gmra.mxu0 %vm980_vm5, %v1661_v26 }
 0x861   : > { %4945 = vmatprep.mubr.msk.f32.mxu0 %vm5422_vm0, %v5421_v1 }
 0x864   : > { %4946 = vmatmul.mubr.msk.f32.vlgmr.msra.gmra.mxu0 %vm884_vm3, %v1853_v27 }
 0x865   : > { %4948 = vmatprep.mubr.msk.f32.mxu0 %vm5422_vm0, %v5421_v1  ;;  %4970 = vmatpush3.msra.mxu0 %v874_v18 }
 0x866   : > { %4997 = vmatprep.subr.mxu0 %v5421_v1 }
 0x868   : > { %4949 = vmatmul.mubr.msk.f32.gmra.mxu0 %vm884_vm3, %v1855_v28 }
 0x869   : > { %4951 = vmatprep.mubr.msk.f32.mxu0 %vm5422_vm0, %v5421_v1 }
 0x86c   : > { %4952 = vmatmul.mubr.msk.f32.gmra.mxu0 %vm884_vm3, %v1857_v30 }
 0x86d   : > { %4971 = vmatprep.mubr.msk.f32.mxu0 %vm5422_vm0, %v5421_v1 }
 0x8eb   : > { %v1746_v33 = vpop.f32.mrf.mxu0 }
 0x8ec   : > { %4931 = vmatmul.mubr.msk.f32.vlgmr.msra.gmra.mxu1 %vm884_vm3, %v1746_v33 }
 0x8ed   : > { %v4921_v35 = vpop.f32.mrf.mxu0  ;;  %4933 = vmatprep.mubr.msk.f32.mxu1 %vm5422_vm0, %v5421_v1 }
 0x8ef   : > { %v1751_v36 = vpop.f32.mrf.mxu0 }
 0x8f0   : > { %4934 = vmatmul.mubr.msk.f32.gmra.mxu1 %vm884_vm3, %v1751_v36 }
 0x8f1   : > { %v4924_v38 = vpop.f32.mrf.mxu0  ;;  %4936 = vmatprep.mubr.msk.f32.mxu1 %vm5422_vm0, %v5421_v1 }
 0x920   : > { %v1756_v39 = vpop.f32.mrf.mxu0 }
 0x921   : > { %4937 = vmatmul.mubr.msk.f32.gmra.mxu1 %vm884_vm3, %v1756_v39 }
 0x922   : > { %v4927_v41 = vpop.f32.mrf.mxu0  ;;  %4960 = vmatprep.mubr.msk.f32.mxu1 %vm5422_vm0, %v5421_v1 }
 0x923   : > { %v4477_v41 = vld [vmem:[%s6541_s8] ss:$0 sm:$0xff] }
 0x924   : > { %v1942_v42 = vpop.f32.mrf.mxu0 }
 0x925   : > { %v1943_v43 = vadd.f32 %v1942_v42, %v5713_v32 }
 0x926   : > { %v4947_v44 = vpop.f32.mrf.mxu0 }
 0x927   : > { %v1956_v45 = vsel %vm980_vm5, %v1943_v43, -inf }
 0x928   : > { %1957 = vmax.xlane.f32.xlu0 %v1956_v45  ;;  %v1947_v46 = vpop.f32.mrf.mxu0 }
 0x929   : > { %v1948_v47 = vadd.f32 %v1947_v46, %v5713_v32 }
 0x92a   : > { %v4950_v48 = vpop.f32.mrf.mxu0 }
 0x92b   : > { %v1959_v49 = vsel %vm980_vm5, %v1948_v47, -inf }
 0x92c   : > { %1960 = vmax.xlane.f32.xlu1 %v1959_v49  ;;  %v1952_v50 = vpop.f32.mrf.mxu0 }
 0x92d   : > { %v1953_v51 = vadd.f32 %v1952_v50, %v5713_v32 }
 0x92e   : > { %v4953_v52 = vpop.f32.mrf.mxu0 }
 0x92f   : > { %v1962_v53 = vsel %vm980_vm5, %v1953_v51, -inf }
 0x930   : > { %1963 = vmax.xlane.f32.xlu0 %v1962_v53 }
 0x93d   : > { %1991 = vrot.lane.b32.xlu1 %v5646_v8, %s6562_s22 }
 0x9ac   : > { %v1835_v54 = vpop.f32.mrf.mxu1 }
 0x9ad   : > { %v5904_v55 = vadd.f32 %v1835_v54, %v5822_v34 }
 0x9ae   : > { %v4932_v56 = vpop.f32.mrf.mxu1 }
 0x9b0   : > { %v1840_v57 = vpop.f32.mrf.mxu1 }
 0x9b1   : > { %v5907_v58 = vadd.f32 %v1840_v57, %v5824_v37  ;;  %v1958_v59 = vpop.xlane.xlu0 %1957 }
 0x9b2   : > { %v1965_v60 = vsub.f32 %v1943_v43, %v1958_v59  ;;  %v4935_v61 = vpop.f32.mrf.mxu1 }
 0x9b4   : > { %v1968_v62 = vmul.f32 1.442695, %v1965_v60 }
 0x9b5   : > { %v1961_v63 = vpop.xlane.xlu1 %1960 }
 0x9b6   : > { %5321 = vpow2.f32 %v1968_v62  ;;  %v1966_v0 = vsub.f32 %v1948_v47, %v1961_v63 }
 0x9b8   : > { %v1970_v2 = vmul.f32 1.442695, %v1966_v0 }
 0x9b9   : > { %v1964_v3 = vpop.xlane.xlu0 %1963  ;;  %v1992_v20 = vpop.permute.xlu1 %1991 }
 0x9ba   : > { %5323 = vpow2.f32 %v1970_v2  ;;  %v1967_v8 = vsub.f32 %v1953_v51, %v1964_v3 }
 0x9bc   : > { %v1972_v4 = vmul.f32 1.442695, %v1967_v8 }
 0x9be   : > { %5325 = vpow2.f32 %v1972_v4 }
 0x9c3   : > { %v5322_v34 = vpop.eup %5321 }
 0x9c4   : > { %v1974_v5 = vsel %vm980_vm5, %v5322_v34, 0.0 }
 0x9c5   : > { %1975 = vadd.xlane.f32.xlu0 %v1974_v5  ;;  %v2254_v5 = vld [vmem:[%s6544_s11 + $0x18] sm:$0xff] }
 0x9c7   : > { %v5324_v6 = vpop.eup %5323 }
 0x9c8   : > { %v1977_v37 = vsel %vm980_vm5, %v5324_v6, 0.0 }
 0x9c9   : > { %1978 = vadd.xlane.f32.xlu0 %v1977_v37  ;;  %v2252_v37 = vld [vmem:[%s6544_s11 + $0x8] sm:$0xff] }
 0x9cb   : > { %v5326_v15 = vpop.eup %5325 }
 0x9cc   : > { %v1980_v7 = vsel %vm980_vm5, %v5326_v15, 0.0 }
 0x9cd   : > { %1981 = vadd.xlane.f32.xlu1 %v1980_v7 }
 0x9de   : > { %1989 = vrot.lane.b32.xlu1 %v5650_v11, %s6562_s22 }
 0x9df   : > { %1993 = vrot.lane.b32.xlu0 %v5652_v13, %s6562_s22  ;;  %s6587_s22 = smov 48  }
 0x9e1   : > { %v1845_v9 = vpop.f32.mrf.mxu1 }
 0x9e2   : > { %v1851_v10 = vadd.f32 %v1845_v9, %v5826_v40 }
 0x9e3   : > { %v4938_v14 = vpop.f32.mrf.mxu1 }
 0xa4e   : > { %v1976_v19 = vpop.xlane.xlu0 %1975 }
 0xa4f   : > { %5327 = vrcp.f32 %v1976_v19 }
 0xa52   : > { %v1979_v21 = vpop.xlane.xlu0 %1978 }
 0xa53   : > { %5329 = vrcp.f32 %v1979_v21 }
 0xa56   : > { %v1982_v11 = vpop.xlane.xlu1 %1981  ;;  %v1994_v16 = vpop.permute.xlu0 %1993 }
 0xa57   : > { %5331 = vrcp.f32 %v1982_v11  ;;  %4955 = vmatpush3.msra.mxu1 %v1994_v16 }
 0xa58   : > { %4956 = vmatprep.subr.mxu1 %v5421_v1 }
 0xa59   : > { %4957 = vmatpush3.msra.mxu1 %v1992_v20 }
 0xa5a   : > { %v1990_v13 = vpop.permute.xlu1 %1989  ;;  %4958 = vmatprep.subr.mxu1 %v5421_v1 }
 0xa5b   : > { %4959 = vmatpush3.msra.mxu1 %v1990_v13  ;;  %v4478_v13 = vld [vmem:[%s6542_s9] ss:$0 sm:$0xff] }
 0xa5c   : > { %v5328_v40 = vpop.eup %5327  ;;  %4980 = vmatprep.subr.mxu1 %v5421_v1 }
 0xa5d   : > { %v1986_v23 = vmul.f32 %v5328_v40, %v5322_v34 }
 0xa5f   : > { %4961 = vmatmul.mubr.msk.f32.vlgmr.msra.gmra.mxu1 %vm980_vm5, %v1986_v23  ;;  %v4479_v23 = vld [vmem:[%s6543_s10] ss:$0 sm:$0xff] }
 0xa60   : > { %v5330_v24 = vpop.eup %5329  ;;  %4963 = vmatprep.mubr.msk.f32.mxu1 %vm5422_vm0, %v5421_v1  ;;  %4981 = vmatpush3.msra.mxu1 %v2254_v5 }
 0xa61   : > { %v1987_v25 = vmul.f32 %v5330_v24, %v5324_v6  ;;  %4982 = vmatprep.subr.mxu1 %v5421_v1  ;;  %v2253_v6 = vld [vmem:[%s6544_s11 + $0x10] sm:$0xff] }
 0xa62   : > { %4983 = vmatpush3.msra.mxu1 %v2253_v6 }
 0xa63   : > { %4964 = vmatmul.mubr.msk.f32.gmra.mxu1 %vm980_vm5, %v1987_v25  ;;  %4984 = vmatprep.subr.mxu1 %v5421_v1 }
 0xa64   : > { %v5332_v26 = vpop.eup %5331  ;;  %4966 = vmatprep.mubr.msk.f32.mxu1 %vm5422_vm0, %v5421_v1  ;;  %4985 = vmatpush3.msra.mxu1 %v2252_v37 }
 0xa65   : > { %v1988_v27 = vmul.f32 %v5332_v26, %v5326_v15  ;;  %v2251_v15 = vld [vmem:[%s6544_s11] sm:$0xff]  ;;  %4986 = vmatprep.subr.mxu1 %v5421_v1 }
 0xa66   : > { %4987 = vmatpush3.msra.mxu1 %v2251_v15  ;;  %v4487_v15 = vld [vmem:[%s6547_s14] ss:$0 sm:$0xff] }
 0xa67   : > { %4967 = vmatmul.mubr.msk.f32.gmra.mxu1 %vm980_vm5, %v1988_v27  ;;  %5022 = vmatprep.subr.mxu1 %v5421_v1 }
 0xa68   : > { %4988 = vmatprep.mubr.msk.f32.mxu1 %vm5422_vm0, %v5421_v1 }
 0xb1f   : > { %v2073_v28 = vpop.f32.mrf.mxu1 }
 0xb20   : > { %4972 = vmatmul.mubr.msk.f32.vlgmr.msra.gmra.mxu0 %vm884_vm3, %v2073_v28 }
 0xb21   : > { %v4962_v30 = vpop.f32.mrf.mxu1  ;;  %4974 = vmatprep.mubr.msk.f32.mxu0 %vm5422_vm0, %v5421_v1 }
 0xb23   : > { %v2078_v31 = vpop.f32.mrf.mxu1 }
 0xb24   : > { %4975 = vmatmul.mubr.msk.f32.gmra.mxu0 %vm884_vm3, %v2078_v31 }
 0xb25   : > { %v4965_v33 = vpop.f32.mrf.mxu1  ;;  %4977 = vmatprep.mubr.msk.f32.mxu0 %vm5422_vm0, %v5421_v1 }
 0xb27   : > { %v2083_v35 = vpop.f32.mrf.mxu1 }
 0xb28   : > { %4978 = vmatmul.mubr.msk.f32.gmra.mxu0 %vm884_vm3, %v2083_v35 }
 0xb29   : > { %v4968_v36 = vpop.f32.mrf.mxu1  ;;  %5013 = vmatprep.mubr.msk.f32.mxu0 %vm5422_vm0, %v5421_v1 }
 0xbe0   : > { %v2162_v38 = vpop.f32.mrf.mxu0 }
 0xbe1   : > { %v2176_v39 = vadd.f32 %v2162_v38, %v5904_v55  ;;  %v2373_v38 = vld [vmem:[%s6546_s13 + $0x38] sm:$0xff] }
 0xbe2   : > { %v4973_v42 = vpop.f32.mrf.mxu0  ;;  %4998 = vmatpush3.msra.mxu0 %v2373_v38 }
 0xbe3   : > { %v2179_v43 = vadd.f32 %v2176_v39, %v5588_v12  ;;  %4999 = vmatprep.subr.mxu0 %v5421_v1  ;;  %v2372_v39 = vld [vmem:[%s6546_s13 + $0x30] sm:$0xff]  ;;  %v2370_v42 = vld [vmem:[%s6546_s13 + $0x20] sm:$0xff] }
 0xbe4   : > { %v2167_v44 = vpop.f32.mrf.mxu0  ;;  %5000 = vmatpush3.msra.mxu0 %v2372_v39 }
 0xbe5   : > { %v5947_v45 = vadd.f32 %v4477_v41, %v2179_v43  ;;  %v2177_v46 = vadd.f32 %v2167_v44, %v5907_v58  ;;  %5001 = vmatprep.subr.mxu0 %v5421_v1  ;;  %v2369_v43 = vld [vmem:[%s6546_s13 + $0x18] sm:$0xff]  ;;  %v2368_v44 = vld [vmem:[%s6546_s13 + $0x10] sm:$0xff] }
 0xbe6   : > { %v4976_v47 = vpop.f32.mrf.mxu0 }
 0xbe7   : > { %v2180_v48 = vadd.f32 %v2177_v46, %v5595_v17  ;;  %v2194_v49 = vsel %vm709_vm2, %v5947_v45, 0.0  ;;  %v2367_v46 = vld [vmem:[%s6546_s13 + $0x8] sm:$0xff]  ;;  %v2366_v47 = vld [vmem:[%s6546_s13] sm:$0xff] }
 0xbe8   : > { %2195 = vadd.xlane.f32.xlu1 %v2194_v49  ;;  %v2172_v50 = vpop.f32.mrf.mxu0 }
 0xbe9   : > { %v5953_v51 = vadd.f32 %v4477_v41, %v2180_v48  ;;  %v2178_v52 = vadd.f32 %v2172_v50, %v1851_v10  ;;  %v4480_v48 = vld [vmem:[%s6545_s12] ss:$0 sm:$0xff] }
 0xbea   : > { %v4979_v53 = vpop.f32.mrf.mxu0 }
 0xbeb   : > { %v2181_v54 = vadd.f32 %v2178_v52, %v5602_v22  ;;  %v2197_v12 = vsel %vm709_vm2, %v5953_v51, 0.0 }
 0xbec   : > { %2198 = vadd.xlane.f32.xlu0 %v2197_v12 }
 0xbed   : > { %v5958_v55 = vadd.f32 %v4477_v41, %v2181_v54  ;;  %v2371_v41 = vld [vmem:[%s6546_s13 + $0x28] sm:$0xff] }
 0xbee   : > { %5002 = vmatpush3.msra.mxu0 %v2371_v41 }
 0xbef   : > { %v2200_v17 = vsel %vm709_vm2, %v5958_v55, 0.0  ;;  %5003 = vmatprep.subr.mxu0 %v5421_v1 }
 0xbf0   : > { %2201 = vadd.xlane.f32.xlu0 %v2200_v17  ;;  %5004 = vmatpush3.msra.mxu0 %v2370_v42  ;;  %v4495_v42 = vld [vmem:[%s6538_s5 + $0x38] sm:$0xff] }
 0xbf1   : > { %5005 = vmatprep.subr.mxu0 %v5421_v1 }
 0xbf2   : > { %5006 = vmatpush3.msra.mxu0 %v2369_v43  ;;  %v4494_v43 = vld [vmem:[%s6538_s5 + $0x30] sm:$0xff] }
 0xbf3   : > { %5007 = vmatprep.subr.mxu0 %v5421_v1 }
 0xbf4   : > { %5008 = vmatpush3.msra.mxu0 %v2368_v44  ;;  %v4493_v44 = vld [vmem:[%s6538_s5 + $0x28] sm:$0xff] }
 0xbf5   : > { %5009 = vmatprep.subr.mxu0 %v5421_v1 }
 0xbf6   : > { %5010 = vmatpush3.msra.mxu0 %v2367_v46  ;;  %v4492_v46 = vld [vmem:[%s6538_s5 + $0x20] sm:$0xff] }
 0xbf7   : > { %5011 = vmatprep.subr.mxu0 %v5421_v1 }
 0xbf8   : > { %5012 = vmatpush3.msra.mxu0 %v2366_v47 }
 0xbf9   : > { %5039 = vmatprep.subr.mxu0 %v5421_v1 }
 0xc71   : > { %v2196_v56 = vpop.xlane.xlu1 %2195 }
 0xc72   : > { %v2203_v57 = vmul.f32 0.03125, %v2196_v56 }
 0xc74   : > { %v2206_v58 = vsub.f32 %v5947_v45, %v2203_v57 }
 0xc75   : > { %v2199_v59 = vpop.xlane.xlu0 %2198 }
 0xc76   : > { %v2204_v60 = vmul.f32 0.03125, %v2199_v59  ;;  %v2209_v61 = vmul.f32 %v2206_v58, %v2206_v58 }
 0xc78   : > { %v2207_v62 = vsub.f32 %v5953_v51, %v2204_v60  ;;  %v2212_v22 = vsel %vm709_vm2, %v2209_v61, 0.0 }
 0xc79   : > { %2213 = vadd.xlane.f32.xlu0 %v2212_v22  ;;  %v2202_v63 = vpop.xlane.xlu0 %2201 }
 0xc7a   : > { %v2205_v0 = vmul.f32 0.03125, %v2202_v63  ;;  %v2210_v2 = vmul.f32 %v2207_v62, %v2207_v62 }
 0xc7c   : > { %v2208_v3 = vsub.f32 %v5958_v55, %v2205_v0  ;;  %v2215_v8 = vsel %vm709_vm2, %v2210_v2, 0.0 }
 0xc7d   : > { %2216 = vadd.xlane.f32.xlu1 %v2215_v8 }
 0xc7e   : > { %v2211_v4 = vmul.f32 %v2208_v3, %v2208_v3 }
 0xc80   : > { %v2218_v34 = vsel %vm709_vm2, %v2211_v4, 0.0 }
 0xc81   : > { %2219 = vadd.xlane.f32.xlu0 %v2218_v34 }
 0xd02   : > { %v2214_v7 = vpop.xlane.xlu0 %2213 }
 0xd03   : > { %v2221_v9 = vmul.f32 0.03125, %v2214_v7 }
 0xd05   : > { %v2224_v10 = vadd.f32 1e-06, %v2221_v9 }
 0xd06   : > { %v2217_v14 = vpop.xlane.xlu1 %2216 }
 0xd07   : > { %5333 = vrsqrt.f32 %v2224_v10  ;;  %v2222_v18 = vmul.f32 0.03125, %v2217_v14 }
 0xd09   : > { %v2225_v19 = vadd.f32 1e-06, %v2222_v18 }
 0xd0a   : > { %v2220_v20 = vpop.xlane.xlu0 %2219 }
 0xd0b   : > { %5335 = vrsqrt.f32 %v2225_v19  ;;  %v2223_v21 = vmul.f32 0.03125, %v2220_v20 }
 0xd0d   : > { %v2226_v11 = vadd.f32 1e-06, %v2223_v21 }
 0xd0f   : > { %5337 = vrsqrt.f32 %v2226_v11 }
 0xd14   : > { %v5334_v16 = vpop.eup %5333 }
 0xd15   : > { %v2230_v40 = vmul.f32 %v5334_v16, %v2206_v58 }
 0xd17   : > { %v2239_v24 = vmul.f32 %v4478_v13, %v2230_v40 }
 0xd18   : > { %v5336_v25 = vpop.eup %5335 }
 0xd19   : > { %v2248_v26 = vadd.f32 %v4479_v23, %v2239_v24  ;;  %v2231_v27 = vmul.f32 %v5336_v25, %v2207_v62 }
 0xd1b   : > { %4989 = vmatmul.mubr.msk.f32.vlgmr.msra.gmra.mxu1 %vm709_vm2, %v2248_v26  ;;  %v2240_v28 = vmul.f32 %v4478_v13, %v2231_v27 }
 0xd1c   : > { %v5338_v30 = vpop.eup %5337  ;;  %4991 = vmatprep.mubr.msk.f32.mxu1 %vm5422_vm0, %v5421_v1  ;;  %5023 = vmatpush3.msra.mxu1 %v4495_v42 }
 0xd1d   : > { %v2249_v31 = vadd.f32 %v4479_v23, %v2240_v28  ;;  %v2232_v33 = vmul.f32 %v5338_v30, %v2208_v3  ;;  %5024 = vmatprep.subr.mxu1 %v5421_v1 }
 0xd1e   : > { %5025 = vmatpush3.msra.mxu1 %v4494_v43 }
 0xd1f   : > { %4992 = vmatmul.mubr.msk.f32.gmra.mxu1 %vm709_vm2, %v2249_v31  ;;  %v2241_v35 = vmul.f32 %v4478_v13, %v2232_v33  ;;  %5026 = vmatprep.subr.mxu1 %v5421_v1 }
 0xd20   : > { %4994 = vmatprep.mubr.msk.f32.mxu1 %vm5422_vm0, %v5421_v1  ;;  %5027 = vmatpush3.msra.mxu1 %v4493_v44 }
 0xd21   : > { %v2250_v36 = vadd.f32 %v4479_v23, %v2241_v35  ;;  %5028 = vmatprep.subr.mxu1 %v5421_v1 }
 0xd22   : > { %5029 = vmatpush3.msra.mxu1 %v4492_v46 }
 0xd23   : > { %4995 = vmatmul.mubr.msk.f32.gmra.mxu1 %vm709_vm2, %v2250_v36  ;;  %5054 = vmatprep.subr.mxu1 %v5421_v1 }
 0xd24   : > { %5030 = vmatprep.mubr.msk.f32.mxu1 %vm5422_vm0, %v5421_v1 }
 0xddb   : > { %v2337_v49 = vpop.f32.mrf.mxu1 }
 0xddc   : > { %v2338_v50 = vadd.f32 %v4480_v48, %v2337_v49 }
 0xddd   : > { %v4990_v52 = vpop.f32.mrf.mxu1 }
 0xdde   : > { %v2354_v53 = vmul.f32 0.70710677, %v2338_v50  ;;  %v2351_v62 = vmul.f32 0.5, %v2338_v50 }
 0xddf   : > { %v2342_v54 = vpop.f32.mrf.mxu1 }
 0xde0   : > { %5339 = verf.f32 %v2354_v53  ;;  %v2343_v12 = vadd.f32 %v4480_v48, %v2342_v54 }
 0xde1   : > { %v4993_v17 = vpop.f32.mrf.mxu1 }
 0xde2   : > { %v2355_v56 = vmul.f32 0.70710677, %v2343_v12  ;;  %v2352_v2 = vmul.f32 0.5, %v2343_v12 }
 0xde3   : > { %v2347_v57 = vpop.f32.mrf.mxu1 }
 0xde4   : > { %5341 = verf.f32 %v2355_v56  ;;  %v2348_v58 = vadd.f32 %v4480_v48, %v2347_v57  ;;  %v4490_v57 = vld [vmem:[%s6581_s29 + $0x1] ss:$0 sm:$0xff] }
 0xde5   : > { %v4996_v59 = vpop.f32.mrf.mxu1 }
 0xde6   : > { %v2356_v60 = vmul.f32 0.70710677, %v2348_v58  ;;  %v2353_v34 = vmul.f32 0.5, %v2348_v58  ;;  %v4491_v59 = vld [vmem:[%s6537_s4 + $0x1] ss:$0 sm:$0xff] }
 0xde8   : > { %5343 = verf.f32 %v2356_v60 }
 0xded   : > { %v5340_v61 = vpop.eup %5339 }
 0xdee   : > { %v2360_v22 = vadd.f32 1.0, %v5340_v61 }
 0xdf0   : > { %v2363_v63 = vmul.f32 %v2360_v22, %v2351_v62 }
 0xdf1   : > { %v5342_v0 = vpop.eup %5341 }
 0xdf2   : > { %v2361_v3 = vadd.f32 1.0, %v5342_v0  ;;  %5014 = vmatmul.mubr.msk.f32.vlgmr.msra.gmra.mxu0 %vm2374_vm6, %v2363_v63 }
 0xdf3   : > { %5016 = vmatprep.mubr.msk.f32.mxu0 %vm5422_vm0, %v5421_v1 }
 0xdf4   : > { %v2364_v8 = vmul.f32 %v2361_v3, %v2352_v2 }
 0xdf5   : > { %v5344_v4 = vpop.eup %5343 }
 0xdf6   : > { %v2362_v5 = vadd.f32 1.0, %v5344_v4  ;;  %5017 = vmatmul.mubr.msk.f32.gmra.mxu0 %vm2374_vm6, %v2364_v8 }
 0xdf7   : > { %5019 = vmatprep.mubr.msk.f32.mxu0 %vm5422_vm0, %v5421_v1 }
 0xdf8   : > { %v2365_v6 = vmul.f32 %v2362_v5, %v2353_v34 }
 0xdfa   : > { %5020 = vmatmul.mubr.msk.f32.gmra.mxu0 %vm2374_vm6, %v2365_v6  ;;  %v4497_v6 = vld [vmem:[%s6539_s6 + $0x1] ss:$0 sm:$0xff] }
 0xdfb   : > { %5045 = vmatprep.mubr.msk.f32.mxu0 %vm5422_vm0, %v5421_v1 }
 0xeb2   : > { %v2450_v37 = vpop.f32.mrf.mxu0 }
 0xeb3   : > { %v2464_v7 = vadd.f32 %v2450_v37, %v5947_v45 }
 0xeb4   : > { %v5015_v9 = vpop.f32.mrf.mxu0 }
 0xeb5   : > { %v6047_v10 = vadd.f32 %v4487_v15, %v2464_v7 }
 0xeb6   : > { %v2455_v14 = vpop.f32.mrf.mxu0 }
 0xeb7   : > { %v2465_v18 = vadd.f32 %v2455_v14, %v5953_v51  ;;  %v2481_v19 = vsel %vm709_vm2, %v6047_v10, 0.0 }
 0xeb8   : > { %2482 = vadd.xlane.f32.xlu1 %v2481_v19  ;;  %v5018_v20 = vpop.f32.mrf.mxu0 }
 0xeb9   : > { %v6052_v21 = vadd.f32 %v4487_v15, %v2465_v18 }
 0xeba   : > { %v2460_v11 = vpop.f32.mrf.mxu0 }
 0xebb   : > { %v2466_v16 = vadd.f32 %v2460_v11, %v5958_v55  ;;  %v2484_v13 = vsel %vm709_vm2, %v6052_v21, 0.0 }
 0xebc   : > { %2485 = vadd.xlane.f32.xlu0 %v2484_v13  ;;  %v5021_v45 = vpop.f32.mrf.mxu0 }
 0xebd   : > { %v6057_v40 = vadd.f32 %v4487_v15, %v2466_v16 }
 0xebf   : > { %v2487_v51 = vsel %vm709_vm2, %v6057_v40, 0.0 }
 0xec0   : > { %2488 = vadd.xlane.f32.xlu1 %v2487_v51 }
 0xf41   : > { %v2483_v23 = vpop.xlane.xlu1 %2482 }
 0xf42   : > { %v2490_v24 = vmul.f32 0.03125, %v2483_v23 }
 0xf44   : > { %v2493_v25 = vsub.f32 %v6047_v10, %v2490_v24 }
 0xf45   : > { %v2486_v26 = vpop.xlane.xlu0 %2485 }
 0xf46   : > { %v2491_v27 = vmul.f32 0.03125, %v2486_v26  ;;  %v2496_v28 = vmul.f32 %v2493_v25, %v2493_v25 }
 0xf48   : > { %v2494_v55 = vsub.f32 %v6052_v21, %v2491_v27  ;;  %v2499_v30 = vsel %vm709_vm2, %v2496_v28, 0.0 }
 0xf49   : > { %2500 = vadd.xlane.f32.xlu0 %v2499_v30  ;;  %v2489_v31 = vpop.xlane.xlu1 %2488 }
 0xf4a   : > { %v2492_v33 = vmul.f32 0.03125, %v2489_v31  ;;  %v2497_v35 = vmul.f32 %v2494_v55, %v2494_v55 }
 0xf4c   : > { %v2495_v36 = vsub.f32 %v6057_v40, %v2492_v33  ;;  %v2502_v38 = vsel %vm709_vm2, %v2497_v35, 0.0 }
 0xf4d   : > { %2503 = vadd.xlane.f32.xlu1 %v2502_v38 }
 0xf4e   : > { %v2498_v39 = vmul.f32 %v2495_v36, %v2495_v36 }
 0xf50   : > { %v2505_v41 = vsel %vm709_vm2, %v2498_v39, 0.0 }
 0xf51   : > { %2506 = vadd.xlane.f32.xlu0 %v2505_v41 }
 0xfd2   : > { %v2501_v47 = vpop.xlane.xlu0 %2500 }
 0xfd3   : > { %v2508_v48 = vmul.f32 0.03125, %v2501_v47 }
 0xfd5   : > { %v2511_v49 = vadd.f32 1e-06, %v2508_v48 }
 0xfd6   : > { %v2504_v50 = vpop.xlane.xlu1 %2503 }
 0xfd7   : > { %5345 = vrsqrt.f32 %v2511_v49  ;;  %v2509_v52 = vmul.f32 0.03125, %v2504_v50 }
 0xfd9   : > { %v2512_v53 = vadd.f32 1e-06, %v2509_v52 }
 0xfda   : > { %v2507_v54 = vpop.xlane.xlu0 %2506 }
 0xfdb   : > { %5347 = vrsqrt.f32 %v2512_v53  ;;  %v2510_v12 = vmul.f32 0.03125, %v2507_v54 }
 0xfdd   : > { %v2513_v17 = vadd.f32 1e-06, %v2510_v12 }
 0xfdf   : > { %5349 = vrsqrt.f32 %v2513_v17 }
 0xfe4   : > { %v5346_v56 = vpop.eup %5345 }
 0xfe5   : > { %v2517_v58 = vmul.f32 %v5346_v56, %v2493_v25 }
 0xfe7   : > { %v2526_v60 = vmul.f32 %v4490_v57, %v2517_v58 }
 0xfe8   : > { %v5348_v61 = vpop.eup %5347 }
 0xfe9   : > { %v2535_v62 = vadd.f32 %v4491_v59, %v2526_v60  ;;  %v2518_v22 = vmul.f32 %v5348_v61, %v2494_v55 }
 0xfeb   : > { %5031 = vmatmul.mubr.msk.f32.vlgmr.msra.gmra.mxu1 %vm709_vm2, %v2535_v62  ;;  %v2527_v63 = vmul.f32 %v4490_v57, %v2518_v22 }
 0xfec   : > { %v5350_v0 = vpop.eup %5349  ;;  %5033 = vmatprep.mubr.msk.f32.mxu1 %vm5422_vm0, %v5421_v1 }
 0xfed   : > { %v2536_v2 = vadd.f32 %v4491_v59, %v2527_v63  ;;  %v2519_v3 = vmul.f32 %v5350_v0, %v2495_v36 }
 0xfef   : > { %5034 = vmatmul.mubr.msk.f32.gmra.mxu1 %vm709_vm2, %v2536_v2  ;;  %v2528_v8 = vmul.f32 %v4490_v57, %v2519_v3 }
 0xff0   : > { %5036 = vmatprep.mubr.msk.f32.mxu1 %vm5422_vm0, %v5421_v1 }
 0xff1   : > { %v2537_v4 = vadd.f32 %v4491_v59, %v2528_v8 }
 0xff3   : > { %5037 = vmatmul.mubr.msk.f32.gmra.mxu1 %vm709_vm2, %v2537_v4 }
 0xff4   : > { %5060 = vmatprep.mubr.msk.f32.mxu1 %vm5422_vm0, %v5421_v1 }
0x10ab   : > { %v2626_v34 = vpop.f32.mrf.mxu1 }
0x10ac   : > { %v6105_v14 = vadd.f32 %v4497_v6, %v2626_v34 }
0x10ad   : > { %v5032_v5 = vpop.f32.mrf.mxu1 }
0x10ae   : > { %v6125_v11 = vmul.f32 0.35355338, %v6105_v14 }
0x10af   : > { %v2631_v37 = vpop.f32.mrf.mxu1 }
0x10b0   : > { %v6101_v15 = vadd.f32 %v4497_v6, %v2631_v37 }
0x10b1   : > { %v5035_v7 = vpop.f32.mrf.mxu1 }
0x10b2   : > { %2653 = vrot.lane.b32.xlu0 %v6101_v15, %s5423_s23  ;;  %v6114_v20 = vmul.f32 0.35355338, %v6101_v15 }
0x10b3   : > { %v2636_v9 = vpop.f32.mrf.mxu1 }
0x10b4   : > { %v6107_v18 = vadd.f32 %v4497_v6, %v2636_v9 }
0x10b5   : > { %v5038_v19 = vpop.f32.mrf.mxu1 }
0x10b6   : > { %2889 = vrot.lane.b32.xlu0 %v6105_v14, %s5424_s24  ;;  %2655 = vrot.lane.b32.xlu1 %v6107_v18, %s5423_s23  ;;  %v6130_v16 = vmul.f32 0.35355338, %v6107_v18 }
0x10ba   : > { %2885 = vrot.lane.b32.xlu0 %v6114_v20, %s6582_s21  ;;  %2651 = vrot.lane.b32.xlu1 %v6105_v14, %s5423_s23  ;;  %s6583_s23 = smov 64  }
0x10be   : > { %2893 = vrot.lane.b32.xlu1 %v6107_v18, %s5424_s24 }
0x10c2   : > { %2891 = vrot.lane.b32.xlu1 %v6101_v15, %s5424_s24  ;;  %s6584_s24 = smov 56  }
0x10c6   : > { %2883 = vrot.lane.b32.xlu1 %v6125_v11, %s6582_s21 }
0x10ca   : > { %2887 = vrot.lane.b32.xlu1 %v6130_v16, %s6582_s21  ;;  %s6588_s21 = smov 72  }
0x1124   : > { %v2654_v45 = vpop.permute.xlu0 %2653 }
0x1128   : > { %v2656_v13 = vpop.permute.xlu1 %2655  ;;  %v2890_v25 = vpop.permute.xlu0 %2889 }
0x1129   : > { %5040 = vmatpush3.xpose.msk.msra.mxu0 %vm884_vm3, %v2656_v13 }
0x112a   : > { %5041 = vmatprep.subr.mxu0 %v5421_v1 }
0x112c   : > { %v2652_v51 = vpop.permute.xlu1 %2651  ;;  %v2886_v27 = vpop.permute.xlu0 %2885 }
0x112d   : > { %5042 = vmatpush3.xpose.msk.msra.mxu0 %vm884_vm3, %v2654_v45 }
0x112e   : > { %5043 = vmatprep.subr.mxu0 %v5421_v1 }
0x1130   : > { %v2894_v23 = vpop.permute.xlu1 %2893 }
0x1131   : > { %5044 = vmatpush3.xpose.msk.msra.mxu0 %vm884_vm3, %v2652_v51 }
0x1132   : > { %5069 = vmatprep.subr.mxu0 %v5421_v1 }
0x1134   : > { %5046 = vmatmul.mubr.msk.f32.vlgmr.msra.gmra.mxu0 %vm884_vm3, %v6125_v11  ;;  %v2892_v24 = vpop.permute.xlu1 %2891 }
0x1135   : > { %5070 = vmatpush3.xpose.msk.msra.mxu0 %vm884_vm3, %v2894_v23  ;;  %5048 = vmatprep.mubr.msk.f32.mxu0 %vm5422_vm0, %v5421_v1 }
0x1136   : > { %5071 = vmatprep.subr.mxu0 %v5421_v1 }
0x1138   : > { %5049 = vmatmul.mubr.msk.f32.gmra.mxu0 %vm884_vm3, %v6114_v20  ;;  %v2884_v26 = vpop.permute.xlu1 %2883 }
0x1139   : > { %5072 = vmatpush3.xpose.msk.msra.mxu0 %vm884_vm3, %v2892_v24  ;;  %5051 = vmatprep.mubr.msk.f32.mxu0 %vm5422_vm0, %v5421_v1 }
0x113a   : > { %5073 = vmatprep.subr.mxu0 %v5421_v1 }
0x113c   : > { %5052 = vmatmul.mubr.msk.f32.gmra.mxu0 %vm884_vm3, %v6130_v16  ;;  %v2888_v28 = vpop.permute.xlu1 %2887 }
0x113d   : > { %5074 = vmatpush3.xpose.msk.msra.mxu0 %vm884_vm3, %v2890_v25  ;;  %5075 = vmatprep.mubr.msk.f32.mxu0 %vm5422_vm0, %v5421_v1 }
0x113e   : > { %5099 = vmatprep.subr.mxu0 %v5421_v1 }
0x1140   : > { %5076 = vmatmul.mubr.msk.f32.vlgmr.msra.gmra.mxu0 %vm884_vm3, %v2884_v26 }
0x1141   : > { %5078 = vmatprep.mubr.msk.f32.mxu0 %vm5422_vm0, %v5421_v1 }
0x1144   : > { %5079 = vmatmul.mubr.msk.f32.gmra.mxu0 %vm884_vm3, %v2886_v27 }
0x1145   : > { %5081 = vmatprep.mubr.msk.f32.mxu0 %vm5422_vm0, %v5421_v1 }
0x1148   : > { %5082 = vmatmul.mubr.msk.f32.gmra.mxu0 %vm884_vm3, %v2888_v28 }
0x1149   : > { %5101 = vmatprep.mubr.msk.f32.mxu0 %vm5422_vm0, %v5421_v1 }
0x11f4   : > { %v2738_v55 = vpop.f32.mrf.mxu0 }
0x11f5   : > { %v2739_v30 = vadd.f32 %v2738_v55, %v5713_v32 }
0x11f6   : > { %v5047_v31 = vpop.f32.mrf.mxu0 }
0x11f7   : > { %v2752_v33 = vsel %vm980_vm5, %v2739_v30, -inf }
0x11f8   : > { %2753 = vmax.xlane.f32.xlu0 %v2752_v33  ;;  %v2743_v35 = vpop.f32.mrf.mxu0 }
0x11f9   : > { %v2744_v36 = vadd.f32 %v2743_v35, %v5713_v32 }
0x11fa   : > { %v5050_v38 = vpop.f32.mrf.mxu0 }
0x11fb   : > { %v2755_v39 = vsel %vm980_vm5, %v2744_v36, -inf }
0x11fc   : > { %2756 = vmax.xlane.f32.xlu1 %v2755_v39  ;;  %v2748_v41 = vpop.f32.mrf.mxu0 }
0x11fd   : > { %v2749_v42 = vadd.f32 %v2748_v41, %v5713_v32 }
0x11fe   : > { %v5053_v43 = vpop.f32.mrf.mxu0 }
0x11ff   : > { %v2758_v44 = vsel %vm980_vm5, %v2749_v42, -inf }
0x1200   : > { %2759 = vmax.xlane.f32.xlu0 %v2758_v44  ;;  %v2973_v46 = vpop.f32.mrf.mxu0 }
0x1201   : > { %v2974_v47 = vadd.f32 %v2973_v46, %v5713_v32 }
0x1202   : > { %v5077_v48 = vpop.f32.mrf.mxu0 }
0x1203   : > { %v2987_v49 = vsel %vm980_vm5, %v2974_v47, -inf }
0x1204   : > { %2988 = vmax.xlane.f32.xlu0 %v2987_v49  ;;  %v2978_v50 = vpop.f32.mrf.mxu0 }
0x1205   : > { %v2979_v52 = vadd.f32 %v2978_v50, %v5713_v32 }
0x1206   : > { %v5080_v53 = vpop.f32.mrf.mxu0 }
0x1207   : > { %v2990_v54 = vsel %vm980_vm5, %v2979_v52, -inf }
0x1208   : > { %2991 = vmax.xlane.f32.xlu0 %v2990_v54  ;;  %v2983_v12 = vpop.f32.mrf.mxu0 }
0x1209   : > { %v2984_v17 = vadd.f32 %v2983_v12, %v5713_v32 }
0x120a   : > { %v5083_v56 = vpop.f32.mrf.mxu0 }
0x120b   : > { %v2993_v57 = vsel %vm980_vm5, %v2984_v17, -inf }
0x120c   : > { %2994 = vmax.xlane.f32.xlu1 %v2993_v57 }
0x121d   : > { %2787 = vrot.lane.b32.xlu1 %v6101_v15, %s6583_s23 }
0x121e   : > { %2789 = vrot.lane.b32.xlu0 %v6107_v18, %s6583_s23 }
0x1221   : > { %2785 = vrot.lane.b32.xlu1 %v6105_v14, %s6583_s23  ;;  %s6589_s23 = smov 104  }
0x1225   : > { %3024 = vrot.lane.b32.xlu1 %v6107_v18, %s6584_s24 }
0x1281   : > { %v2754_v58 = vpop.xlane.xlu0 %2753 }
0x1282   : > { %v2761_v59 = vsub.f32 %v2739_v30, %v2754_v58 }
0x1284   : > { %v2764_v60 = vmul.f32 1.442695, %v2761_v59 }
0x1285   : > { %v2757_v61 = vpop.xlane.xlu1 %2756 }
0x1286   : > { %5351 = vpow2.f32 %v2764_v60  ;;  %v2762_v62 = vsub.f32 %v2744_v36, %v2757_v61  ;;  %v4501_v60 = vld [vmem:[%s6540_s7 + $0x20] sm:$0xff]  ;;  %v4502_v61 = vld [vmem:[%s6540_s7 + $0x28] sm:$0xff] }
0x1287   : > { %5100 = vmatpush3.msra.mxu0 %v4502_v61 }
0x1288   : > { %v2766_v22 = vmul.f32 1.442695, %v2762_v62  ;;  %5121 = vmatprep.subr.mxu0 %v5421_v1 }
0x1289   : > { %v2760_v63 = vpop.xlane.xlu0 %2759 }
0x128a   : > { %5353 = vpow2.f32 %v2766_v22  ;;  %v2763_v0 = vsub.f32 %v2749_v42, %v2760_v63 }
0x128c   : > { %v2768_v2 = vmul.f32 1.442695, %v2763_v0 }
0x128d   : > { %v2989_v3 = vpop.xlane.xlu0 %2988 }
0x128e   : > { %5355 = vpow2.f32 %v2768_v2  ;;  %v2996_v8 = vsub.f32 %v2974_v47, %v2989_v3 }
0x1290   : > { %v2999_v4 = vmul.f32 1.442695, %v2996_v8 }
0x1291   : > { %v2992_v34 = vpop.xlane.xlu0 %2991 }
0x1292   : > { %5357 = vpow2.f32 %v2999_v4  ;;  %v2997_v5 = vsub.f32 %v2979_v52, %v2992_v34 }
0x1293   : > { %v5352_v6 = vpop.eup %5351 }
0x1294   : > { %v3001_v37 = vmul.f32 1.442695, %v2997_v5  ;;  %v2770_v7 = vsel %vm980_vm5, %v5352_v6, 0.0 }
0x1295   : > { %2771 = vadd.xlane.f32.xlu0 %v2770_v7  ;;  %v2790_v9 = vpop.permute.xlu0 %2789  ;;  %v2995_v19 = vpop.xlane.xlu1 %2994 }
0x1296   : > { %5359 = vpow2.f32 %v3001_v37  ;;  %v2998_v13 = vsub.f32 %v2984_v17, %v2995_v19  ;;  %5055 = vmatpush3.msra.mxu1 %v2790_v9 }
0x1297   : > { %v5354_v45 = vpop.eup %5353  ;;  %5056 = vmatprep.subr.mxu1 %v5421_v1 }
0x1298   : > { %v3003_v51 = vmul.f32 1.442695, %v2998_v13  ;;  %v2773_v23 = vsel %vm980_vm5, %v5354_v45, 0.0 }
0x1299   : > { %2774 = vadd.xlane.f32.xlu1 %v2773_v23  ;;  %v2788_v24 = vpop.permute.xlu1 %2787 }
0x129a   : > { %5361 = vpow2.f32 %v3003_v51  ;;  %5057 = vmatpush3.msra.mxu1 %v2788_v24 }
0x129b   : > { %v5356_v25 = vpop.eup %5355  ;;  %5058 = vmatprep.subr.mxu1 %v5421_v1 }
0x129c   : > { %v2776_v26 = vsel %vm980_vm5, %v5356_v25, 0.0 }
0x129d   : > { %2777 = vadd.xlane.f32.xlu0 %v2776_v26  ;;  %v2786_v27 = vpop.permute.xlu1 %2785 }
0x129e   : > { %5059 = vmatpush3.msra.mxu1 %v2786_v27 }
0x129f   : > { %v5358_v28 = vpop.eup %5357  ;;  %5084 = vmatprep.subr.mxu1 %v5421_v1 }
0x12a0   : > { %v3005_v55 = vsel %vm980_vm5, %v5358_v28, 0.0 }
0x12a1   : > { %3006 = vadd.xlane.f32.xlu1 %v3005_v55  ;;  %v3025_v36 = vpop.permute.xlu1 %3024 }
0x12a3   : > { %v5360_v30 = vpop.eup %5359 }
0x12a4   : > { %v3008_v31 = vsel %vm980_vm5, %v5360_v30, 0.0 }
0x12a5   : > { %3009 = vadd.xlane.f32.xlu0 %v3008_v31 }
0x12a7   : > { %v5362_v33 = vpop.eup %5361 }
0x12a8   : > { %v3011_v35 = vsel %vm980_vm5, %v5362_v33, 0.0 }
0x12a9   : > { %3012 = vadd.xlane.f32.xlu1 %v3011_v35 }
0x12ba   : > { %3020 = vrot.lane.b32.xlu1 %v6105_v14, %s6584_s24 }
0x12bb   : > { %3022 = vrot.lane.b32.xlu0 %v6101_v15, %s6584_s24  ;;  %s6590_s24 = smov 40  }
0x12be   : > { %3304 = vrot.lane.b32.xlu1 %v6101_v15, %s6585_s2 }
0x12bf   : > { %3306 = vrot.lane.b32.xlu0 %v6107_v18, %s6585_s2 }
0x12c2   : > { %3296 = vrot.lane.b32.xlu1 %v6125_v11, %s6586_s25 }
0x12c3   : > { %3302 = vrot.lane.b32.xlu0 %v6105_v14, %s6585_s2 }
0x12c6   : > { %3300 = vrot.lane.b32.xlu1 %v6130_v16, %s6586_s25 }
0x12c7   : > { %3298 = vrot.lane.b32.xlu0 %v6114_v20, %s6586_s25 }
0x131e   : > { %v2772_v38 = vpop.xlane.xlu0 %2771 }
0x131f   : > { %5363 = vrcp.f32 %v2772_v38 }
0x1322   : > { %v2775_v39 = vpop.xlane.xlu1 %2774 }
0x1323   : > { %5365 = vrcp.f32 %v2775_v39 }
0x1326   : > { %v2778_v41 = vpop.xlane.xlu0 %2777 }
0x1327   : > { %5367 = vrcp.f32 %v2778_v41 }
0x132a   : > { %v3007_v42 = vpop.xlane.xlu1 %3006 }
0x132b   : > { %5369 = vrcp.f32 %v3007_v42 }
0x132c   : > { %v5364_v43 = vpop.eup %5363 }
0x132d   : > { %v2782_v44 = vmul.f32 %v5364_v43, %v5352_v6 }
0x132e   : > { %v3010_v46 = vpop.xlane.xlu0 %3009 }
0x132f   : > { %5371 = vrcp.f32 %v3010_v46  ;;  %5061 = vmatmul.mubr.msk.f32.vlgmr.msra.gmra.mxu1 %vm980_vm5, %v2782_v44 }
0x1330   : > { %v5366_v47 = vpop.eup %5365  ;;  %5085 = vmatpush3.msra.mxu1 %v3025_v36  ;;  %5063 = vmatprep.mubr.msk.f32.mxu1 %vm5422_vm0, %v5421_v1 }
0x1331   : > { %5086 = vmatprep.subr.mxu1 %v5421_v1  ;;  %v2783_v48 = vmul.f32 %v5366_v47, %v5354_v45 }
0x1332   : > { %v3023_v49 = vpop.permute.xlu0 %3022  ;;  %v3013_v50 = vpop.xlane.xlu1 %3012 }
0x1333   : > { %5373 = vrcp.f32 %v3013_v50  ;;  %5064 = vmatmul.mubr.msk.f32.gmra.mxu1 %vm980_vm5, %v2783_v48 }
0x1334   : > { %v5368_v52 = vpop.eup %5367  ;;  %5087 = vmatpush3.msra.mxu1 %v3023_v49  ;;  %5066 = vmatprep.mubr.msk.f32.mxu1 %vm5422_vm0, %v5421_v1 }
0x1335   : > { %5088 = vmatprep.subr.mxu1 %v5421_v1  ;;  %v2784_v53 = vmul.f32 %v5368_v52, %v5356_v25 }
0x1336   : > { %v3021_v54 = vpop.permute.xlu1 %3020  ;;  %v3307_v4 = vpop.permute.xlu0 %3306 }
0x1337   : > { %5067 = vmatmul.mubr.msk.f32.gmra.mxu1 %vm980_vm5, %v2784_v53 }
0x1338   : > { %v5370_v12 = vpop.eup %5369  ;;  %5089 = vmatpush3.msra.mxu1 %v3021_v54  ;;  %5090 = vmatprep.mubr.msk.f32.mxu1 %vm5422_vm0, %v5421_v1 }
0x1339   : > { %v3017_v17 = vmul.f32 %v5370_v12, %v5358_v28  ;;  %5110 = vmatprep.subr.mxu1 %v5421_v1 }
0x133a   : > { %v3305_v6 = vpop.permute.xlu1 %3304  ;;  %v3303_v9 = vpop.permute.xlu0 %3302 }
0x133b   : > { %5091 = vmatmul.mubr.msk.f32.vlgmr.msra.gmra.mxu1 %vm980_vm5, %v3017_v17 }
0x133c   : > { %v5372_v56 = vpop.eup %5371  ;;  %5093 = vmatprep.mubr.msk.f32.mxu1 %vm5422_vm0, %v5421_v1  ;;  %5111 = vmatpush3.msra.mxu1 %v4501_v60 }
0x133d   : > { %v3018_v57 = vmul.f32 %v5372_v56, %v5360_v30  ;;  %5136 = vmatprep.subr.mxu1 %v5421_v1 }
0x133e   : > { %v3297_v13 = vpop.permute.xlu1 %3296  ;;  %v3299_v45 = vpop.permute.xlu0 %3298 }
0x133f   : > { %5094 = vmatmul.mubr.msk.f32.gmra.mxu1 %vm980_vm5, %v3018_v57 }
0x1340   : > { %v5374_v58 = vpop.eup %5373  ;;  %5096 = vmatprep.mubr.msk.f32.mxu1 %vm5422_vm0, %v5421_v1 }
0x1341   : > { %v3019_v59 = vmul.f32 %v5374_v58, %v5362_v33 }
0x1342   : > { %v3301_v51 = vpop.permute.xlu1 %3300 }
0x1343   : > { %5097 = vmatmul.mubr.msk.f32.gmra.mxu1 %vm980_vm5, %v3019_v59 }
0x1344   : > { %5112 = vmatprep.mubr.msk.f32.mxu1 %vm5422_vm0, %v5421_v1 }
0x13ef   : > { %v2869_v62 = vpop.f32.mrf.mxu1 }
0x13f0   : > { %5113 = vmatmul.mubr.msk.f32.vlgmr.msra.gmra.mxu1 %vm884_vm3, %v2869_v62 }
0x13f1   : > { %v5062_v22 = vpop.f32.mrf.mxu1  ;;  %5115 = vmatprep.mubr.msk.f32.mxu1 %vm5422_vm0, %v5421_v1 }
0x13f3   : > { %v2874_v63 = vpop.f32.mrf.mxu1 }
0x13f4   : > { %5116 = vmatmul.mubr.msk.f32.gmra.mxu1 %vm884_vm3, %v2874_v63 }
0x13f5   : > { %v5065_v0 = vpop.f32.mrf.mxu1  ;;  %5118 = vmatprep.mubr.msk.f32.mxu1 %vm5422_vm0, %v5421_v1 }
0x13f7   : > { %v2879_v2 = vpop.f32.mrf.mxu1 }
0x13f8   : > { %5119 = vmatmul.mubr.msk.f32.gmra.mxu1 %vm884_vm3, %v2879_v2 }
0x13f9   : > { %v5068_v3 = vpop.f32.mrf.mxu1  ;;  %5142 = vmatprep.mubr.msk.f32.mxu1 %vm5422_vm0, %v5421_v1 }
0x13fb   : > { %v3104_v8 = vpop.f32.mrf.mxu1 }
0x13fc   : > { %5102 = vmatmul.mubr.msk.f32.vlgmr.msra.gmra.mxu0 %vm884_vm3, %v3104_v8 }
0x13fd   : > { %5122 = vmatpush3.xpose.msk.msra.mxu0 %vm884_vm3, %v3307_v4  ;;  %v5092_v34 = vpop.f32.mrf.mxu1  ;;  %5104 = vmatprep.mubr.msk.f32.mxu0 %vm5422_vm0, %v5421_v1 }
0x13fe   : > { %5123 = vmatprep.subr.mxu0 %v5421_v1 }
0x13ff   : > { %v3109_v5 = vpop.f32.mrf.mxu1 }
0x1400   : > { %5105 = vmatmul.mubr.msk.f32.gmra.mxu0 %vm884_vm3, %v3109_v5 }
0x1401   : > { %5124 = vmatpush3.xpose.msk.msra.mxu0 %vm884_vm3, %v3305_v6  ;;  %v5095_v37 = vpop.f32.mrf.mxu1  ;;  %5107 = vmatprep.mubr.msk.f32.mxu0 %vm5422_vm0, %v5421_v1 }
0x1402   : > { %5125 = vmatprep.subr.mxu0 %v5421_v1  ;;  %v4503_v37 = vld [vmem:[%s6540_s7 + $0x30] sm:$0xff] }
0x1403   : > { %v3114_v7 = vpop.f32.mrf.mxu1 }
0x1404   : > { %5108 = vmatmul.mubr.msk.f32.gmra.mxu0 %vm884_vm3, %v3114_v7 }
0x1405   : > { %5126 = vmatpush3.xpose.msk.msra.mxu0 %vm884_vm3, %v3303_v9  ;;  %v5098_v19 = vpop.f32.mrf.mxu1  ;;  %5127 = vmatprep.mubr.msk.f32.mxu0 %vm5422_vm0, %v5421_v1 }
0x1406   : > { %5151 = vmatprep.subr.mxu0 %v5421_v1 }
0x1408   : > { %5128 = vmatmul.mubr.msk.f32.vlgmr.msra.gmra.mxu0 %vm884_vm3, %v3297_v13 }
0x1409   : > { %5130 = vmatprep.mubr.msk.f32.mxu0 %vm5422_vm0, %v5421_v1  ;;  %5152 = vmatpush3.msra.mxu0 %v4503_v37 }
0x140a   : > { %5177 = vmatprep.subr.mxu0 %v5421_v1 }
0x140c   : > { %5131 = vmatmul.mubr.msk.f32.gmra.mxu0 %vm884_vm3, %v3299_v45 }
0x140d   : > { %5133 = vmatprep.mubr.msk.f32.mxu0 %vm5422_vm0, %v5421_v1 }
0x1410   : > { %5134 = vmatmul.mubr.msk.f32.gmra.mxu0 %vm884_vm3, %v3301_v51 }
0x1411   : > { %5153 = vmatprep.mubr.msk.f32.mxu0 %vm5422_vm0, %v5421_v1 }
0x14b0   : > { %v3282_v23 = vpop.f32.mrf.mxu1 }
0x14b2   : > { %v5114_v24 = vpop.f32.mrf.mxu1 }
0x14b4   : > { %v3287_v25 = vpop.f32.mrf.mxu1 }
0x14b6   : > { %v5117_v26 = vpop.f32.mrf.mxu1 }
0x14b8   : > { %v3292_v27 = vpop.f32.mrf.mxu1 }
0x14ba   : > { %v5120_v28 = vpop.f32.mrf.mxu1 }
0x14bc   : > { %v3193_v55 = vpop.f32.mrf.mxu0 }
0x14bd   : > { %v6274_v30 = vadd.f32 %v3282_v23, %v3193_v55 }
0x14be   : > { %v5103_v31 = vpop.f32.mrf.mxu0 }
0x14c0   : > { %v3198_v33 = vpop.f32.mrf.mxu0 }
0x14c1   : > { %v6276_v35 = vadd.f32 %v3287_v25, %v3198_v33 }
0x14c2   : > { %v5106_v36 = vpop.f32.mrf.mxu0 }
0x14c4   : > { %v3203_v38 = vpop.f32.mrf.mxu0 }
0x14c5   : > { %v6278_v39 = vadd.f32 %v3292_v27, %v3203_v38 }
0x14c6   : > { %v5109_v41 = vpop.f32.mrf.mxu0 }
0x14c8   : > { %v3386_v42 = vpop.f32.mrf.mxu0 }
0x14c9   : > { %v3387_v43 = vadd.f32 %v3386_v42, %v5713_v32 }
0x14ca   : > { %v5129_v44 = vpop.f32.mrf.mxu0 }
0x14cb   : > { %v3400_v46 = vsel %vm980_vm5, %v3387_v43, -inf }
0x14cc   : > { %3401 = vmax.xlane.f32.xlu0 %v3400_v46  ;;  %v3391_v47 = vpop.f32.mrf.mxu0 }
0x14cd   : > { %v3392_v48 = vadd.f32 %v3391_v47, %v5713_v32 }
0x14ce   : > { %v5132_v49 = vpop.f32.mrf.mxu0 }
0x14cf   : > { %v3403_v50 = vsel %vm980_vm5, %v3392_v48, -inf }
0x14d0   : > { %3404 = vmax.xlane.f32.xlu1 %v3403_v50  ;;  %v3396_v52 = vpop.f32.mrf.mxu0 }
0x14d1   : > { %v3397_v53 = vadd.f32 %v3396_v52, %v5713_v32 }
0x14d2   : > { %v5135_v54 = vpop.f32.mrf.mxu0 }
0x14d3   : > { %v3406_v12 = vsel %vm980_vm5, %v3397_v53, -inf }
0x14d4   : > { %3407 = vmax.xlane.f32.xlu0 %v3406_v12 }
0x14e1   : > { %3435 = vrot.lane.b32.xlu1 %v6101_v15, %s6587_s22 }
0x14e5   : > { %3433 = vrot.lane.b32.xlu1 %v6105_v14, %s6587_s22 }
0x14e9   : > { %3633 = vrot.lane.b32.xlu1 %v6107_v18, %s6588_s21 }
0x14ea   : > { %3437 = vrot.lane.b32.xlu0 %v6107_v18, %s6587_s22 }
0x1555   : > { %v3402_v17 = vpop.xlane.xlu0 %3401 }
0x1556   : > { %v3409_v56 = vsub.f32 %v3387_v43, %v3402_v17 }
0x1558   : > { %v3412_v57 = vmul.f32 1.442695, %v3409_v56 }
0x1559   : > { %v3405_v58 = vpop.xlane.xlu1 %3404 }
0x155a   : > { %5375 = vpow2.f32 %v3412_v57  ;;  %v3410_v59 = vsub.f32 %v3392_v48, %v3405_v58 }
0x155c   : > { %v3414_v60 = vmul.f32 1.442695, %v3410_v59 }
0x155d   : > { %v3408_v61 = vpop.xlane.xlu0 %3407  ;;  %v3436_v22 = vpop.permute.xlu1 %3435 }
0x155e   : > { %5377 = vpow2.f32 %v3414_v60  ;;  %v3411_v62 = vsub.f32 %v3397_v53, %v3408_v61 }
0x1560   : > { %v3416_v63 = vmul.f32 1.442695, %v3411_v62 }
0x1561   : > { %v3438_v0 = vpop.permute.xlu0 %3437  ;;  %v3434_v2 = vpop.permute.xlu1 %3433 }
0x1562   : > { %5379 = vpow2.f32 %v3416_v63  ;;  %5137 = vmatpush3.msra.mxu1 %v3438_v0 }
0x1563   : > { %5138 = vmatprep.subr.mxu1 %v5421_v1 }
0x1564   : > { %5139 = vmatpush3.msra.mxu1 %v3436_v22 }
0x1565   : > { %5140 = vmatprep.subr.mxu1 %v5421_v1  ;;  %v3634_v9 = vpop.permute.xlu1 %3633 }
0x1566   : > { %5141 = vmatpush3.msra.mxu1 %v3434_v2 }
0x1567   : > { %v5376_v3 = vpop.eup %5375  ;;  %5162 = vmatprep.subr.mxu1 %v5421_v1 }
0x1568   : > { %v3418_v8 = vsel %vm980_vm5, %v5376_v3, 0.0 }
0x1569   : > { %3419 = vadd.xlane.f32.xlu0 %v3418_v8 }
0x156b   : > { %v5378_v4 = vpop.eup %5377 }
0x156c   : > { %v3421_v34 = vsel %vm980_vm5, %v5378_v4, 0.0 }
0x156d   : > { %3422 = vadd.xlane.f32.xlu0 %v3421_v34 }
0x156f   : > { %v5380_v5 = vpop.eup %5379 }
0x1570   : > { %v3424_v6 = vsel %vm980_vm5, %v5380_v5, 0.0 }
0x1571   : > { %3425 = vadd.xlane.f32.xlu1 %v3424_v6 }
0x1582   : > { %3629 = vrot.lane.b32.xlu1 %v6105_v14, %s6588_s21 }
0x1583   : > { %3631 = vrot.lane.b32.xlu0 %v6101_v15, %s6588_s21 }
0x1587   : > { %3623 = vrot.lane.b32.xlu0 %v6125_v11, %s6589_s23 }
0x158b   : > { %3764 = vrot.lane.b32.xlu0 %v6107_v18, %s6590_s24 }
0x15f2   : > { %v3420_v7 = vpop.xlane.xlu0 %3419 }
0x15f3   : > { %5381 = vrcp.f32 %v3420_v7 }
0x15f6   : > { %v3423_v19 = vpop.xlane.xlu0 %3422 }
0x15f7   : > { %5383 = vrcp.f32 %v3423_v19 }
0x15fa   : > { %v3426_v13 = vpop.xlane.xlu1 %3425  ;;  %v3632_v23 = vpop.permute.xlu0 %3631 }
0x15fb   : > { %5385 = vrcp.f32 %v3426_v13 }
0x15fe   : > { %v3630_v26 = vpop.permute.xlu1 %3629  ;;  %v3624_v27 = vpop.permute.xlu0 %3623 }
0x1600   : > { %v5382_v45 = vpop.eup %5381 }
0x1601   : > { %v3430_v51 = vmul.f32 %v5382_v45, %v5376_v3 }
0x1602   : > { %v3765_v55 = vpop.permute.xlu0 %3764 }
0x1603   : > { %5143 = vmatmul.mubr.msk.f32.vlgmr.msra.gmra.mxu1 %vm980_vm5, %v3430_v51 }
0x1604   : > { %v5384_v11 = vpop.eup %5383  ;;  %5163 = vmatpush3.xpose.msk.msra.mxu1 %vm884_vm3, %v3634_v9  ;;  %5145 = vmatprep.mubr.msk.f32.mxu1 %vm5422_vm0, %v5421_v1 }
0x1605   : > { %5164 = vmatprep.subr.mxu1 %v5421_v1  ;;  %v3431_v18 = vmul.f32 %v5384_v11, %v5378_v4  ;;  %v4504_v4 = vld [vmem:[%s6540_s7 + $0x38] sm:$0xff] }
0x1607   : > { %5146 = vmatmul.mubr.msk.f32.gmra.mxu1 %vm980_vm5, %v3431_v18 }
0x1608   : > { %v5386_v24 = vpop.eup %5385  ;;  %5165 = vmatpush3.xpose.msk.msra.mxu1 %vm884_vm3, %v3632_v23  ;;  %5148 = vmatprep.mubr.msk.f32.mxu1 %vm5422_vm0, %v5421_v1 }
0x1609   : > { %5166 = vmatprep.subr.mxu1 %v5421_v1  ;;  %v3432_v25 = vmul.f32 %v5386_v24, %v5380_v5 }
0x160b   : > { %5149 = vmatmul.mubr.msk.f32.gmra.mxu1 %vm980_vm5, %v3432_v25 }
0x160c   : > { %5167 = vmatpush3.xpose.msk.msra.mxu1 %vm884_vm3, %v3630_v26  ;;  %5168 = vmatprep.mubr.msk.f32.mxu1 %vm5422_vm0, %v5421_v1 }
0x160d   : > { %5192 = vmatprep.subr.mxu1 %v5421_v1 }
0x160f   : > { %5169 = vmatmul.mubr.msk.f32.vlgmr.msra.gmra.mxu1 %vm884_vm3, %v3624_v27 }
0x1610   : > { %5171 = vmatprep.mubr.msk.f32.mxu1 %vm5422_vm0, %v5421_v1  ;;  %5193 = vmatpush3.msra.mxu1 %v4504_v4 }
0x1611   : > { %5220 = vmatprep.subr.mxu1 %v5421_v1 }
0x16c3   : > { %v3517_v28 = vpop.f32.mrf.mxu1 }
0x16c4   : > { %5154 = vmatmul.mubr.msk.f32.vlgmr.msra.gmra.mxu0 %vm884_vm3, %v3517_v28 }
0x16c5   : > { %5178 = vmatpush3.msra.mxu0 %v3765_v55  ;;  %v5144_v31 = vpop.f32.mrf.mxu1  ;;  %5156 = vmatprep.mubr.msk.f32.mxu0 %vm5422_vm0, %v5421_v1 }
0x16c6   : > { %5179 = vmatprep.subr.mxu0 %v5421_v1  ;;  %v4554_v31 = vld [vmem:[%s6541_s8 + $0x1] ss:$0 sm:$0xff] }
0x16c7   : > { %v3522_v33 = vpop.f32.mrf.mxu1 }
0x16c8   : > { %5157 = vmatmul.mubr.msk.f32.gmra.mxu0 %vm884_vm3, %v3522_v33 }
0x16c9   : > { %v5147_v36 = vpop.f32.mrf.mxu1  ;;  %5159 = vmatprep.mubr.msk.f32.mxu0 %vm5422_vm0, %v5421_v1 }
0x16cb   : > { %v3527_v38 = vpop.f32.mrf.mxu1 }
0x16cc   : > { %5160 = vmatmul.mubr.msk.f32.gmra.mxu0 %vm884_vm3, %v3527_v38 }
0x16cd   : > { %v5150_v41 = vpop.f32.mrf.mxu1  ;;  %5183 = vmatprep.mubr.msk.f32.mxu0 %vm5422_vm0, %v5421_v1 }
0x16cf   : > { %v3713_v42 = vpop.f32.mrf.mxu1 }
0x16d0   : > { %v3714_v43 = vadd.f32 %v3713_v42, %v5713_v32 }
0x16d1   : > { %v5170_v44 = vpop.f32.mrf.mxu1 }
0x16d2   : > { %v3727_v46 = vsel %vm980_vm5, %v3714_v43, -inf }
0x16d3   : > { %3728 = vmax.xlane.f32.xlu1 %v3727_v46 }
0x16e4   : > { %3625 = vrot.lane.b32.xlu1 %v6114_v20, %s6589_s23 }
0x16e8   : > { %3762 = vrot.lane.b32.xlu1 %v6101_v15, %s6590_s24 }
0x16ec   : > { %3627 = vrot.lane.b32.xlu1 %v6130_v16, %s6589_s23 }
0x175c   : > { %v3729_v47 = vpop.xlane.xlu1 %3728 }
0x175d   : > { %v3736_v48 = vsub.f32 %v3714_v43, %v3729_v47 }
0x175f   : > { %v3739_v49 = vmul.f32 1.442695, %v3736_v48 }
0x1760   : > { %v3626_v50 = vpop.permute.xlu1 %3625 }
0x1761   : > { %5387 = vpow2.f32 %v3739_v49  ;;  %5172 = vmatmul.mubr.msk.f32.gmra.mxu1 %vm884_vm3, %v3626_v50 }
0x1762   : > { %5174 = vmatprep.mubr.msk.f32.mxu1 %vm5422_vm0, %v5421_v1 }
0x1764   : > { %v3763_v52 = vpop.permute.xlu1 %3762 }
0x1765   : > { %5180 = vmatpush3.msra.mxu0 %v3763_v52  ;;  %v4562_v52 = vld [vmem:[%s6544_s11 + $0x38] sm:$0xff] }
0x1766   : > { %5181 = vmatprep.subr.mxu0 %v5421_v1 }
0x1768   : > { %v3628_v20 = vpop.permute.xlu1 %3627 }
0x1769   : > { %5175 = vmatmul.mubr.msk.f32.gmra.mxu1 %vm884_vm3, %v3628_v20  ;;  %v4561_v20 = vld [vmem:[%s6544_s11 + $0x30] sm:$0xff] }
0x176a   : > { %5194 = vmatprep.mubr.msk.f32.mxu1 %vm5422_vm0, %v5421_v1 }
0x176e   : > { %v5388_v15 = vpop.eup %5387 }
0x176f   : > { %v3745_v16 = vsel %vm980_vm5, %v5388_v15, 0.0 }
0x1770   : > { %3746 = vadd.xlane.f32.xlu0 %v3745_v16  ;;  %v4559_v16 = vld [vmem:[%s6544_s11 + $0x20] sm:$0xff] }
0x1784   : > { %v3606_v53 = vpop.f32.mrf.mxu0 }
0x1785   : > { %v3620_v54 = vadd.f32 %v3606_v53, %v6274_v30 }
0x1786   : > { %3760 = vrot.lane.b32.xlu0 %v6105_v14, %s6590_s24  ;;  %v5155_v12 = vpop.f32.mrf.mxu0 }
0x1788   : > { %v3611_v17 = vpop.f32.mrf.mxu0 }
0x1789   : > { %v6360_v56 = vadd.f32 %v3611_v17, %v6276_v35 }
0x178a   : > { %v5158_v57 = vpop.f32.mrf.mxu0 }
0x178b   : > { %v6423_v57 = vld [vmem:[%s6542_s9 + $0x1] ss:$0 sm:$0xff] }
0x178c   : > { %v3616_v58 = vpop.f32.mrf.mxu0 }
0x178d   : > { %v6363_v59 = vadd.f32 %v3616_v58, %v6278_v39 }
0x178e   : > { %v5161_v60 = vpop.f32.mrf.mxu0 }
0x178f   : > { %v6428_v60 = vld [vmem:[%s6543_s10 + $0x1] ss:$0 sm:$0xff] }
0x17f9   : > { %v3747_v61 = vpop.xlane.xlu0 %3746 }
0x17fa   : > { %5389 = vrcp.f32 %v3747_v61 }
0x17fd   : > { %v3761_v62 = vpop.permute.xlu0 %3760 }
0x17fe   : > { %5182 = vmatpush3.msra.mxu0 %v3761_v62 }
0x17ff   : > { %5203 = vmatprep.subr.mxu0 %v5421_v1 }
0x1807   : > { %v5390_v30 = vpop.eup %5389 }
0x1808   : > { %v3757_v22 = vmul.f32 %v5390_v30, %v5388_v15  ;;  %v4560_v15 = vld [vmem:[%s6544_s11 + $0x28] sm:$0xff] }
0x180a   : > { %5184 = vmatmul.mubr.msk.f32.vlgmr.msra.gmra.mxu0 %vm980_vm5, %v3757_v22 }
0x180b   : > { %5186 = vmatprep.mubr.msk.f32.mxu0 %vm5422_vm0, %v5421_v1  ;;  %5204 = vmatpush3.msra.mxu0 %v4562_v52 }
0x180c   : > { %5205 = vmatprep.subr.mxu0 %v5421_v1 }
0x180d   : > { %5206 = vmatpush3.msra.mxu0 %v4561_v20 }
0x180e   : > { %5207 = vmatprep.subr.mxu0 %v5421_v1 }
0x180f   : > { %5208 = vmatpush3.msra.mxu0 %v4560_v15 }
0x1810   : > { %5209 = vmatprep.subr.mxu0 %v5421_v1 }
0x1811   : > { %5210 = vmatpush3.msra.mxu0 %v4559_v16 }
0x1812   : > { %5245 = vmatprep.subr.mxu0 %v5421_v1 }
0x1821   : > { %v3718_v14 = vpop.f32.mrf.mxu1 }
0x1822   : > { %v3719_v35 = vadd.f32 %v3718_v14, %v5713_v32 }
0x1823   : > { %v5173_v63 = vpop.f32.mrf.mxu1 }
0x1824   : > { %v3730_v39 = vsel %vm980_vm5, %v3719_v35, -inf }
0x1825   : > { %3731 = vmax.xlane.f32.xlu0 %v3730_v39 }
0x1829   : > { %v3723_v0 = vpop.f32.mrf.mxu1 }
0x182a   : > { %v3724_v2 = vadd.f32 %v3723_v0, %v5713_v32 }
0x182b   : > { %v5176_v3 = vpop.f32.mrf.mxu1 }
0x182c   : > { %v3733_v8 = vsel %vm980_vm5, %v3724_v2, -inf }
0x182d   : > { %3734 = vmax.xlane.f32.xlu1 %v3733_v8 }
0x18ae   : > { %v3732_v34 = vpop.xlane.xlu0 %3731 }
0x18af   : > { %v3737_v5 = vsub.f32 %v3719_v35, %v3732_v34 }
0x18b1   : > { %v3741_v6 = vmul.f32 1.442695, %v3737_v5  ;;  %v4571_v5 = vld [vmem:[%s6546_s13 + $0x58] sm:$0xff] }
0x18b3   : > { %5391 = vpow2.f32 %v3741_v6  ;;  %v4570_v6 = vld [vmem:[%s6546_s13 + $0x50] sm:$0xff] }
0x18b6   : > { %v3735_v37 = vpop.xlane.xlu1 %3734 }
0x18b7   : > { %v3738_v7 = vsub.f32 %v3724_v2, %v3735_v37  ;;  %v4569_v37 = vld [vmem:[%s6546_s13 + $0x48] sm:$0xff] }
0x18b9   : > { %v3743_v9 = vmul.f32 1.442695, %v3738_v7  ;;  %v4568_v7 = vld [vmem:[%s6546_s13 + $0x40] sm:$0xff] }
0x18bb   : > { %5393 = vpow2.f32 %v3743_v9 }
0x18c0   : > { %v5392_v32 = vpop.eup %5391 }
0x18c1   : > { %v3748_v19 = vsel %vm980_vm5, %v5392_v32, 0.0 }
0x18c2   : > { %3749 = vadd.xlane.f32.xlu0 %v3748_v19 }
0x18c8   : > { %v5394_v13 = vpop.eup %5393 }
0x18c9   : > { %v3751_v45 = vsel %vm980_vm5, %v5394_v13, 0.0 }
0x18ca   : > { %3752 = vadd.xlane.f32.xlu0 %v3751_v45  ;;  %v3844_v51 = vpop.f32.mrf.mxu0 }
0x18cb   : > { %5195 = vmatmul.mubr.msk.f32.vlgmr.msra.gmra.mxu1 %vm884_vm3, %v3844_v51 }
0x18cc   : > { %v5185_v11 = vpop.f32.mrf.mxu0  ;;  %5197 = vmatprep.mubr.msk.f32.mxu1 %vm5422_vm0, %v5421_v1 }
0x194b   : > { %v3750_v18 = vpop.xlane.xlu0 %3749 }
0x194c   : > { %5395 = vrcp.f32 %v3750_v18 }
0x1953   : > { %v3753_v23 = vpop.xlane.xlu0 %3752 }
0x1954   : > { %5397 = vrcp.f32 %v3753_v23 }
0x1959   : > { %v5396_v24 = vpop.eup %5395 }
0x195a   : > { %v3758_v25 = vmul.f32 %v5396_v24, %v5392_v32 }
0x195c   : > { %5187 = vmatmul.mubr.msk.f32.gmra.mxu0 %vm980_vm5, %v3758_v25  ;;  %v4564_v25 = vld [vmem:[%s6545_s12 + $0x1] ss:$0 sm:$0xff] }
0x195d   : > { %5189 = vmatprep.mubr.msk.f32.mxu0 %vm5422_vm0, %v5421_v1 }
0x1961   : > { %v5398_v26 = vpop.eup %5397 }
0x1962   : > { %v3759_v27 = vmul.f32 %v5398_v26, %v5394_v13 }
0x1964   : > { %5190 = vmatmul.mubr.msk.f32.gmra.mxu0 %vm980_vm5, %v3759_v27 }
0x1965   : > { %5211 = vmatprep.mubr.msk.f32.mxu0 %vm5422_vm0, %v5421_v1 }
0x198b   : > { %v3933_v28 = vpop.f32.mrf.mxu1 }
0x198c   : > { %v3947_v55 = vadd.f32 %v3933_v28, %v3620_v54 }
0x198d   : > { %v5196_v33 = vpop.f32.mrf.mxu1 }
0x198e   : > { %v3950_v36 = vadd.f32 %v3947_v55, %v6047_v10 }
0x1990   : > { %v6392_v38 = vadd.f32 %v4554_v31, %v3950_v36 }
0x1992   : > { %v3968_v41 = vsel %vm709_vm2, %v6392_v38, 0.0 }
0x1993   : > { %3969 = vadd.xlane.f32.xlu0 %v3968_v41 }
0x1a1c   : > { %v3970_v42 = vpop.xlane.xlu0 %3969  ;;  %v3849_v43 = vpop.f32.mrf.mxu0 }
0x1a1d   : > { %v3977_v44 = vmul.f32 0.03125, %v3970_v42  ;;  %5198 = vmatmul.mubr.msk.f32.gmra.mxu1 %vm884_vm3, %v3849_v43 }
0x1a1e   : > { %v5188_v46 = vpop.f32.mrf.mxu0  ;;  %5200 = vmatprep.mubr.msk.f32.mxu1 %vm5422_vm0, %v5421_v1 }
0x1a1f   : > { %v3980_v47 = vsub.f32 %v6392_v38, %v3977_v44 }
0x1a21   : > { %v3983_v48 = vmul.f32 %v3980_v47, %v3980_v47 }
0x1a23   : > { %v3986_v10 = vsel %vm709_vm2, %v3983_v48, 0.0 }
0x1a24   : > { %3987 = vadd.xlane.f32.xlu1 %v3986_v10  ;;  %v3854_v49 = vpop.f32.mrf.mxu0 }
0x1a25   : > { %5201 = vmatmul.mubr.msk.f32.gmra.mxu1 %vm884_vm3, %v3854_v49 }
0x1a26   : > { %v5191_v50 = vpop.f32.mrf.mxu0  ;;  %5236 = vmatprep.mubr.msk.f32.mxu1 %vm5422_vm0, %v5421_v1 }
0x1aad   : > { %v3988_v53 = vpop.xlane.xlu1 %3987 }
0x1aae   : > { %v3995_v54 = vmul.f32 0.03125, %v3988_v53 }
0x1ab0   : > { %v3998_v12 = vadd.f32 1e-06, %v3995_v54 }
0x1ab2   : > { %5399 = vrsqrt.f32 %v3998_v12  ;;  %v4580_v12 = vld [vmem:[%s6547_s14 + $0x1] ss:$0 sm:$0xff] }
0x1abf   : > { %v5400_v17 = vpop.eup %5399 }
0x1ac0   : > { %v4004_v58 = vmul.f32 %v5400_v17, %v3980_v47 }
0x1ac2   : > { %v4013_v61 = vmul.f32 %v6423_v57, %v4004_v58 }
0x1ac4   : > { %v4022_v62 = vadd.f32 %v6428_v60, %v4013_v61 }
0x1ac6   : > { %5212 = vmatmul.mubr.msk.f32.vlgmr.msra.gmra.mxu0 %vm709_vm2, %v4022_v62 }
0x1ac7   : > { %5214 = vmatprep.mubr.msk.f32.mxu0 %vm5422_vm0, %v5421_v1 }
0x1add   : > { %v3938_v30 = vpop.f32.mrf.mxu1 }
0x1ade   : > { %v3948_v22 = vadd.f32 %v3938_v30, %v6360_v56  ;;  %v4575_v56 = vld [vmem:[%s6546_s13 + $0x78] sm:$0xff] }
0x1adf   : > { %v5199_v14 = vpop.f32.mrf.mxu1  ;;  %5221 = vmatpush3.msra.mxu1 %v4575_v56 }
0x1ae0   : > { %v3951_v35 = vadd.f32 %v3948_v22, %v6052_v21  ;;  %5222 = vmatprep.subr.mxu1 %v5421_v1  ;;  %v4574_v21 = vld [vmem:[%s6546_s13 + $0x70] sm:$0xff] }
0x1ae1   : > { %5223 = vmatpush3.msra.mxu1 %v4574_v21 }
0x1ae2   : > { %v3962_v63 = vadd.f32 %v4554_v31, %v3951_v35  ;;  %5224 = vmatprep.subr.mxu1 %v5421_v1 }
0x1ae4   : > { %v3971_v39 = vsel %vm709_vm2, %v3962_v63, 0.0 }
0x1ae5   : > { %3972 = vadd.xlane.f32.xlu0 %v3971_v39  ;;  %v3943_v0 = vpop.f32.mrf.mxu1 }
0x1ae6   : > { %v3949_v2 = vadd.f32 %v3943_v0, %v6363_v59  ;;  %v4572_v59 = vld [vmem:[%s6546_s13 + $0x60] sm:$0xff] }
0x1ae7   : > { %v5202_v3 = vpop.f32.mrf.mxu1 }
0x1ae8   : > { %v3952_v8 = vadd.f32 %v3949_v2, %v6057_v40  ;;  %v4573_v40 = vld [vmem:[%s6546_s13 + $0x68] sm:$0xff] }
0x1ae9   : > { %5225 = vmatpush3.msra.mxu1 %v4573_v40 }
0x1aea   : > { %v3963_v4 = vadd.f32 %v4554_v31, %v3952_v8  ;;  %5226 = vmatprep.subr.mxu1 %v5421_v1 }
0x1aeb   : > { %5227 = vmatpush3.msra.mxu1 %v4572_v59 }
0x1aec   : > { %v3974_v34 = vsel %vm709_vm2, %v3963_v4, 0.0  ;;  %5228 = vmatprep.subr.mxu1 %v5421_v1 }
0x1aed   : > { %3975 = vadd.xlane.f32.xlu1 %v3974_v34  ;;  %5229 = vmatpush3.msra.mxu1 %v4571_v5 }
0x1aee   : > { %5230 = vmatprep.subr.mxu1 %v5421_v1 }
0x1aef   : > { %5231 = vmatpush3.msra.mxu1 %v4570_v6 }
0x1af0   : > { %5232 = vmatprep.subr.mxu1 %v5421_v1 }
0x1af1   : > { %5233 = vmatpush3.msra.mxu1 %v4569_v37  ;;  %v4280_v37 = vld [vmem:[%s6550_s17 + $0x18] sm:$0xff] }
0x1af2   : > { %5234 = vmatprep.subr.mxu1 %v5421_v1  ;;  %5246 = vmatpush3.msra.mxu0 %v4280_v37 }
0x1af3   : > { %5235 = vmatpush3.msra.mxu1 %v4568_v7  ;;  %5247 = vmatprep.subr.mxu0 %v5421_v1  ;;  %v4279_v7 = vld [vmem:[%s6550_s17 + $0x10] sm:$0xff] }
0x1af4   : > { %5248 = vmatpush3.msra.mxu0 %v4279_v7 }
0x1af5   : > { %5249 = vmatprep.subr.mxu0 %v5421_v1 }
0x1b6e   : > { %v3973_v9 = vpop.xlane.xlu0 %3972 }
0x1b6f   : > { %v3978_v32 = vmul.f32 0.03125, %v3973_v9  ;;  %v4278_v9 = vld [vmem:[%s6550_s17 + $0x8] sm:$0xff] }
0x1b70   : > { %5250 = vmatpush3.msra.mxu0 %v4278_v9 }
0x1b71   : > { %v3981_v19 = vsub.f32 %v3962_v63, %v3978_v32  ;;  %v4277_v32 = vld [vmem:[%s6550_s17] sm:$0xff]  ;;  %5251 = vmatprep.subr.mxu0 %v5421_v1 }
0x1b72   : > { %5252 = vmatpush3.msra.mxu0 %v4277_v32 }
0x1b73   : > { %v3984_v13 = vmul.f32 %v3981_v19, %v3981_v19 }
0x1b75   : > { %v3989_v45 = vsel %vm709_vm2, %v3984_v13, 0.0 }
0x1b76   : > { %3990 = vadd.xlane.f32.xlu0 %v3989_v45  ;;  %v3976_v51 = vpop.xlane.xlu1 %3975 }
0x1b77   : > { %v3979_v11 = vmul.f32 0.03125, %v3976_v51 }
0x1b79   : > { %v3982_v18 = vsub.f32 %v3963_v4, %v3979_v11  ;;  %v4581_v11 = vld [vmem:[%s6548_s15] ss:$0 sm:$0xff] }
0x1b7b   : > { %v3985_v23 = vmul.f32 %v3982_v18, %v3982_v18 }
0x1b7d   : > { %v3992_v24 = vsel %vm709_vm2, %v3985_v23, 0.0  ;;  %v4582_v23 = vld [vmem:[%s6549_s16] ss:$0 sm:$0xff] }
0x1b7e   : > { %3993 = vadd.xlane.f32.xlu1 %v3992_v24 }
0x1b86   : > { %v4113_v26 = vpop.f32.mrf.mxu0 }
0x1b87   : > { %v4114_v27 = vadd.f32 %v4564_v25, %v4113_v26 }
0x1b88   : > { %v5213_v28 = vpop.f32.mrf.mxu0 }
0x1b89   : > { %v4130_v55 = vmul.f32 0.70710677, %v4114_v27  ;;  %v4127_v33 = vmul.f32 0.5, %v4114_v27 }
0x1b8b   : > { %5401 = verf.f32 %v4130_v55  ;;  %v4356_v55 = vshrl.u32 %v601_v29, 7 }
0x1b98   : > { %v5402_v31 = vpop.eup %5401 }
0x1b99   : > { %v4136_v36 = vadd.f32 1.0, %v5402_v31  ;;  %v4281_v31 = vld [vmem:[%s6551_s18] sm:$0x1] }
0x1b9b   : > { %v4139_v41 = vmul.f32 %v4136_v36, %v4127_v33  ;;  %v4357_v33 = vsub.s32 0, %v4356_v55 }
0x1b9d   : > { %5237 = vmatmul.mubr.msk.f32.vlgmr.msra.gmra.mxu1 %vm2374_vm6, %v4139_v41 }
0x1b9e   : > { %5239 = vmatprep.mubr.msk.f32.mxu1 %vm5422_vm0, %v5421_v1 }
0x1bff   : > { %v3991_v42 = vpop.xlane.xlu0 %3990 }
0x1c00   : > { %v3996_v43 = vmul.f32 0.03125, %v3991_v42 }
0x1c02   : > { %v3999_v44 = vadd.f32 1e-06, %v3996_v43 }
0x1c04   : > { %5403 = vrsqrt.f32 %v3999_v44 }
0x1c07   : > { %v3994_v46 = vpop.xlane.xlu1 %3993 }
0x1c08   : > { %v3997_v47 = vmul.f32 0.03125, %v3994_v46 }
0x1c0a   : > { %v4000_v48 = vadd.f32 1e-06, %v3997_v47 }
0x1c0c   : > { %5405 = vrsqrt.f32 %v4000_v48 }
0x1c11   : > { %v5404_v10 = vpop.eup %5403 }
0x1c12   : > { %v4005_v49 = vmul.f32 %v5404_v10, %v3981_v19 }
0x1c14   : > { %v4014_v50 = vmul.f32 %v6423_v57, %v4005_v49 }
0x1c16   : > { %v4023_v52 = vadd.f32 %v6428_v60, %v4014_v50 }
0x1c18   : > { %5215 = vmatmul.mubr.msk.f32.gmra.mxu0 %vm709_vm2, %v4023_v52 }
0x1c19   : > { %v5406_v20 = vpop.eup %5405  ;;  %5217 = vmatprep.mubr.msk.f32.mxu0 %vm5422_vm0, %v5421_v1 }
0x1c1a   : > { %v4006_v15 = vmul.f32 %v5406_v20, %v3982_v18 }
0x1c1c   : > { %v4015_v16 = vmul.f32 %v6423_v57, %v4006_v15 }
0x1c1e   : > { %v4024_v53 = vadd.f32 %v6428_v60, %v4015_v16 }
0x1c20   : > { %5218 = vmatmul.mubr.msk.f32.gmra.mxu0 %vm709_vm2, %v4024_v53 }
0x1c21   : > { %5253 = vmatprep.mubr.msk.f32.mxu0 %vm5422_vm0, %v5421_v1 }
0x1c5d   : > { %v4226_v54 = vpop.f32.mrf.mxu1 }
0x1c5e   : > { %v4238_v17 = vadd.f32 %v4226_v54, %v6392_v38 }
0x1c5f   : > { %v5238_v58 = vpop.f32.mrf.mxu1 }
0x1c60   : > { %v4247_v61 = vadd.f32 %v4580_v12, %v4238_v17 }
0x1c62   : > { %v4250_v62 = vsel %vm709_vm2, %v4247_v61, 0.0 }
0x1c63   : > { %4251 = vadd.xlane.f32.xlu0 %v4250_v62 }
0x1cd8   : > { %v4118_v57 = vpop.f32.mrf.mxu0 }
0x1cd9   : > { %v4119_v30 = vadd.f32 %v4564_v25, %v4118_v57 }
0x1cda   : > { %v5216_v60 = vpop.f32.mrf.mxu0 }
0x1cdb   : > { %v4131_v22 = vmul.f32 0.70710677, %v4119_v30  ;;  %v4128_v2 = vmul.f32 0.5, %v4119_v30 }
0x1cdd   : > { %5407 = verf.f32 %v4131_v22 }
0x1ce0   : > { %v4123_v14 = vpop.f32.mrf.mxu0 }
0x1ce1   : > { %v4124_v35 = vadd.f32 %v4564_v25, %v4123_v14 }
0x1ce2   : > { %v5219_v63 = vpop.f32.mrf.mxu0 }
0x1ce3   : > { %v4132_v39 = vmul.f32 0.70710677, %v4124_v35  ;;  %v4129_v40 = vmul.f32 0.5, %v4124_v35 }
0x1ce5   : > { %5409 = verf.f32 %v4132_v39 }
0x1cea   : > { %v5408_v0 = vpop.eup %5407 }
0x1ceb   : > { %v4137_v3 = vadd.f32 1.0, %v5408_v0 }
0x1cec   : > { %v4252_v8 = vpop.xlane.xlu0 %4251 }
0x1ced   : > { %v4140_v38 = vmul.f32 %v4137_v3, %v4128_v2  ;;  %v4253_v4 = vmul.f32 0.03125, %v4252_v8 }
0x1cef   : > { %v4254_v34 = vsub.f32 %v4247_v61, %v4253_v4  ;;  %5240 = vmatmul.mubr.msk.f32.gmra.mxu1 %vm2374_vm6, %v4140_v38 }
0x1cf0   : > { %5242 = vmatprep.mubr.msk.f32.mxu1 %vm5422_vm0, %v5421_v1 }
0x1cf1   : > { %v4255_v56 = vmul.f32 %v4254_v34, %v4254_v34 }
0x1cf2   : > { %v5410_v21 = vpop.eup %5409 }
0x1cf3   : > { %v4138_v59 = vadd.f32 1.0, %v5410_v21  ;;  %v4256_v5 = vsel %vm709_vm2, %v4255_v56, 0.0 }
0x1cf4   : > { %4257 = vadd.xlane.f32.xlu1 %v4256_v5 }
0x1cf5   : > { %v4141_v6 = vmul.f32 %v4138_v59, %v4129_v40 }
0x1cf7   : > { %5243 = vmatmul.mubr.msk.f32.gmra.mxu1 %vm2374_vm6, %v4141_v6 }
0x1d7d   : > { %v4258_v19 = vpop.xlane.xlu1 %4257 }
0x1d7e   : > { %v4259_v13 = vmul.f32 0.03125, %v4258_v19 }
0x1d80   : > { %v4260_v45 = vadd.f32 1e-06, %v4259_v13 }
0x1d82   : > { %5411 = vrsqrt.f32 %v4260_v45 }
0x1d8f   : > { %v5412_v51 = vpop.eup %5411 }
0x1d90   : > { %v4262_v18 = vmul.f32 %v5412_v51, %v4254_v34 }
0x1d92   : > { %v4269_v24 = vmul.f32 %v4581_v11, %v4262_v18 }
0x1d94   : > { %v4276_v25 = vadd.f32 %v4582_v23, %v4269_v24 }
0x1d96   : > { %5254 = vmatmul.mubr.msk.f32.vlgmr.msra.gmra.mxu0 %vm709_vm2, %v4276_v25 }
0x1daf   : > { %v4231_v1 = vpop.f32.mrf.mxu1 }
0x1db1   : > { %v5241_v26 = vpop.f32.mrf.mxu1 }
0x1db7   : > { %v4235_v27 = vpop.f32.mrf.mxu1 }
0x1db9   : > { %v5244_v28 = vpop.f32.mrf.mxu1 }
0x1e56   : > { %v4351_v36 = vpop.f32.mrf.mxu0 }
0x1e57   : > { %v4352_v41 = vadd.f32 %v4351_v36, %v4281_v31 }
0x1e58   : > { %v5255_v42 = vpop.f32.mrf.mxu0 }
0x1e59   : > { %v4358_v43 = vrot.slane %v4352_v41, %v4357_v33 }
0x1e5b   : > { %4359 = vst [vmem:[%s600_s20] sm:$0xff] %v4358_v43 }
0x1e5c PF: > { %s29_s0 = sadd.s32 1, %s5419_s0  }
0x1e5d   : > { %p26_p4 = scmp.ge.s32.totalorder %s29_s0, 4  }
0x1e5f   :  { %28 = sbr.rel (!%p26_p4) target bundleno = 5 (0x5), region = 138 }

</bundles_post_ra>
